<compile_context>
chip_gen: v7x
topology: tpu7x:2x2x1
jax: 0.10.0
libtpu: 0.0.40
codegen_flags: <defaults>
</compile_context>

<pallas_src>
import numpy as np

import jax
import jax.numpy as jnp
from jax.experimental import pallas as pl
from jax.experimental.pallas import tpu as pltpu

_EPS = 1e-5
_TAP = 128          # lane stride between the K tap blocks inside a packed weight


# ---------------------------------------------------------------------------
# Host-side packing helpers (run once, outside jit)
# ---------------------------------------------------------------------------
class _RowPacker:
    """Packs 2-D blocks into one zero-padded (rows, width) array, row-major."""

    def __init__(self, row_align=8):
        self._row_align = row_align
        self._blocks = []            # (name, np.ndarray)
        self.layout = {}             # name -> (row_offset, rows, cols)
        self._rows = 0
        self._width = 0

    def add(self, name, arr):
        a = np.asarray(arr, dtype=np.float32)
        assert a.ndim == 2 and name not in self.layout
        r, c = a.shape
        self.layout[name] = (self._rows, r, c)
        self._blocks.append((name, a))
        self._rows += -(-r // self._row_align) * self._row_align
        self._width = max(self._width, c)

    def pack(self, dtype):
        buf = np.zeros((self._rows, self._width), np.float32)
        for name, a in self._blocks:
            off, r, c = self.layout[name]
            buf[off:off + r, :c] = a
        return jnp.asarray(buf, dtype=dtype)


def _sel_conv(l_out, l_in, stride, tap):
    """S[t, i] = 1 iff i == stride*t + tap (regular conv tap selection)."""
    s = np.zeros((l_out, l_in), np.float32)
    s[np.arange(l_out), stride * np.arange(l_out) + tap] = 1.0
    return s


def _sel_reflect(l, tap):
    """ReflectionPad1d(1) + k=3 conv tap: source index = reflect(t + tap - 1)."""
    src = np.abs(np.arange(l) + tap - 1)
    src = np.where(src > l - 1, 2 * (l - 1) - src, src)
    s = np.zeros((l, l), np.float32)
    s[np.arange(l), src] = 1.0
    return s


def _sel_convT(l_out, l_in, stride, tap):
    """S[p, t] = 1 iff p == stride*t + tap (transposed-conv tap scatter)."""
    t = np.arange(l_in)
    p = stride * t + tap
    ok = p < l_out
    s = np.zeros((l_out, l_in), np.float32)
    s[p[ok], t[ok]] = 1.0
    return s


def _bdiag(s, n):
    """Block-diagonal over the batch (samples are stacked sample-major)."""
    return np.kron(np.eye(n, dtype=np.float32), s)


def _pack_conv_w(w):
    # PyTorch Conv1d weight (C_out, C_in, K) -> (C_in, K*_TAP); tap k occupies
    # lanes [k*_TAP, k*_TAP + C_out) so per-tap slices are 128-lane aligned.
    w = np.asarray(w, np.float32)
    cout, cin, k = w.shape
    buf = np.zeros((cin, k * _TAP), np.float32)
    for kk in range(k):
        buf[:, kk * _TAP:kk * _TAP + cout] = w[:, :, kk].T
    return buf


def _pack_convT_w(w):
    # PyTorch ConvTranspose1d weight (C_in, C_out, K) -> (C_in, K*_TAP).
    w = np.asarray(w, np.float32)
    cin, cout, k = w.shape
    buf = np.zeros((cin, k * _TAP), np.float32)
    for kk in range(k):
        buf[:, kk * _TAP:kk * _TAP + cout] = w[:, :, kk]
    return buf


# ---------------------------------------------------------------------------
# The fused Generator kernel
# ---------------------------------------------------------------------------
def _make_kernel(n, in_lens, signal_nc, mats_layout, wts_layout, vecs_layout):
    l1, l2, l3, l4, l5 = in_lens        # instance-norm spatial lengths

    def kernel(x_ref, mats_ref, wts_ref, vecs_ref, out_ref):
        # ----- packed-parameter accessors (static row/col slices of the refs)
        def mat(name):
            off, r, c = mats_layout[name]
            return mats_ref[off:off + r, 0:c]          # bf16 (r, c)

        def wt(name):
            off, r, c = wts_layout[name]
            return wts_ref[off:off + r, 0:c]           # bf16 (C_in, 3*_TAP)

        def vec(name):
            off, _, c = vecs_layout[name]
            return vecs_ref[off:off + 1, 0:c]          # f32 (1, c)

        # ----- one conv layer = 1 weight matmul + <=3 tiny spatial matmuls
        def conv(h, sel_names, w_name, cout, bias_name=None):
            # h: (R_in, C_in) f32.  g[:, k*_TAP : k*_TAP+cout] = h @ W_k.
            g = jnp.dot(h.astype(jnp.bfloat16), wt(w_name),
                        preferred_element_type=jnp.float32)
            out = None
            for k, sn in enumerate(sel_names):
                gk = g[:, k * _TAP:k * _TAP + cout]    # 128-lane-aligned slice
                if sn is None:                          # identity spatial tap
                    term = gk
                else:
                    term = jnp.dot(mat(sn), gk.astype(jnp.bfloat16),
                                   preferred_element_type=jnp.float32)
                out = term if out is None else out + term
            if bias_name is not None:
                out = out + vec(bias_name)
            return out

        # ----- InstanceNorm1d (+ReLU): per-sample/per-channel stats, f32
        def instance_norm_relu(h, l, relu=True):
            row = jax.lax.broadcasted_iota(jnp.int32, h.shape, 0)
            masks = [jnp.where((row >= i * l) & (row < (i + 1) * l), 1.0, 0.0)
                     for i in range(n)]
            inv_l = 1.0 / float(l)
            mean = None
            for m in masks:
                mi = jnp.sum(h * m, axis=0, keepdims=True) * inv_l
                mean = mi * m if mean is None else mean + mi * m
            cent = h - mean
            var = None
            for m in masks:
                vi = jnp.sum(cent * cent * m, axis=0, keepdims=True) * inv_l
                var = vi * m if var is None else var + vi * m
            y = cent * jax.lax.rsqrt(var + _EPS)
            return jnp.maximum(y, 0.0) if relu else y

        # ----- training-mode BatchNorm1d: per-channel stats over all N*L rows
        def batch_norm(h, g_name, b_name):
            m = jnp.mean(h, axis=0, keepdims=True)
            v = jnp.mean((h - m) * (h - m), axis=0, keepdims=True)
            return (h - m) * jax.lax.rsqrt(v + _EPS) * vec(g_name) + vec(b_name)

        h = x_ref[...]                                  # (N*L0, C_in) f32

        # ---- encoder: Conv(k3,s1)+IN+ReLU, Conv(k3,s2)+IN+ReLU, Conv(k3,s2)+IN+ReLU
        h = conv(h, ("enc1_s0", "enc1_s1", "enc1_s2"), "enc1_w", 16, "enc1_b")
        h = instance_norm_relu(h, l1)
        h = conv(h, ("enc2_s0", "enc2_s1", "enc2_s2"), "enc2_w", 32, "enc2_b")
        h = instance_norm_relu(h, l2)
        h = conv(h, ("enc3_s0", "enc3_s1", "enc3_s2"), "enc3_w", 64, "enc3_b")
        h = instance_norm_relu(h, l3)

        # ---- bottleneck: 4 x ResnetBlock(64)
        #      x + BN(Conv(refl_pad(ReLU(BN(Conv(refl_pad(x)))))))
        for b in range(4):
            t = conv(h, ("res_s0", None, "res_s2"), f"res{b}_w1", 64)
            t = jnp.maximum(batch_norm(t, f"res{b}_g1", f"res{b}_b1"), 0.0)
            t = conv(t, ("res_s0", None, "res_s2"), f"res{b}_w2", 64)
            t = batch_norm(t, f"res{b}_g2", f"res{b}_b2")
            h = h + t

        # ---- decoder: ConvT(k3,s2)+IN+ReLU, ConvT(k3,s2)+IN+ReLU, ConvT(k3,s1)
        h = conv(h, ("dec1_s0", "dec1_s1", "dec1_s2"), "dec1_w", 32)
        h = instance_norm_relu(h, l4)
        h = conv(h, ("dec2_s0", "dec2_s1", "dec2_s2"), "dec2_w", 16)
        h = instance_norm_relu(h, l5)
        h = conv(h, ("dec3_s0", "dec3_s1", "dec3_s2"), "dec3_w", signal_nc)

        out_ref[...] = h.astype(out_ref.dtype)

    return kernel


# ---------------------------------------------------------------------------
# Wrapper: host-side packing + a single pallas_call
# ---------------------------------------------------------------------------
def make_generator_forward(params, n, l0):
    """Builds a jitted forward(x) for x of shape (n, gen_input_nc, l0) (NCL)."""
    gen_input_nc = int(params["enc1_w"].shape[1])
    signal_nc = int(params["dec3_w"].shape[1])

    l1 = l0 - 2
    l2 = (l1 - 3) // 2 + 1
    l3 = (l2 - 3) // 2 + 1
    l4 = 2 * l3 + 1
    l5 = 2 * l4 + 1
    l6 = l5 + 2

    # --- spatial selection matrices (block-diagonal over the batch)
    mats = _RowPacker(row_align=16)
    for j in range(3):
        mats.add(f"enc1_s{j}", _bdiag(_sel_conv(l1, l0, 1, j), n))
        mats.add(f"enc2_s{j}", _bdiag(_sel_conv(l2, l1, 2, j), n))
        mats.add(f"enc3_s{j}", _bdiag(_sel_conv(l3, l2, 2, j), n))
        mats.add(f"dec1_s{j}", _bdiag(_sel_convT(l4, l3, 2, j), n))
        mats.add(f"dec2_s{j}", _bdiag(_sel_convT(l5, l4, 2, j), n))
        mats.add(f"dec3_s{j}", _bdiag(_sel_convT(l6, l5, 1, j), n))
    for j in (0, 2):   # reflect-pad conv: tap 1 is the identity (no matrix)
        mats.add(f"res_s{j}", _bdiag(_sel_reflect(l3, j), n))

    # --- conv weights, flattened with 128-lane-aligned tap blocks
    wts = _RowPacker(row_align=16)
    wts.add("enc1_w", _pack_conv_w(params["enc1_w"]))
    wts.add("enc2_w", _pack_conv_w(params["enc2_w"]))
    wts.add("enc3_w", _pack_conv_w(params["enc3_w"]))
    for b in range(4):
        wts.add(f"res{b}_w1", _pack_conv_w(params[f"res{b}_w1"]))
        wts.add(f"res{b}_w2", _pack_conv_w(params[f"res{b}_w2"]))
    wts.add("dec1_w", _pack_convT_w(params["dec1_w"]))
    wts.add("dec2_w", _pack_convT_w(params["dec2_w"]))
    wts.add("dec3_w", _pack_convT_w(params["dec3_w"]))

    # --- biases + BN gamma/beta (kept in f32)
    vecs = _RowPacker(row_align=8)
    for nm in ("enc1_b", "enc2_b", "enc3_b"):
        vecs.add(nm, np.asarray(params[nm], np.float32)[None, :])
    for b in range(4):
        for nm in (f"res{b}_g1", f"res{b}_b1", f"res{b}_g2", f"res{b}_b2"):
            vecs.add(nm, np.asarray(params[nm], np.float32)[None, :])

    mats_arr = mats.pack(jnp.bfloat16)     # 0/1 entries: exact in bf16
    wts_arr = wts.pack(jnp.bfloat16)
    vecs_arr = vecs.pack(jnp.float32)

    kernel = _make_kernel(n, (l1, l2, l3, l4, l5), signal_nc,
                          mats.layout, wts.layout, vecs.layout)

    out_shape = (n * l6, signal_nc)

    def _spec(shape):
        return pl.BlockSpec(shape, lambda i: (0, 0))

    pc = pl.pallas_call(
        kernel,
        out_shape=jax.ShapeDtypeStruct(out_shape, jnp.float32),
        grid=(1,),
        in_specs=[_spec((n * l0, gen_input_nc)),
                  _spec(mats_arr.shape),
                  _spec(wts_arr.shape),
                  _spec(vecs_arr.shape)],
        out_specs=_spec(out_shape),
        compiler_params=pltpu.CompilerParams(
            dimension_semantics=("arbitrary",)),
    )

    @jax.jit
    def _run(x, mats_a, wts_a, vecs_a):
        # NCL -> stacked channels-last (N*L0, C_in)
        xs = jnp.transpose(x, (0, 2, 1)).reshape(n * l0, gen_input_nc)
        y = pc(xs.astype(jnp.float32), mats_a, wts_a, vecs_a)
        # stacked (N*L6, C_out) -> NCL, like the PyTorch module
        return jnp.transpose(y.reshape(n, l6, signal_nc), (0, 2, 1))

    def forward(x):
        return _run(x, mats_arr, wts_arr, vecs_arr)

    return forward


# ---------------------------------------------------------------------------
# Deterministic PyTorch-style parameter init
# ---------------------------------------------------------------------------
def init_params(key, gen_input_nc, signal_nc):
    ki = iter(jax.random.split(key, 32))

    def conv(cout, cin, k, bias=True):
        bound = 1.0 / (cin * k) ** 0.5
        w = jax.random.uniform(next(ki), (cout, cin, k), jnp.float32, -bound, bound)
        b = jax.random.uniform(next(ki), (cout,), jnp.float32, -bound, bound) if bias else None
        return w, b

    def convT(cin, cout, k):
        bound = 1.0 / (cout * k) ** 0.5
        return jax.random.uniform(next(ki), (cin, cout, k), jnp.float32, -bound, bound)

    p = {}
    p["enc1_w"], p["enc1_b"] = conv(16, gen_input_nc, 3)
    p["enc2_w"], p["enc2_b"] = conv(32, 16, 3)
    p["enc3_w"], p["enc3_b"] = conv(64, 32, 3)
    for b in range(4):
        p[f"res{b}_w1"], _ = conv(64, 64, 3, bias=False)
        p[f"res{b}_w2"], _ = conv(64, 64, 3, bias=False)
        p[f"res{b}_g1"] = jnp.ones((64,), jnp.float32)
        p[f"res{b}_b1"] = jnp.zeros((64,), jnp.float32)
        p[f"res{b}_g2"] = jnp.ones((64,), jnp.float32)
        p[f"res{b}_b2"] = jnp.zeros((64,), jnp.float32)
    p["dec1_w"] = convT(64, 32, 3)
    p["dec2_w"] = convT(32, 16, 3)
    p["dec3_w"] = convT(16, signal_nc, 3)
    return p


if __name__ == "__main__":
    key = jax.random.PRNGKey(0)
    k_par, k_in = jax.random.split(key)

    gen_input_nc, signal_nc = 4, 4
    batch, length = 2, 32      # lengths: 32 -> 30 -> 14 -> 6 -> (resnet) 6 -> 13 -> 27 -> 29

    x = jax.random.normal(k_in, (batch, gen_input_nc, length), jnp.float32)
    params = init_params(k_par, gen_input_nc, signal_nc)

    forward = make_generator_forward(params, batch, length)
    out = jax.block_until_ready(forward(x))

    assert out.shape == (batch, signal_nc, 29), out.shape
    assert bool(jnp.all(jnp.isfinite(out)))
    print("KERNEL_OK")
</pallas_src>

<mosaic_0001>
module attributes {stable_mosaic.version = 11 : i64} {
  func.func @kernel(%arg0: i32, %arg1: memref<64x4xf32, #tpu.memory_space<vmem>>, %arg2: memref<848x64xbf16, #tpu.memory_space<vmem>>, %arg3: memref<688x384xbf16, #tpu.memory_space<vmem>>, %arg4: memref<152x64xf32, #tpu.memory_space<vmem>>, %arg5: memref<58x4xf32, #tpu.memory_space<vmem>>) attributes {dimension_semantics = [#tpu.dimension_semantics<arbitrary>], iteration_bounds = array<i64: 1>, scalar_prefetch = 0 : i64, scratch_operands = 0 : i64, tpu.core_type = #tpu.core_type<tc>, window_params = [{pipeline_mode = #tpu.pipeline_mode<synchronous>, transform_indices = @transform_0, window_bounds = array<i64: 64, 4>}, {pipeline_mode = #tpu.pipeline_mode<synchronous>, transform_indices = @transform_1, window_bounds = array<i64: 848, 64>}, {pipeline_mode = #tpu.pipeline_mode<synchronous>, transform_indices = @transform_2, window_bounds = array<i64: 688, 384>}, {pipeline_mode = #tpu.pipeline_mode<synchronous>, transform_indices = @transform_3, window_bounds = array<i64: 152, 64>}, {pipeline_mode = #tpu.pipeline_mode<synchronous>, transform_indices = @transform_4, window_bounds = array<i64: 58, 4>}]} {
    %c0 = arith.constant 0 : index
    %c0_0 = arith.constant 0 : index
    %0 = vector.load %arg1[%c0, %c0_0] : memref<64x4xf32, #tpu.memory_space<vmem>>, vector<64x4xf32>
    %1 = arith.truncf %0 : vector<64x4xf32> to vector<64x4xbf16>
    %c0_1 = arith.constant 0 : index
    %c0_2 = arith.constant 0 : index
    %2 = vector.load %arg3[%c0_1, %c0_2] : memref<688x384xbf16, #tpu.memory_space<vmem>>, vector<4x384xbf16>
    %cst = arith.constant dense<0.000000e+00> : vector<64x384xf32>
    %3 = tpu.matmul %1, %2, %cst {dimension_numbers = #tpu.dot_dimension_numbers<[1], [0], [0], [1], [0, 0, 1, 1], [], []>} : vector<64x4xbf16>, vector<4x384xbf16>, vector<64x384xf32> -> vector<64x384xf32>
    %4 = vector.extract_strided_slice %3 {offsets = [0, 0], sizes = [64, 16], strides = [1, 1]} : vector<64x384xf32> to vector<64x16xf32>
    %c0_3 = arith.constant 0 : index
    %c0_4 = arith.constant 0 : index
    %5 = vector.load %arg2[%c0_3, %c0_4] : memref<848x64xbf16, #tpu.memory_space<vmem>>, vector<60x64xbf16>
    %6 = arith.truncf %4 : vector<64x16xf32> to vector<64x16xbf16>
    %cst_5 = arith.constant dense<0.000000e+00> : vector<60x16xf32>
    %7 = tpu.matmul %5, %6, %cst_5 {dimension_numbers = #tpu.dot_dimension_numbers<[1], [0], [0], [1], [0, 0, 1, 1], [], []>} : vector<60x64xbf16>, vector<64x16xbf16>, vector<60x16xf32> -> vector<60x16xf32>
    %8 = vector.extract_strided_slice %3 {offsets = [0, 128], sizes = [64, 16], strides = [1, 1]} : vector<64x384xf32> to vector<64x16xf32>
    %c272 = arith.constant 272 : index
    %c0_6 = arith.constant 0 : index
    %9 = vector.load %arg2[%c272, %c0_6] : memref<848x64xbf16, #tpu.memory_space<vmem>>, vector<60x64xbf16>
    %10 = arith.truncf %8 : vector<64x16xf32> to vector<64x16xbf16>
    %cst_7 = arith.constant dense<0.000000e+00> : vector<60x16xf32>
    %11 = tpu.matmul %9, %10, %cst_7 {dimension_numbers = #tpu.dot_dimension_numbers<[1], [0], [0], [1], [0, 0, 1, 1], [], []>} : vector<60x64xbf16>, vector<64x16xbf16>, vector<60x16xf32> -> vector<60x16xf32>
    %12 = arith.addf %7, %11 : vector<60x16xf32>
    %13 = vector.extract_strided_slice %3 {offsets = [0, 256], sizes = [64, 16], strides = [1, 1]} : vector<64x384xf32> to vector<64x16xf32>
    %c544 = arith.constant 544 : index
    %c0_8 = arith.constant 0 : index
    %14 = vector.load %arg2[%c544, %c0_8] : memref<848x64xbf16, #tpu.memory_space<vmem>>, vector<60x64xbf16>
    %15 = arith.truncf %13 : vector<64x16xf32> to vector<64x16xbf16>
    %cst_9 = arith.constant dense<0.000000e+00> : vector<60x16xf32>
    %16 = tpu.matmul %14, %15, %cst_9 {dimension_numbers = #tpu.dot_dimension_numbers<[1], [0], [0], [1], [0, 0, 1, 1], [], []>} : vector<60x64xbf16>, vector<64x16xbf16>, vector<60x16xf32> -> vector<60x16xf32>
    %17 = arith.addf %12, %16 : vector<60x16xf32>
    %c0_10 = arith.constant 0 : index
    %c0_11 = arith.constant 0 : index
    %18 = vector.load %arg4[%c0_10, %c0_11] : memref<152x64xf32, #tpu.memory_space<vmem>>, vector<1x16xf32>
    %19 = vector.broadcast %18 : vector<1x16xf32> to vector<60x16xf32>
    %20 = arith.addf %17, %19 : vector<60x16xf32>
    %21 = tpu.iota {dimensions = array<i32: 0>} : vector<60x16xi32>
    %c0_i32 = arith.constant 0 : i32
    %22 = vector.broadcast %c0_i32 : i32 to vector<60x16xi32>
    %23 = arith.cmpi sge, %21, %22 : vector<60x16xi32>
    %c30_i32 = arith.constant 30 : i32
    %24 = vector.broadcast %c30_i32 : i32 to vector<60x16xi32>
    %25 = arith.cmpi slt, %21, %24 : vector<60x16xi32>
    %26 = arith.andi %23, %25 : vector<60x16xi1>
    %cst_12 = arith.constant 1.000000e+00 : f32
    %cst_13 = arith.constant 0.000000e+00 : f32
    %27 = vector.broadcast %cst_12 : f32 to vector<60x16xf32>
    %28 = vector.broadcast %cst_13 : f32 to vector<60x16xf32>
    %29 = arith.select %26, %27, %28 : vector<60x16xi1>, vector<60x16xf32>
    %c30_i32_14 = arith.constant 30 : i32
    %30 = vector.broadcast %c30_i32_14 : i32 to vector<60x16xi32>
    %31 = arith.cmpi sge, %21, %30 : vector<60x16xi32>
    %c60_i32 = arith.constant 60 : i32
    %32 = vector.broadcast %c60_i32 : i32 to vector<60x16xi32>
    %33 = arith.cmpi slt, %21, %32 : vector<60x16xi32>
    %34 = arith.andi %31, %33 : vector<60x16xi1>
    %cst_15 = arith.constant 1.000000e+00 : f32
    %cst_16 = arith.constant 0.000000e+00 : f32
    %35 = vector.broadcast %cst_15 : f32 to vector<60x16xf32>
    %36 = vector.broadcast %cst_16 : f32 to vector<60x16xf32>
    %37 = arith.select %34, %35, %36 : vector<60x16xi1>, vector<60x16xf32>
    %38 = arith.mulf %20, %29 : vector<60x16xf32>
    %cst_17 = arith.constant dense<0.000000e+00> : vector<16xf32>
    %39 = vector.multi_reduction <add>, %38, %cst_17 [0] : vector<60x16xf32> to vector<16xf32>
    %40 = vector.shape_cast %39 : vector<16xf32> to vector<1x16xf32>
    %cst_18 = arith.constant 0.0333333351 : f32
    %41 = vector.broadcast %cst_18 : f32 to vector<1x16xf32>
    %42 = arith.mulf %40, %41 : vector<1x16xf32>
    %43 = vector.broadcast %42 : vector<1x16xf32> to vector<60x16xf32>
    %44 = arith.mulf %43, %29 : vector<60x16xf32>
    %45 = arith.mulf %20, %37 : vector<60x16xf32>
    %cst_19 = arith.constant dense<0.000000e+00> : vector<16xf32>
    %46 = vector.multi_reduction <add>, %45, %cst_19 [0] : vector<60x16xf32> to vector<16xf32>
    %47 = vector.shape_cast %46 : vector<16xf32> to vector<1x16xf32>
    %cst_20 = arith.constant 0.0333333351 : f32
    %48 = vector.broadcast %cst_20 : f32 to vector<1x16xf32>
    %49 = arith.mulf %47, %48 : vector<1x16xf32>
    %50 = vector.broadcast %49 : vector<1x16xf32> to vector<60x16xf32>
    %51 = arith.mulf %50, %37 : vector<60x16xf32>
    %52 = arith.addf %44, %51 : vector<60x16xf32>
    %53 = arith.subf %20, %52 : vector<60x16xf32>
    %54 = arith.mulf %53, %53 : vector<60x16xf32>
    %55 = arith.mulf %54, %29 : vector<60x16xf32>
    %cst_21 = arith.constant dense<0.000000e+00> : vector<16xf32>
    %56 = vector.multi_reduction <add>, %55, %cst_21 [0] : vector<60x16xf32> to vector<16xf32>
    %57 = vector.shape_cast %56 : vector<16xf32> to vector<1x16xf32>
    %cst_22 = arith.constant 0.0333333351 : f32
    %58 = vector.broadcast %cst_22 : f32 to vector<1x16xf32>
    %59 = arith.mulf %57, %58 : vector<1x16xf32>
    %60 = vector.broadcast %59 : vector<1x16xf32> to vector<60x16xf32>
    %61 = arith.mulf %60, %29 : vector<60x16xf32>
    %62 = arith.mulf %53, %53 : vector<60x16xf32>
    %63 = arith.mulf %62, %37 : vector<60x16xf32>
    %cst_23 = arith.constant dense<0.000000e+00> : vector<16xf32>
    %64 = vector.multi_reduction <add>, %63, %cst_23 [0] : vector<60x16xf32> to vector<16xf32>
    %65 = vector.shape_cast %64 : vector<16xf32> to vector<1x16xf32>
    %cst_24 = arith.constant 0.0333333351 : f32
    %66 = vector.broadcast %cst_24 : f32 to vector<1x16xf32>
    %67 = arith.mulf %65, %66 : vector<1x16xf32>
    %68 = vector.broadcast %67 : vector<1x16xf32> to vector<60x16xf32>
    %69 = arith.mulf %68, %37 : vector<60x16xf32>
    %70 = arith.addf %61, %69 : vector<60x16xf32>
    %cst_25 = arith.constant 9.99999974E-6 : f32
    %71 = vector.broadcast %cst_25 : f32 to vector<60x16xf32>
    %72 = arith.addf %70, %71 : vector<60x16xf32>
    %73 = math.rsqrt %72 : vector<60x16xf32>
    %74 = arith.mulf %53, %73 : vector<60x16xf32>
    %cst_26 = arith.constant 0.000000e+00 : f32
    %75 = vector.broadcast %cst_26 : f32 to vector<60x16xf32>
    %76 = arith.maximumf %74, %75 : vector<60x16xf32>
    %77 = arith.truncf %76 : vector<60x16xf32> to vector<60x16xbf16>
    %c16 = arith.constant 16 : index
    %c0_27 = arith.constant 0 : index
    %78 = vector.load %arg3[%c16, %c0_27] : memref<688x384xbf16, #tpu.memory_space<vmem>>, vector<16x384xbf16>
    %cst_28 = arith.constant dense<0.000000e+00> : vector<60x384xf32>
    %79 = tpu.matmul %77, %78, %cst_28 {dimension_numbers = #tpu.dot_dimension_numbers<[1], [0], [0], [1], [0, 0, 1, 1], [], []>} : vector<60x16xbf16>, vector<16x384xbf16>, vector<60x384xf32> -> vector<60x384xf32>
    %80 = vector.extract_strided_slice %79 {offsets = [0, 0], sizes = [60, 32], strides = [1, 1]} : vector<60x384xf32> to vector<60x32xf32>
    %c64 = arith.constant 64 : index
    %c0_29 = arith.constant 0 : index
    %81 = vector.load %arg2[%c64, %c0_29] : memref<848x64xbf16, #tpu.memory_space<vmem>>, vector<28x60xbf16>
    %82 = arith.truncf %80 : vector<60x32xf32> to vector<60x32xbf16>
    %cst_30 = arith.constant dense<0.000000e+00> : vector<28x32xf32>
    %83 = tpu.matmul %81, %82, %cst_30 {dimension_numbers = #tpu.dot_dimension_numbers<[1], [0], [0], [1], [0, 0, 1, 1], [], []>} : vector<28x60xbf16>, vector<60x32xbf16>, vector<28x32xf32> -> vector<28x32xf32>
    %84 = vector.extract_strided_slice %79 {offsets = [0, 128], sizes = [60, 32], strides = [1, 1]} : vector<60x384xf32> to vector<60x32xf32>
    %c336 = arith.constant 336 : index
    %c0_31 = arith.constant 0 : index
    %85 = vector.load %arg2[%c336, %c0_31] : memref<848x64xbf16, #tpu.memory_space<vmem>>, vector<28x60xbf16>
    %86 = arith.truncf %84 : vector<60x32xf32> to vector<60x32xbf16>
    %cst_32 = arith.constant dense<0.000000e+00> : vector<28x32xf32>
    %87 = tpu.matmul %85, %86, %cst_32 {dimension_numbers = #tpu.dot_dimension_numbers<[1], [0], [0], [1], [0, 0, 1, 1], [], []>} : vector<28x60xbf16>, vector<60x32xbf16>, vector<28x32xf32> -> vector<28x32xf32>
    %88 = arith.addf %83, %87 : vector<28x32xf32>
    %89 = vector.extract_strided_slice %79 {offsets = [0, 256], sizes = [60, 32], strides = [1, 1]} : vector<60x384xf32> to vector<60x32xf32>
    %c608 = arith.constant 608 : index
    %c0_33 = arith.constant 0 : index
    %90 = vector.load %arg2[%c608, %c0_33] : memref<848x64xbf16, #tpu.memory_space<vmem>>, vector<28x60xbf16>
    %91 = arith.truncf %89 : vector<60x32xf32> to vector<60x32xbf16>
    %cst_34 = arith.constant dense<0.000000e+00> : vector<28x32xf32>
    %92 = tpu.matmul %90, %91, %cst_34 {dimension_numbers = #tpu.dot_dimension_numbers<[1], [0], [0], [1], [0, 0, 1, 1], [], []>} : vector<28x60xbf16>, vector<60x32xbf16>, vector<28x32xf32> -> vector<28x32xf32>
    %93 = arith.addf %88, %92 : vector<28x32xf32>
    %c8 = arith.constant 8 : index
    %c0_35 = arith.constant 0 : index
    %94 = vector.load %arg4[%c8, %c0_35] : memref<152x64xf32, #tpu.memory_space<vmem>>, vector<1x32xf32>
    %95 = vector.broadcast %94 : vector<1x32xf32> to vector<28x32xf32>
    %96 = arith.addf %93, %95 : vector<28x32xf32>
    %97 = tpu.iota {dimensions = array<i32: 0>} : vector<28x32xi32>
    %c0_i32_36 = arith.constant 0 : i32
    %98 = vector.broadcast %c0_i32_36 : i32 to vector<28x32xi32>
    %99 = arith.cmpi sge, %97, %98 : vector<28x32xi32>
    %c14_i32 = arith.constant 14 : i32
    %100 = vector.broadcast %c14_i32 : i32 to vector<28x32xi32>
    %101 = arith.cmpi slt, %97, %100 : vector<28x32xi32>
    %102 = arith.andi %99, %101 : vector<28x32xi1>
    %cst_37 = arith.constant 1.000000e+00 : f32
    %cst_38 = arith.constant 0.000000e+00 : f32
    %103 = vector.broadcast %cst_37 : f32 to vector<28x32xf32>
    %104 = vector.broadcast %cst_38 : f32 to vector<28x32xf32>
    %105 = arith.select %102, %103, %104 : vector<28x32xi1>, vector<28x32xf32>
    %c14_i32_39 = arith.constant 14 : i32
    %106 = vector.broadcast %c14_i32_39 : i32 to vector<28x32xi32>
    %107 = arith.cmpi sge, %97, %106 : vector<28x32xi32>
    %c28_i32 = arith.constant 28 : i32
    %108 = vector.broadcast %c28_i32 : i32 to vector<28x32xi32>
    %109 = arith.cmpi slt, %97, %108 : vector<28x32xi32>
    %110 = arith.andi %107, %109 : vector<28x32xi1>
    %cst_40 = arith.constant 1.000000e+00 : f32
    %cst_41 = arith.constant 0.000000e+00 : f32
    %111 = vector.broadcast %cst_40 : f32 to vector<28x32xf32>
    %112 = vector.broadcast %cst_41 : f32 to vector<28x32xf32>
    %113 = arith.select %110, %111, %112 : vector<28x32xi1>, vector<28x32xf32>
    %114 = arith.mulf %96, %105 : vector<28x32xf32>
    %cst_42 = arith.constant dense<0.000000e+00> : vector<32xf32>
    %115 = vector.multi_reduction <add>, %114, %cst_42 [0] : vector<28x32xf32> to vector<32xf32>
    %116 = vector.shape_cast %115 : vector<32xf32> to vector<1x32xf32>
    %cst_43 = arith.constant 0.0714285746 : f32
    %117 = vector.broadcast %cst_43 : f32 to vector<1x32xf32>
    %118 = arith.mulf %116, %117 : vector<1x32xf32>
    %119 = vector.broadcast %118 : vector<1x32xf32> to vector<28x32xf32>
    %120 = arith.mulf %119, %105 : vector<28x32xf32>
    %121 = arith.mulf %96, %113 : vector<28x32xf32>
    %cst_44 = arith.constant dense<0.000000e+00> : vector<32xf32>
    %122 = vector.multi_reduction <add>, %121, %cst_44 [0] : vector<28x32xf32> to vector<32xf32>
    %123 = vector.shape_cast %122 : vector<32xf32> to vector<1x32xf32>
    %cst_45 = arith.constant 0.0714285746 : f32
    %124 = vector.broadcast %cst_45 : f32 to vector<1x32xf32>
    %125 = arith.mulf %123, %124 : vector<1x32xf32>
    %126 = vector.broadcast %125 : vector<1x32xf32> to vector<28x32xf32>
    %127 = arith.mulf %126, %113 : vector<28x32xf32>
    %128 = arith.addf %120, %127 : vector<28x32xf32>
    %129 = arith.subf %96, %128 : vector<28x32xf32>
    %130 = arith.mulf %129, %129 : vector<28x32xf32>
    %131 = arith.mulf %130, %105 : vector<28x32xf32>
    %cst_46 = arith.constant dense<0.000000e+00> : vector<32xf32>
    %132 = vector.multi_reduction <add>, %131, %cst_46 [0] : vector<28x32xf32> to vector<32xf32>
    %133 = vector.shape_cast %132 : vector<32xf32> to vector<1x32xf32>
    %cst_47 = arith.constant 0.0714285746 : f32
    %134 = vector.broadcast %cst_47 : f32 to vector<1x32xf32>
    %135 = arith.mulf %133, %134 : vector<1x32xf32>
    %136 = vector.broadcast %135 : vector<1x32xf32> to vector<28x32xf32>
    %137 = arith.mulf %136, %105 : vector<28x32xf32>
    %138 = arith.mulf %129, %129 : vector<28x32xf32>
    %139 = arith.mulf %138, %113 : vector<28x32xf32>
    %cst_48 = arith.constant dense<0.000000e+00> : vector<32xf32>
    %140 = vector.multi_reduction <add>, %139, %cst_48 [0] : vector<28x32xf32> to vector<32xf32>
    %141 = vector.shape_cast %140 : vector<32xf32> to vector<1x32xf32>
    %cst_49 = arith.constant 0.0714285746 : f32
    %142 = vector.broadcast %cst_49 : f32 to vector<1x32xf32>
    %143 = arith.mulf %141, %142 : vector<1x32xf32>
    %144 = vector.broadcast %143 : vector<1x32xf32> to vector<28x32xf32>
    %145 = arith.mulf %144, %113 : vector<28x32xf32>
    %146 = arith.addf %137, %145 : vector<28x32xf32>
    %cst_50 = arith.constant 9.99999974E-6 : f32
    %147 = vector.broadcast %cst_50 : f32 to vector<28x32xf32>
    %148 = arith.addf %146, %147 : vector<28x32xf32>
    %149 = math.rsqrt %148 : vector<28x32xf32>
    %150 = arith.mulf %129, %149 : vector<28x32xf32>
    %cst_51 = arith.constant 0.000000e+00 : f32
    %151 = vector.broadcast %cst_51 : f32 to vector<28x32xf32>
    %152 = arith.maximumf %150, %151 : vector<28x32xf32>
    %153 = arith.truncf %152 : vector<28x32xf32> to vector<28x32xbf16>
    %c32 = arith.constant 32 : index
    %c0_52 = arith.constant 0 : index
    %154 = vector.load %arg3[%c32, %c0_52] : memref<688x384xbf16, #tpu.memory_space<vmem>>, vector<32x384xbf16>
    %cst_53 = arith.constant dense<0.000000e+00> : vector<28x384xf32>
    %155 = tpu.matmul %153, %154, %cst_53 {dimension_numbers = #tpu.dot_dimension_numbers<[1], [0], [0], [1], [0, 0, 1, 1], [], []>} : vector<28x32xbf16>, vector<32x384xbf16>, vector<28x384xf32> -> vector<28x384xf32>
    %156 = vector.extract_strided_slice %155 {offsets = [0, 0], sizes = [28, 64], strides = [1, 1]} : vector<28x384xf32> to vector<28x64xf32>
    %c96 = arith.constant 96 : index
    %c0_54 = arith.constant 0 : index
    %157 = vector.load %arg2[%c96, %c0_54] : memref<848x64xbf16, #tpu.memory_space<vmem>>, vector<12x28xbf16>
    %158 = arith.truncf %156 : vector<28x64xf32> to vector<28x64xbf16>
    %cst_55 = arith.constant dense<0.000000e+00> : vector<12x64xf32>
    %159 = tpu.matmul %157, %158, %cst_55 {dimension_numbers = #tpu.dot_dimension_numbers<[1], [0], [0], [1], [0, 0, 1, 1], [], []>} : vector<12x28xbf16>, vector<28x64xbf16>, vector<12x64xf32> -> vector<12x64xf32>
    %160 = vector.extract_strided_slice %155 {offsets = [0, 128], sizes = [28, 64], strides = [1, 1]} : vector<28x384xf32> to vector<28x64xf32>
    %c368 = arith.constant 368 : index
    %c0_56 = arith.constant 0 : index
    %161 = vector.load %arg2[%c368, %c0_56] : memref<848x64xbf16, #tpu.memory_space<vmem>>, vector<12x28xbf16>
    %162 = arith.truncf %160 : vector<28x64xf32> to vector<28x64xbf16>
    %cst_57 = arith.constant dense<0.000000e+00> : vector<12x64xf32>
    %163 = tpu.matmul %161, %162, %cst_57 {dimension_numbers = #tpu.dot_dimension_numbers<[1], [0], [0], [1], [0, 0, 1, 1], [], []>} : vector<12x28xbf16>, vector<28x64xbf16>, vector<12x64xf32> -> vector<12x64xf32>
    %164 = arith.addf %159, %163 : vector<12x64xf32>
    %165 = vector.extract_strided_slice %155 {offsets = [0, 256], sizes = [28, 64], strides = [1, 1]} : vector<28x384xf32> to vector<28x64xf32>
    %c640 = arith.constant 640 : index
    %c0_58 = arith.constant 0 : index
    %166 = vector.load %arg2[%c640, %c0_58] : memref<848x64xbf16, #tpu.memory_space<vmem>>, vector<12x28xbf16>
    %167 = arith.truncf %165 : vector<28x64xf32> to vector<28x64xbf16>
    %cst_59 = arith.constant dense<0.000000e+00> : vector<12x64xf32>
    %168 = tpu.matmul %166, %167, %cst_59 {dimension_numbers = #tpu.dot_dimension_numbers<[1], [0], [0], [1], [0, 0, 1, 1], [], []>} : vector<12x28xbf16>, vector<28x64xbf16>, vector<12x64xf32> -> vector<12x64xf32>
    %169 = arith.addf %164, %168 : vector<12x64xf32>
    %c16_60 = arith.constant 16 : index
    %c0_61 = arith.constant 0 : index
    %170 = vector.load %arg4[%c16_60, %c0_61] : memref<152x64xf32, #tpu.memory_space<vmem>>, vector<1x64xf32>
    %171 = vector.broadcast %170 : vector<1x64xf32> to vector<12x64xf32>
    %172 = arith.addf %169, %171 : vector<12x64xf32>
    %173 = tpu.iota {dimensions = array<i32: 0>} : vector<12x64xi32>
    %c0_i32_62 = arith.constant 0 : i32
    %174 = vector.broadcast %c0_i32_62 : i32 to vector<12x64xi32>
    %175 = arith.cmpi sge, %173, %174 : vector<12x64xi32>
    %c6_i32 = arith.constant 6 : i32
    %176 = vector.broadcast %c6_i32 : i32 to vector<12x64xi32>
    %177 = arith.cmpi slt, %173, %176 : vector<12x64xi32>
    %178 = arith.andi %175, %177 : vector<12x64xi1>
    %cst_63 = arith.constant 1.000000e+00 : f32
    %cst_64 = arith.constant 0.000000e+00 : f32
    %179 = vector.broadcast %cst_63 : f32 to vector<12x64xf32>
    %180 = vector.broadcast %cst_64 : f32 to vector<12x64xf32>
    %181 = arith.select %178, %179, %180 : vector<12x64xi1>, vector<12x64xf32>
    %c6_i32_65 = arith.constant 6 : i32
    %182 = vector.broadcast %c6_i32_65 : i32 to vector<12x64xi32>
    %183 = arith.cmpi sge, %173, %182 : vector<12x64xi32>
    %c12_i32 = arith.constant 12 : i32
    %184 = vector.broadcast %c12_i32 : i32 to vector<12x64xi32>
    %185 = arith.cmpi slt, %173, %184 : vector<12x64xi32>
    %186 = arith.andi %183, %185 : vector<12x64xi1>
    %cst_66 = arith.constant 1.000000e+00 : f32
    %cst_67 = arith.constant 0.000000e+00 : f32
    %187 = vector.broadcast %cst_66 : f32 to vector<12x64xf32>
    %188 = vector.broadcast %cst_67 : f32 to vector<12x64xf32>
    %189 = arith.select %186, %187, %188 : vector<12x64xi1>, vector<12x64xf32>
    %190 = arith.mulf %172, %181 : vector<12x64xf32>
    %cst_68 = arith.constant dense<0.000000e+00> : vector<64xf32>
    %191 = vector.multi_reduction <add>, %190, %cst_68 [0] : vector<12x64xf32> to vector<64xf32>
    %192 = vector.shape_cast %191 : vector<64xf32> to vector<1x64xf32>
    %cst_69 = arith.constant 0.166666672 : f32
    %193 = vector.broadcast %cst_69 : f32 to vector<1x64xf32>
    %194 = arith.mulf %192, %193 : vector<1x64xf32>
    %195 = vector.broadcast %194 : vector<1x64xf32> to vector<12x64xf32>
    %196 = arith.mulf %195, %181 : vector<12x64xf32>
    %197 = arith.mulf %172, %189 : vector<12x64xf32>
    %cst_70 = arith.constant dense<0.000000e+00> : vector<64xf32>
    %198 = vector.multi_reduction <add>, %197, %cst_70 [0] : vector<12x64xf32> to vector<64xf32>
    %199 = vector.shape_cast %198 : vector<64xf32> to vector<1x64xf32>
    %cst_71 = arith.constant 0.166666672 : f32
    %200 = vector.broadcast %cst_71 : f32 to vector<1x64xf32>
    %201 = arith.mulf %199, %200 : vector<1x64xf32>
    %202 = vector.broadcast %201 : vector<1x64xf32> to vector<12x64xf32>
    %203 = arith.mulf %202, %189 : vector<12x64xf32>
    %204 = arith.addf %196, %203 : vector<12x64xf32>
    %205 = arith.subf %172, %204 : vector<12x64xf32>
    %206 = arith.mulf %205, %205 : vector<12x64xf32>
    %207 = arith.mulf %206, %181 : vector<12x64xf32>
    %cst_72 = arith.constant dense<0.000000e+00> : vector<64xf32>
    %208 = vector.multi_reduction <add>, %207, %cst_72 [0] : vector<12x64xf32> to vector<64xf32>
    %209 = vector.shape_cast %208 : vector<64xf32> to vector<1x64xf32>
    %cst_73 = arith.constant 0.166666672 : f32
    %210 = vector.broadcast %cst_73 : f32 to vector<1x64xf32>
    %211 = arith.mulf %209, %210 : vector<1x64xf32>
    %212 = vector.broadcast %211 : vector<1x64xf32> to vector<12x64xf32>
    %213 = arith.mulf %212, %181 : vector<12x64xf32>
    %214 = arith.mulf %205, %205 : vector<12x64xf32>
    %215 = arith.mulf %214, %189 : vector<12x64xf32>
    %cst_74 = arith.constant dense<0.000000e+00> : vector<64xf32>
    %216 = vector.multi_reduction <add>, %215, %cst_74 [0] : vector<12x64xf32> to vector<64xf32>
    %217 = vector.shape_cast %216 : vector<64xf32> to vector<1x64xf32>
    %cst_75 = arith.constant 0.166666672 : f32
    %218 = vector.broadcast %cst_75 : f32 to vector<1x64xf32>
    %219 = arith.mulf %217, %218 : vector<1x64xf32>
    %220 = vector.broadcast %219 : vector<1x64xf32> to vector<12x64xf32>
    %221 = arith.mulf %220, %189 : vector<12x64xf32>
    %222 = arith.addf %213, %221 : vector<12x64xf32>
    %cst_76 = arith.constant 9.99999974E-6 : f32
    %223 = vector.broadcast %cst_76 : f32 to vector<12x64xf32>
    %224 = arith.addf %222, %223 : vector<12x64xf32>
    %225 = math.rsqrt %224 : vector<12x64xf32>
    %226 = arith.mulf %205, %225 : vector<12x64xf32>
    %cst_77 = arith.constant 0.000000e+00 : f32
    %227 = vector.broadcast %cst_77 : f32 to vector<12x64xf32>
    %228 = arith.maximumf %226, %227 : vector<12x64xf32>
    %229 = arith.truncf %228 : vector<12x64xf32> to vector<12x64xbf16>
    %c64_78 = arith.constant 64 : index
    %c0_79 = arith.constant 0 : index
    %230 = vector.load %arg3[%c64_78, %c0_79] : memref<688x384xbf16, #tpu.memory_space<vmem>>, vector<64x384xbf16>
    %cst_80 = arith.constant dense<0.000000e+00> : vector<12x384xf32>
    %231 = tpu.matmul %229, %230, %cst_80 {dimension_numbers = #tpu.dot_dimension_numbers<[1], [0], [0], [1], [0, 0, 1, 1], [], []>} : vector<12x64xbf16>, vector<64x384xbf16>, vector<12x384xf32> -> vector<12x384xf32>
    %232 = vector.extract_strided_slice %231 {offsets = [0, 0], sizes = [12, 64], strides = [1, 1]} : vector<12x384xf32> to vector<12x64xf32>
    %c816 = arith.constant 816 : index
    %c0_81 = arith.constant 0 : index
    %233 = vector.load %arg2[%c816, %c0_81] : memref<848x64xbf16, #tpu.memory_space<vmem>>, vector<12x12xbf16>
    %234 = arith.truncf %232 : vector<12x64xf32> to vector<12x64xbf16>
    %cst_82 = arith.constant dense<0.000000e+00> : vector<12x64xf32>
    %235 = tpu.matmul %233, %234, %cst_82 {dimension_numbers = #tpu.dot_dimension_numbers<[1], [0], [0], [1], [0, 0, 1, 1], [], []>} : vector<12x12xbf16>, vector<12x64xbf16>, vector<12x64xf32> -> vector<12x64xf32>
    %236 = vector.extract_strided_slice %231 {offsets = [0, 128], sizes = [12, 64], strides = [1, 1]} : vector<12x384xf32> to vector<12x64xf32>
    %237 = arith.addf %235, %236 : vector<12x64xf32>
    %238 = vector.extract_strided_slice %231 {offsets = [0, 256], sizes = [12, 64], strides = [1, 1]} : vector<12x384xf32> to vector<12x64xf32>
    %c832 = arith.constant 832 : index
    %c0_83 = arith.constant 0 : index
    %239 = vector.load %arg2[%c832, %c0_83] : memref<848x64xbf16, #tpu.memory_space<vmem>>, vector<12x12xbf16>
    %240 = arith.truncf %238 : vector<12x64xf32> to vector<12x64xbf16>
    %cst_84 = arith.constant dense<0.000000e+00> : vector<12x64xf32>
    %241 = tpu.matmul %239, %240, %cst_84 {dimension_numbers = #tpu.dot_dimension_numbers<[1], [0], [0], [1], [0, 0, 1, 1], [], []>} : vector<12x12xbf16>, vector<12x64xbf16>, vector<12x64xf32> -> vector<12x64xf32>
    %242 = arith.addf %237, %241 : vector<12x64xf32>
    %cst_85 = arith.constant dense<0.000000e+00> : vector<64xf32>
    %243 = vector.multi_reduction <add>, %242, %cst_85 [0] : vector<12x64xf32> to vector<64xf32>
    %244 = vector.shape_cast %243 : vector<64xf32> to vector<1x64xf32>
    %cst_86 = arith.constant 1.200000e+01 : f32
    %245 = vector.broadcast %cst_86 : f32 to vector<1x64xf32>
    %246 = arith.divf %244, %245 : vector<1x64xf32>
    %247 = vector.broadcast %246 : vector<1x64xf32> to vector<12x64xf32>
    %248 = arith.subf %242, %247 : vector<12x64xf32>
    %249 = vector.broadcast %246 : vector<1x64xf32> to vector<12x64xf32>
    %250 = arith.subf %242, %249 : vector<12x64xf32>
    %251 = arith.mulf %248, %250 : vector<12x64xf32>
    %cst_87 = arith.constant dense<0.000000e+00> : vector<64xf32>
    %252 = vector.multi_reduction <add>, %251, %cst_87 [0] : vector<12x64xf32> to vector<64xf32>
    %253 = vector.shape_cast %252 : vector<64xf32> to vector<1x64xf32>
    %cst_88 = arith.constant 1.200000e+01 : f32
    %254 = vector.broadcast %cst_88 : f32 to vector<1x64xf32>
    %255 = arith.divf %253, %254 : vector<1x64xf32>
    %256 = vector.broadcast %246 : vector<1x64xf32> to vector<12x64xf32>
    %257 = arith.subf %242, %256 : vector<12x64xf32>
    %cst_89 = arith.constant 9.99999974E-6 : f32
    %258 = vector.broadcast %cst_89 : f32 to vector<1x64xf32>
    %259 = arith.addf %255, %258 : vector<1x64xf32>
    %260 = math.rsqrt %259 : vector<1x64xf32>
    %261 = vector.broadcast %260 : vector<1x64xf32> to vector<12x64xf32>
    %262 = arith.mulf %257, %261 : vector<12x64xf32>
    %c24 = arith.constant 24 : index
    %c0_90 = arith.constant 0 : index
    %263 = vector.load %arg4[%c24, %c0_90] : memref<152x64xf32, #tpu.memory_space<vmem>>, vector<1x64xf32>
    %264 = vector.broadcast %263 : vector<1x64xf32> to vector<12x64xf32>
    %265 = arith.mulf %262, %264 : vector<12x64xf32>
    %c32_91 = arith.constant 32 : index
    %c0_92 = arith.constant 0 : index
    %266 = vector.load %arg4[%c32_91, %c0_92] : memref<152x64xf32, #tpu.memory_space<vmem>>, vector<1x64xf32>
    %267 = vector.broadcast %266 : vector<1x64xf32> to vector<12x64xf32>
    %268 = arith.addf %265, %267 : vector<12x64xf32>
    %cst_93 = arith.constant 0.000000e+00 : f32
    %269 = vector.broadcast %cst_93 : f32 to vector<12x64xf32>
    %270 = arith.maximumf %268, %269 : vector<12x64xf32>
    %271 = arith.truncf %270 : vector<12x64xf32> to vector<12x64xbf16>
    %c128 = arith.constant 128 : index
    %c0_94 = arith.constant 0 : index
    %272 = vector.load %arg3[%c128, %c0_94] : memref<688x384xbf16, #tpu.memory_space<vmem>>, vector<64x384xbf16>
    %cst_95 = arith.constant dense<0.000000e+00> : vector<12x384xf32>
    %273 = tpu.matmul %271, %272, %cst_95 {dimension_numbers = #tpu.dot_dimension_numbers<[1], [0], [0], [1], [0, 0, 1, 1], [], []>} : vector<12x64xbf16>, vector<64x384xbf16>, vector<12x384xf32> -> vector<12x384xf32>
    %274 = vector.extract_strided_slice %273 {offsets = [0, 0], sizes = [12, 64], strides = [1, 1]} : vector<12x384xf32> to vector<12x64xf32>
    %c816_96 = arith.constant 816 : index
    %c0_97 = arith.constant 0 : index
    %275 = vector.load %arg2[%c816_96, %c0_97] : memref<848x64xbf16, #tpu.memory_space<vmem>>, vector<12x12xbf16>
    %276 = arith.truncf %274 : vector<12x64xf32> to vector<12x64xbf16>
    %cst_98 = arith.constant dense<0.000000e+00> : vector<12x64xf32>
    %277 = tpu.matmul %275, %276, %cst_98 {dimension_numbers = #tpu.dot_dimension_numbers<[1], [0], [0], [1], [0, 0, 1, 1], [], []>} : vector<12x12xbf16>, vector<12x64xbf16>, vector<12x64xf32> -> vector<12x64xf32>
    %278 = vector.extract_strided_slice %273 {offsets = [0, 128], sizes = [12, 64], strides = [1, 1]} : vector<12x384xf32> to vector<12x64xf32>
    %279 = arith.addf %277, %278 : vector<12x64xf32>
    %280 = vector.extract_strided_slice %273 {offsets = [0, 256], sizes = [12, 64], strides = [1, 1]} : vector<12x384xf32> to vector<12x64xf32>
    %c832_99 = arith.constant 832 : index
    %c0_100 = arith.constant 0 : index
    %281 = vector.load %arg2[%c832_99, %c0_100] : memref<848x64xbf16, #tpu.memory_space<vmem>>, vector<12x12xbf16>
    %282 = arith.truncf %280 : vector<12x64xf32> to vector<12x64xbf16>
    %cst_101 = arith.constant dense<0.000000e+00> : vector<12x64xf32>
    %283 = tpu.matmul %281, %282, %cst_101 {dimension_numbers = #tpu.dot_dimension_numbers<[1], [0], [0], [1], [0, 0, 1, 1], [], []>} : vector<12x12xbf16>, vector<12x64xbf16>, vector<12x64xf32> -> vector<12x64xf32>
    %284 = arith.addf %279, %283 : vector<12x64xf32>
    %cst_102 = arith.constant dense<0.000000e+00> : vector<64xf32>
    %285 = vector.multi_reduction <add>, %284, %cst_102 [0] : vector<12x64xf32> to vector<64xf32>
    %286 = vector.shape_cast %285 : vector<64xf32> to vector<1x64xf32>
    %cst_103 = arith.constant 1.200000e+01 : f32
    %287 = vector.broadcast %cst_103 : f32 to vector<1x64xf32>
    %288 = arith.divf %286, %287 : vector<1x64xf32>
    %289 = vector.broadcast %288 : vector<1x64xf32> to vector<12x64xf32>
    %290 = arith.subf %284, %289 : vector<12x64xf32>
    %291 = vector.broadcast %288 : vector<1x64xf32> to vector<12x64xf32>
    %292 = arith.subf %284, %291 : vector<12x64xf32>
    %293 = arith.mulf %290, %292 : vector<12x64xf32>
    %cst_104 = arith.constant dense<0.000000e+00> : vector<64xf32>
    %294 = vector.multi_reduction <add>, %293, %cst_104 [0] : vector<12x64xf32> to vector<64xf32>
    %295 = vector.shape_cast %294 : vector<64xf32> to vector<1x64xf32>
    %cst_105 = arith.constant 1.200000e+01 : f32
    %296 = vector.broadcast %cst_105 : f32 to vector<1x64xf32>
    %297 = arith.divf %295, %296 : vector<1x64xf32>
    %298 = vector.broadcast %288 : vector<1x64xf32> to vector<12x64xf32>
    %299 = arith.subf %284, %298 : vector<12x64xf32>
    %cst_106 = arith.constant 9.99999974E-6 : f32
    %300 = vector.broadcast %cst_106 : f32 to vector<1x64xf32>
    %301 = arith.addf %297, %300 : vector<1x64xf32>
    %302 = math.rsqrt %301 : vector<1x64xf32>
    %303 = vector.broadcast %302 : vector<1x64xf32> to vector<12x64xf32>
    %304 = arith.mulf %299, %303 : vector<12x64xf32>
    %c40 = arith.constant 40 : index
    %c0_107 = arith.constant 0 : index
    %305 = vector.load %arg4[%c40, %c0_107] : memref<152x64xf32, #tpu.memory_space<vmem>>, vector<1x64xf32>
    %306 = vector.broadcast %305 : vector<1x64xf32> to vector<12x64xf32>
    %307 = arith.mulf %304, %306 : vector<12x64xf32>
    %c48 = arith.constant 48 : index
    %c0_108 = arith.constant 0 : index
    %308 = vector.load %arg4[%c48, %c0_108] : memref<152x64xf32, #tpu.memory_space<vmem>>, vector<1x64xf32>
    %309 = vector.broadcast %308 : vector<1x64xf32> to vector<12x64xf32>
    %310 = arith.addf %307, %309 : vector<12x64xf32>
    %311 = arith.addf %228, %310 : vector<12x64xf32>
    %312 = arith.truncf %311 : vector<12x64xf32> to vector<12x64xbf16>
    %c192 = arith.constant 192 : index
    %c0_109 = arith.constant 0 : index
    %313 = vector.load %arg3[%c192, %c0_109] : memref<688x384xbf16, #tpu.memory_space<vmem>>, vector<64x384xbf16>
    %cst_110 = arith.constant dense<0.000000e+00> : vector<12x384xf32>
    %314 = tpu.matmul %312, %313, %cst_110 {dimension_numbers = #tpu.dot_dimension_numbers<[1], [0], [0], [1], [0, 0, 1, 1], [], []>} : vector<12x64xbf16>, vector<64x384xbf16>, vector<12x384xf32> -> vector<12x384xf32>
    %315 = vector.extract_strided_slice %314 {offsets = [0, 0], sizes = [12, 64], strides = [1, 1]} : vector<12x384xf32> to vector<12x64xf32>
    %c816_111 = arith.constant 816 : index
    %c0_112 = arith.constant 0 : index
    %316 = vector.load %arg2[%c816_111, %c0_112] : memref<848x64xbf16, #tpu.memory_space<vmem>>, vector<12x12xbf16>
    %317 = arith.truncf %315 : vector<12x64xf32> to vector<12x64xbf16>
    %cst_113 = arith.constant dense<0.000000e+00> : vector<12x64xf32>
    %318 = tpu.matmul %316, %317, %cst_113 {dimension_numbers = #tpu.dot_dimension_numbers<[1], [0], [0], [1], [0, 0, 1, 1], [], []>} : vector<12x12xbf16>, vector<12x64xbf16>, vector<12x64xf32> -> vector<12x64xf32>
    %319 = vector.extract_strided_slice %314 {offsets = [0, 128], sizes = [12, 64], strides = [1, 1]} : vector<12x384xf32> to vector<12x64xf32>
    %320 = arith.addf %318, %319 : vector<12x64xf32>
    %321 = vector.extract_strided_slice %314 {offsets = [0, 256], sizes = [12, 64], strides = [1, 1]} : vector<12x384xf32> to vector<12x64xf32>
    %c832_114 = arith.constant 832 : index
    %c0_115 = arith.constant 0 : index
    %322 = vector.load %arg2[%c832_114, %c0_115] : memref<848x64xbf16, #tpu.memory_space<vmem>>, vector<12x12xbf16>
    %323 = arith.truncf %321 : vector<12x64xf32> to vector<12x64xbf16>
    %cst_116 = arith.constant dense<0.000000e+00> : vector<12x64xf32>
    %324 = tpu.matmul %322, %323, %cst_116 {dimension_numbers = #tpu.dot_dimension_numbers<[1], [0], [0], [1], [0, 0, 1, 1], [], []>} : vector<12x12xbf16>, vector<12x64xbf16>, vector<12x64xf32> -> vector<12x64xf32>
    %325 = arith.addf %320, %324 : vector<12x64xf32>
    %cst_117 = arith.constant dense<0.000000e+00> : vector<64xf32>
    %326 = vector.multi_reduction <add>, %325, %cst_117 [0] : vector<12x64xf32> to vector<64xf32>
    %327 = vector.shape_cast %326 : vector<64xf32> to vector<1x64xf32>
    %cst_118 = arith.constant 1.200000e+01 : f32
    %328 = vector.broadcast %cst_118 : f32 to vector<1x64xf32>
    %329 = arith.divf %327, %328 : vector<1x64xf32>
    %330 = vector.broadcast %329 : vector<1x64xf32> to vector<12x64xf32>
    %331 = arith.subf %325, %330 : vector<12x64xf32>
    %332 = vector.broadcast %329 : vector<1x64xf32> to vector<12x64xf32>
    %333 = arith.subf %325, %332 : vector<12x64xf32>
    %334 = arith.mulf %331, %333 : vector<12x64xf32>
    %cst_119 = arith.constant dense<0.000000e+00> : vector<64xf32>
    %335 = vector.multi_reduction <add>, %334, %cst_119 [0] : vector<12x64xf32> to vector<64xf32>
    %336 = vector.shape_cast %335 : vector<64xf32> to vector<1x64xf32>
    %cst_120 = arith.constant 1.200000e+01 : f32
    %337 = vector.broadcast %cst_120 : f32 to vector<1x64xf32>
    %338 = arith.divf %336, %337 : vector<1x64xf32>
    %339 = vector.broadcast %329 : vector<1x64xf32> to vector<12x64xf32>
    %340 = arith.subf %325, %339 : vector<12x64xf32>
    %cst_121 = arith.constant 9.99999974E-6 : f32
    %341 = vector.broadcast %cst_121 : f32 to vector<1x64xf32>
    %342 = arith.addf %338, %341 : vector<1x64xf32>
    %343 = math.rsqrt %342 : vector<1x64xf32>
    %344 = vector.broadcast %343 : vector<1x64xf32> to vector<12x64xf32>
    %345 = arith.mulf %340, %344 : vector<12x64xf32>
    %c56 = arith.constant 56 : index
    %c0_122 = arith.constant 0 : index
    %346 = vector.load %arg4[%c56, %c0_122] : memref<152x64xf32, #tpu.memory_space<vmem>>, vector<1x64xf32>
    %347 = vector.broadcast %346 : vector<1x64xf32> to vector<12x64xf32>
    %348 = arith.mulf %345, %347 : vector<12x64xf32>
    %c64_123 = arith.constant 64 : index
    %c0_124 = arith.constant 0 : index
    %349 = vector.load %arg4[%c64_123, %c0_124] : memref<152x64xf32, #tpu.memory_space<vmem>>, vector<1x64xf32>
    %350 = vector.broadcast %349 : vector<1x64xf32> to vector<12x64xf32>
    %351 = arith.addf %348, %350 : vector<12x64xf32>
    %cst_125 = arith.constant 0.000000e+00 : f32
    %352 = vector.broadcast %cst_125 : f32 to vector<12x64xf32>
    %353 = arith.maximumf %351, %352 : vector<12x64xf32>
    %354 = arith.truncf %353 : vector<12x64xf32> to vector<12x64xbf16>
    %c256 = arith.constant 256 : index
    %c0_126 = arith.constant 0 : index
    %355 = vector.load %arg3[%c256, %c0_126] : memref<688x384xbf16, #tpu.memory_space<vmem>>, vector<64x384xbf16>
    %cst_127 = arith.constant dense<0.000000e+00> : vector<12x384xf32>
    %356 = tpu.matmul %354, %355, %cst_127 {dimension_numbers = #tpu.dot_dimension_numbers<[1], [0], [0], [1], [0, 0, 1, 1], [], []>} : vector<12x64xbf16>, vector<64x384xbf16>, vector<12x384xf32> -> vector<12x384xf32>
    %357 = vector.extract_strided_slice %356 {offsets = [0, 0], sizes = [12, 64], strides = [1, 1]} : vector<12x384xf32> to vector<12x64xf32>
    %c816_128 = arith.constant 816 : index
    %c0_129 = arith.constant 0 : index
    %358 = vector.load %arg2[%c816_128, %c0_129] : memref<848x64xbf16, #tpu.memory_space<vmem>>, vector<12x12xbf16>
    %359 = arith.truncf %357 : vector<12x64xf32> to vector<12x64xbf16>
    %cst_130 = arith.constant dense<0.000000e+00> : vector<12x64xf32>
    %360 = tpu.matmul %358, %359, %cst_130 {dimension_numbers = #tpu.dot_dimension_numbers<[1], [0], [0], [1], [0, 0, 1, 1], [], []>} : vector<12x12xbf16>, vector<12x64xbf16>, vector<12x64xf32> -> vector<12x64xf32>
    %361 = vector.extract_strided_slice %356 {offsets = [0, 128], sizes = [12, 64], strides = [1, 1]} : vector<12x384xf32> to vector<12x64xf32>
    %362 = arith.addf %360, %361 : vector<12x64xf32>
    %363 = vector.extract_strided_slice %356 {offsets = [0, 256], sizes = [12, 64], strides = [1, 1]} : vector<12x384xf32> to vector<12x64xf32>
    %c832_131 = arith.constant 832 : index
    %c0_132 = arith.constant 0 : index
    %364 = vector.load %arg2[%c832_131, %c0_132] : memref<848x64xbf16, #tpu.memory_space<vmem>>, vector<12x12xbf16>
    %365 = arith.truncf %363 : vector<12x64xf32> to vector<12x64xbf16>
    %cst_133 = arith.constant dense<0.000000e+00> : vector<12x64xf32>
    %366 = tpu.matmul %364, %365, %cst_133 {dimension_numbers = #tpu.dot_dimension_numbers<[1], [0], [0], [1], [0, 0, 1, 1], [], []>} : vector<12x12xbf16>, vector<12x64xbf16>, vector<12x64xf32> -> vector<12x64xf32>
    %367 = arith.addf %362, %366 : vector<12x64xf32>
    %cst_134 = arith.constant dense<0.000000e+00> : vector<64xf32>
    %368 = vector.multi_reduction <add>, %367, %cst_134 [0] : vector<12x64xf32> to vector<64xf32>
    %369 = vector.shape_cast %368 : vector<64xf32> to vector<1x64xf32>
    %cst_135 = arith.constant 1.200000e+01 : f32
    %370 = vector.broadcast %cst_135 : f32 to vector<1x64xf32>
    %371 = arith.divf %369, %370 : vector<1x64xf32>
    %372 = vector.broadcast %371 : vector<1x64xf32> to vector<12x64xf32>
    %373 = arith.subf %367, %372 : vector<12x64xf32>
    %374 = vector.broadcast %371 : vector<1x64xf32> to vector<12x64xf32>
    %375 = arith.subf %367, %374 : vector<12x64xf32>
    %376 = arith.mulf %373, %375 : vector<12x64xf32>
    %cst_136 = arith.constant dense<0.000000e+00> : vector<64xf32>
    %377 = vector.multi_reduction <add>, %376, %cst_136 [0] : vector<12x64xf32> to vector<64xf32>
    %378 = vector.shape_cast %377 : vector<64xf32> to vector<1x64xf32>
    %cst_137 = arith.constant 1.200000e+01 : f32
    %379 = vector.broadcast %cst_137 : f32 to vector<1x64xf32>
    %380 = arith.divf %378, %379 : vector<1x64xf32>
    %381 = vector.broadcast %371 : vector<1x64xf32> to vector<12x64xf32>
    %382 = arith.subf %367, %381 : vector<12x64xf32>
    %cst_138 = arith.constant 9.99999974E-6 : f32
    %383 = vector.broadcast %cst_138 : f32 to vector<1x64xf32>
    %384 = arith.addf %380, %383 : vector<1x64xf32>
    %385 = math.rsqrt %384 : vector<1x64xf32>
    %386 = vector.broadcast %385 : vector<1x64xf32> to vector<12x64xf32>
    %387 = arith.mulf %382, %386 : vector<12x64xf32>
    %c72 = arith.constant 72 : index
    %c0_139 = arith.constant 0 : index
    %388 = vector.load %arg4[%c72, %c0_139] : memref<152x64xf32, #tpu.memory_space<vmem>>, vector<1x64xf32>
    %389 = vector.broadcast %388 : vector<1x64xf32> to vector<12x64xf32>
    %390 = arith.mulf %387, %389 : vector<12x64xf32>
    %c80 = arith.constant 80 : index
    %c0_140 = arith.constant 0 : index
    %391 = vector.load %arg4[%c80, %c0_140] : memref<152x64xf32, #tpu.memory_space<vmem>>, vector<1x64xf32>
    %392 = vector.broadcast %391 : vector<1x64xf32> to vector<12x64xf32>
    %393 = arith.addf %390, %392 : vector<12x64xf32>
    %394 = arith.addf %311, %393 : vector<12x64xf32>
    %395 = arith.truncf %394 : vector<12x64xf32> to vector<12x64xbf16>
    %c320 = arith.constant 320 : index
    %c0_141 = arith.constant 0 : index
    %396 = vector.load %arg3[%c320, %c0_141] : memref<688x384xbf16, #tpu.memory_space<vmem>>, vector<64x384xbf16>
    %cst_142 = arith.constant dense<0.000000e+00> : vector<12x384xf32>
    %397 = tpu.matmul %395, %396, %cst_142 {dimension_numbers = #tpu.dot_dimension_numbers<[1], [0], [0], [1], [0, 0, 1, 1], [], []>} : vector<12x64xbf16>, vector<64x384xbf16>, vector<12x384xf32> -> vector<12x384xf32>
    %398 = vector.extract_strided_slice %397 {offsets = [0, 0], sizes = [12, 64], strides = [1, 1]} : vector<12x384xf32> to vector<12x64xf32>
    %c816_143 = arith.constant 816 : index
    %c0_144 = arith.constant 0 : index
    %399 = vector.load %arg2[%c816_143, %c0_144] : memref<848x64xbf16, #tpu.memory_space<vmem>>, vector<12x12xbf16>
    %400 = arith.truncf %398 : vector<12x64xf32> to vector<12x64xbf16>
    %cst_145 = arith.constant dense<0.000000e+00> : vector<12x64xf32>
    %401 = tpu.matmul %399, %400, %cst_145 {dimension_numbers = #tpu.dot_dimension_numbers<[1], [0], [0], [1], [0, 0, 1, 1], [], []>} : vector<12x12xbf16>, vector<12x64xbf16>, vector<12x64xf32> -> vector<12x64xf32>
    %402 = vector.extract_strided_slice %397 {offsets = [0, 128], sizes = [12, 64], strides = [1, 1]} : vector<12x384xf32> to vector<12x64xf32>
    %403 = arith.addf %401, %402 : vector<12x64xf32>
    %404 = vector.extract_strided_slice %397 {offsets = [0, 256], sizes = [12, 64], strides = [1, 1]} : vector<12x384xf32> to vector<12x64xf32>
    %c832_146 = arith.constant 832 : index
    %c0_147 = arith.constant 0 : index
    %405 = vector.load %arg2[%c832_146, %c0_147] : memref<848x64xbf16, #tpu.memory_space<vmem>>, vector<12x12xbf16>
    %406 = arith.truncf %404 : vector<12x64xf32> to vector<12x64xbf16>
    %cst_148 = arith.constant dense<0.000000e+00> : vector<12x64xf32>
    %407 = tpu.matmul %405, %406, %cst_148 {dimension_numbers = #tpu.dot_dimension_numbers<[1], [0], [0], [1], [0, 0, 1, 1], [], []>} : vector<12x12xbf16>, vector<12x64xbf16>, vector<12x64xf32> -> vector<12x64xf32>
    %408 = arith.addf %403, %407 : vector<12x64xf32>
    %cst_149 = arith.constant dense<0.000000e+00> : vector<64xf32>
    %409 = vector.multi_reduction <add>, %408, %cst_149 [0] : vector<12x64xf32> to vector<64xf32>
    %410 = vector.shape_cast %409 : vector<64xf32> to vector<1x64xf32>
    %cst_150 = arith.constant 1.200000e+01 : f32
    %411 = vector.broadcast %cst_150 : f32 to vector<1x64xf32>
    %412 = arith.divf %410, %411 : vector<1x64xf32>
    %413 = vector.broadcast %412 : vector<1x64xf32> to vector<12x64xf32>
    %414 = arith.subf %408, %413 : vector<12x64xf32>
    %415 = vector.broadcast %412 : vector<1x64xf32> to vector<12x64xf32>
    %416 = arith.subf %408, %415 : vector<12x64xf32>
    %417 = arith.mulf %414, %416 : vector<12x64xf32>
    %cst_151 = arith.constant dense<0.000000e+00> : vector<64xf32>
    %418 = vector.multi_reduction <add>, %417, %cst_151 [0] : vector<12x64xf32> to vector<64xf32>
    %419 = vector.shape_cast %418 : vector<64xf32> to vector<1x64xf32>
    %cst_152 = arith.constant 1.200000e+01 : f32
    %420 = vector.broadcast %cst_152 : f32 to vector<1x64xf32>
    %421 = arith.divf %419, %420 : vector<1x64xf32>
    %422 = vector.broadcast %412 : vector<1x64xf32> to vector<12x64xf32>
    %423 = arith.subf %408, %422 : vector<12x64xf32>
    %cst_153 = arith.constant 9.99999974E-6 : f32
    %424 = vector.broadcast %cst_153 : f32 to vector<1x64xf32>
    %425 = arith.addf %421, %424 : vector<1x64xf32>
    %426 = math.rsqrt %425 : vector<1x64xf32>
    %427 = vector.broadcast %426 : vector<1x64xf32> to vector<12x64xf32>
    %428 = arith.mulf %423, %427 : vector<12x64xf32>
    %c88 = arith.constant 88 : index
    %c0_154 = arith.constant 0 : index
    %429 = vector.load %arg4[%c88, %c0_154] : memref<152x64xf32, #tpu.memory_space<vmem>>, vector<1x64xf32>
    %430 = vector.broadcast %429 : vector<1x64xf32> to vector<12x64xf32>
    %431 = arith.mulf %428, %430 : vector<12x64xf32>
    %c96_155 = arith.constant 96 : index
    %c0_156 = arith.constant 0 : index
    %432 = vector.load %arg4[%c96_155, %c0_156] : memref<152x64xf32, #tpu.memory_space<vmem>>, vector<1x64xf32>
    %433 = vector.broadcast %432 : vector<1x64xf32> to vector<12x64xf32>
    %434 = arith.addf %431, %433 : vector<12x64xf32>
    %cst_157 = arith.constant 0.000000e+00 : f32
    %435 = vector.broadcast %cst_157 : f32 to vector<12x64xf32>
    %436 = arith.maximumf %434, %435 : vector<12x64xf32>
    %437 = arith.truncf %436 : vector<12x64xf32> to vector<12x64xbf16>
    %c384 = arith.constant 384 : index
    %c0_158 = arith.constant 0 : index
    %438 = vector.load %arg3[%c384, %c0_158] : memref<688x384xbf16, #tpu.memory_space<vmem>>, vector<64x384xbf16>
    %cst_159 = arith.constant dense<0.000000e+00> : vector<12x384xf32>
    %439 = tpu.matmul %437, %438, %cst_159 {dimension_numbers = #tpu.dot_dimension_numbers<[1], [0], [0], [1], [0, 0, 1, 1], [], []>} : vector<12x64xbf16>, vector<64x384xbf16>, vector<12x384xf32> -> vector<12x384xf32>
    %440 = vector.extract_strided_slice %439 {offsets = [0, 0], sizes = [12, 64], strides = [1, 1]} : vector<12x384xf32> to vector<12x64xf32>
    %c816_160 = arith.constant 816 : index
    %c0_161 = arith.constant 0 : index
    %441 = vector.load %arg2[%c816_160, %c0_161] : memref<848x64xbf16, #tpu.memory_space<vmem>>, vector<12x12xbf16>
    %442 = arith.truncf %440 : vector<12x64xf32> to vector<12x64xbf16>
    %cst_162 = arith.constant dense<0.000000e+00> : vector<12x64xf32>
    %443 = tpu.matmul %441, %442, %cst_162 {dimension_numbers = #tpu.dot_dimension_numbers<[1], [0], [0], [1], [0, 0, 1, 1], [], []>} : vector<12x12xbf16>, vector<12x64xbf16>, vector<12x64xf32> -> vector<12x64xf32>
    %444 = vector.extract_strided_slice %439 {offsets = [0, 128], sizes = [12, 64], strides = [1, 1]} : vector<12x384xf32> to vector<12x64xf32>
    %445 = arith.addf %443, %444 : vector<12x64xf32>
    %446 = vector.extract_strided_slice %439 {offsets = [0, 256], sizes = [12, 64], strides = [1, 1]} : vector<12x384xf32> to vector<12x64xf32>
    %c832_163 = arith.constant 832 : index
    %c0_164 = arith.constant 0 : index
    %447 = vector.load %arg2[%c832_163, %c0_164] : memref<848x64xbf16, #tpu.memory_space<vmem>>, vector<12x12xbf16>
    %448 = arith.truncf %446 : vector<12x64xf32> to vector<12x64xbf16>
    %cst_165 = arith.constant dense<0.000000e+00> : vector<12x64xf32>
    %449 = tpu.matmul %447, %448, %cst_165 {dimension_numbers = #tpu.dot_dimension_numbers<[1], [0], [0], [1], [0, 0, 1, 1], [], []>} : vector<12x12xbf16>, vector<12x64xbf16>, vector<12x64xf32> -> vector<12x64xf32>
    %450 = arith.addf %445, %449 : vector<12x64xf32>
    %cst_166 = arith.constant dense<0.000000e+00> : vector<64xf32>
    %451 = vector.multi_reduction <add>, %450, %cst_166 [0] : vector<12x64xf32> to vector<64xf32>
    %452 = vector.shape_cast %451 : vector<64xf32> to vector<1x64xf32>
    %cst_167 = arith.constant 1.200000e+01 : f32
    %453 = vector.broadcast %cst_167 : f32 to vector<1x64xf32>
    %454 = arith.divf %452, %453 : vector<1x64xf32>
    %455 = vector.broadcast %454 : vector<1x64xf32> to vector<12x64xf32>
    %456 = arith.subf %450, %455 : vector<12x64xf32>
    %457 = vector.broadcast %454 : vector<1x64xf32> to vector<12x64xf32>
    %458 = arith.subf %450, %457 : vector<12x64xf32>
    %459 = arith.mulf %456, %458 : vector<12x64xf32>
    %cst_168 = arith.constant dense<0.000000e+00> : vector<64xf32>
    %460 = vector.multi_reduction <add>, %459, %cst_168 [0] : vector<12x64xf32> to vector<64xf32>
    %461 = vector.shape_cast %460 : vector<64xf32> to vector<1x64xf32>
    %cst_169 = arith.constant 1.200000e+01 : f32
    %462 = vector.broadcast %cst_169 : f32 to vector<1x64xf32>
    %463 = arith.divf %461, %462 : vector<1x64xf32>
    %464 = vector.broadcast %454 : vector<1x64xf32> to vector<12x64xf32>
    %465 = arith.subf %450, %464 : vector<12x64xf32>
    %cst_170 = arith.constant 9.99999974E-6 : f32
    %466 = vector.broadcast %cst_170 : f32 to vector<1x64xf32>
    %467 = arith.addf %463, %466 : vector<1x64xf32>
    %468 = math.rsqrt %467 : vector<1x64xf32>
    %469 = vector.broadcast %468 : vector<1x64xf32> to vector<12x64xf32>
    %470 = arith.mulf %465, %469 : vector<12x64xf32>
    %c104 = arith.constant 104 : index
    %c0_171 = arith.constant 0 : index
    %471 = vector.load %arg4[%c104, %c0_171] : memref<152x64xf32, #tpu.memory_space<vmem>>, vector<1x64xf32>
    %472 = vector.broadcast %471 : vector<1x64xf32> to vector<12x64xf32>
    %473 = arith.mulf %470, %472 : vector<12x64xf32>
    %c112 = arith.constant 112 : index
    %c0_172 = arith.constant 0 : index
    %474 = vector.load %arg4[%c112, %c0_172] : memref<152x64xf32, #tpu.memory_space<vmem>>, vector<1x64xf32>
    %475 = vector.broadcast %474 : vector<1x64xf32> to vector<12x64xf32>
    %476 = arith.addf %473, %475 : vector<12x64xf32>
    %477 = arith.addf %394, %476 : vector<12x64xf32>
    %478 = arith.truncf %477 : vector<12x64xf32> to vector<12x64xbf16>
    %c448 = arith.constant 448 : index
    %c0_173 = arith.constant 0 : index
    %479 = vector.load %arg3[%c448, %c0_173] : memref<688x384xbf16, #tpu.memory_space<vmem>>, vector<64x384xbf16>
    %cst_174 = arith.constant dense<0.000000e+00> : vector<12x384xf32>
    %480 = tpu.matmul %478, %479, %cst_174 {dimension_numbers = #tpu.dot_dimension_numbers<[1], [0], [0], [1], [0, 0, 1, 1], [], []>} : vector<12x64xbf16>, vector<64x384xbf16>, vector<12x384xf32> -> vector<12x384xf32>
    %481 = vector.extract_strided_slice %480 {offsets = [0, 0], sizes = [12, 64], strides = [1, 1]} : vector<12x384xf32> to vector<12x64xf32>
    %c816_175 = arith.constant 816 : index
    %c0_176 = arith.constant 0 : index
    %482 = vector.load %arg2[%c816_175, %c0_176] : memref<848x64xbf16, #tpu.memory_space<vmem>>, vector<12x12xbf16>
    %483 = arith.truncf %481 : vector<12x64xf32> to vector<12x64xbf16>
    %cst_177 = arith.constant dense<0.000000e+00> : vector<12x64xf32>
    %484 = tpu.matmul %482, %483, %cst_177 {dimension_numbers = #tpu.dot_dimension_numbers<[1], [0], [0], [1], [0, 0, 1, 1], [], []>} : vector<12x12xbf16>, vector<12x64xbf16>, vector<12x64xf32> -> vector<12x64xf32>
    %485 = vector.extract_strided_slice %480 {offsets = [0, 128], sizes = [12, 64], strides = [1, 1]} : vector<12x384xf32> to vector<12x64xf32>
    %486 = arith.addf %484, %485 : vector<12x64xf32>
    %487 = vector.extract_strided_slice %480 {offsets = [0, 256], sizes = [12, 64], strides = [1, 1]} : vector<12x384xf32> to vector<12x64xf32>
    %c832_178 = arith.constant 832 : index
    %c0_179 = arith.constant 0 : index
    %488 = vector.load %arg2[%c832_178, %c0_179] : memref<848x64xbf16, #tpu.memory_space<vmem>>, vector<12x12xbf16>
    %489 = arith.truncf %487 : vector<12x64xf32> to vector<12x64xbf16>
    %cst_180 = arith.constant dense<0.000000e+00> : vector<12x64xf32>
    %490 = tpu.matmul %488, %489, %cst_180 {dimension_numbers = #tpu.dot_dimension_numbers<[1], [0], [0], [1], [0, 0, 1, 1], [], []>} : vector<12x12xbf16>, vector<12x64xbf16>, vector<12x64xf32> -> vector<12x64xf32>
    %491 = arith.addf %486, %490 : vector<12x64xf32>
    %cst_181 = arith.constant dense<0.000000e+00> : vector<64xf32>
    %492 = vector.multi_reduction <add>, %491, %cst_181 [0] : vector<12x64xf32> to vector<64xf32>
    %493 = vector.shape_cast %492 : vector<64xf32> to vector<1x64xf32>
    %cst_182 = arith.constant 1.200000e+01 : f32
    %494 = vector.broadcast %cst_182 : f32 to vector<1x64xf32>
    %495 = arith.divf %493, %494 : vector<1x64xf32>
    %496 = vector.broadcast %495 : vector<1x64xf32> to vector<12x64xf32>
    %497 = arith.subf %491, %496 : vector<12x64xf32>
    %498 = vector.broadcast %495 : vector<1x64xf32> to vector<12x64xf32>
    %499 = arith.subf %491, %498 : vector<12x64xf32>
    %500 = arith.mulf %497, %499 : vector<12x64xf32>
    %cst_183 = arith.constant dense<0.000000e+00> : vector<64xf32>
    %501 = vector.multi_reduction <add>, %500, %cst_183 [0] : vector<12x64xf32> to vector<64xf32>
    %502 = vector.shape_cast %501 : vector<64xf32> to vector<1x64xf32>
    %cst_184 = arith.constant 1.200000e+01 : f32
    %503 = vector.broadcast %cst_184 : f32 to vector<1x64xf32>
    %504 = arith.divf %502, %503 : vector<1x64xf32>
    %505 = vector.broadcast %495 : vector<1x64xf32> to vector<12x64xf32>
    %506 = arith.subf %491, %505 : vector<12x64xf32>
    %cst_185 = arith.constant 9.99999974E-6 : f32
    %507 = vector.broadcast %cst_185 : f32 to vector<1x64xf32>
    %508 = arith.addf %504, %507 : vector<1x64xf32>
    %509 = math.rsqrt %508 : vector<1x64xf32>
    %510 = vector.broadcast %509 : vector<1x64xf32> to vector<12x64xf32>
    %511 = arith.mulf %506, %510 : vector<12x64xf32>
    %c120 = arith.constant 120 : index
    %c0_186 = arith.constant 0 : index
    %512 = vector.load %arg4[%c120, %c0_186] : memref<152x64xf32, #tpu.memory_space<vmem>>, vector<1x64xf32>
    %513 = vector.broadcast %512 : vector<1x64xf32> to vector<12x64xf32>
    %514 = arith.mulf %511, %513 : vector<12x64xf32>
    %c128_187 = arith.constant 128 : index
    %c0_188 = arith.constant 0 : index
    %515 = vector.load %arg4[%c128_187, %c0_188] : memref<152x64xf32, #tpu.memory_space<vmem>>, vector<1x64xf32>
    %516 = vector.broadcast %515 : vector<1x64xf32> to vector<12x64xf32>
    %517 = arith.addf %514, %516 : vector<12x64xf32>
    %cst_189 = arith.constant 0.000000e+00 : f32
    %518 = vector.broadcast %cst_189 : f32 to vector<12x64xf32>
    %519 = arith.maximumf %517, %518 : vector<12x64xf32>
    %520 = arith.truncf %519 : vector<12x64xf32> to vector<12x64xbf16>
    %c512 = arith.constant 512 : index
    %c0_190 = arith.constant 0 : index
    %521 = vector.load %arg3[%c512, %c0_190] : memref<688x384xbf16, #tpu.memory_space<vmem>>, vector<64x384xbf16>
    %cst_191 = arith.constant dense<0.000000e+00> : vector<12x384xf32>
    %522 = tpu.matmul %520, %521, %cst_191 {dimension_numbers = #tpu.dot_dimension_numbers<[1], [0], [0], [1], [0, 0, 1, 1], [], []>} : vector<12x64xbf16>, vector<64x384xbf16>, vector<12x384xf32> -> vector<12x384xf32>
    %523 = vector.extract_strided_slice %522 {offsets = [0, 0], sizes = [12, 64], strides = [1, 1]} : vector<12x384xf32> to vector<12x64xf32>
    %c816_192 = arith.constant 816 : index
    %c0_193 = arith.constant 0 : index
    %524 = vector.load %arg2[%c816_192, %c0_193] : memref<848x64xbf16, #tpu.memory_space<vmem>>, vector<12x12xbf16>
    %525 = arith.truncf %523 : vector<12x64xf32> to vector<12x64xbf16>
    %cst_194 = arith.constant dense<0.000000e+00> : vector<12x64xf32>
    %526 = tpu.matmul %524, %525, %cst_194 {dimension_numbers = #tpu.dot_dimension_numbers<[1], [0], [0], [1], [0, 0, 1, 1], [], []>} : vector<12x12xbf16>, vector<12x64xbf16>, vector<12x64xf32> -> vector<12x64xf32>
    %527 = vector.extract_strided_slice %522 {offsets = [0, 128], sizes = [12, 64], strides = [1, 1]} : vector<12x384xf32> to vector<12x64xf32>
    %528 = arith.addf %526, %527 : vector<12x64xf32>
    %529 = vector.extract_strided_slice %522 {offsets = [0, 256], sizes = [12, 64], strides = [1, 1]} : vector<12x384xf32> to vector<12x64xf32>
    %c832_195 = arith.constant 832 : index
    %c0_196 = arith.constant 0 : index
    %530 = vector.load %arg2[%c832_195, %c0_196] : memref<848x64xbf16, #tpu.memory_space<vmem>>, vector<12x12xbf16>
    %531 = arith.truncf %529 : vector<12x64xf32> to vector<12x64xbf16>
    %cst_197 = arith.constant dense<0.000000e+00> : vector<12x64xf32>
    %532 = tpu.matmul %530, %531, %cst_197 {dimension_numbers = #tpu.dot_dimension_numbers<[1], [0], [0], [1], [0, 0, 1, 1], [], []>} : vector<12x12xbf16>, vector<12x64xbf16>, vector<12x64xf32> -> vector<12x64xf32>
    %533 = arith.addf %528, %532 : vector<12x64xf32>
    %cst_198 = arith.constant dense<0.000000e+00> : vector<64xf32>
    %534 = vector.multi_reduction <add>, %533, %cst_198 [0] : vector<12x64xf32> to vector<64xf32>
    %535 = vector.shape_cast %534 : vector<64xf32> to vector<1x64xf32>
    %cst_199 = arith.constant 1.200000e+01 : f32
    %536 = vector.broadcast %cst_199 : f32 to vector<1x64xf32>
    %537 = arith.divf %535, %536 : vector<1x64xf32>
    %538 = vector.broadcast %537 : vector<1x64xf32> to vector<12x64xf32>
    %539 = arith.subf %533, %538 : vector<12x64xf32>
    %540 = vector.broadcast %537 : vector<1x64xf32> to vector<12x64xf32>
    %541 = arith.subf %533, %540 : vector<12x64xf32>
    %542 = arith.mulf %539, %541 : vector<12x64xf32>
    %cst_200 = arith.constant dense<0.000000e+00> : vector<64xf32>
    %543 = vector.multi_reduction <add>, %542, %cst_200 [0] : vector<12x64xf32> to vector<64xf32>
    %544 = vector.shape_cast %543 : vector<64xf32> to vector<1x64xf32>
    %cst_201 = arith.constant 1.200000e+01 : f32
    %545 = vector.broadcast %cst_201 : f32 to vector<1x64xf32>
    %546 = arith.divf %544, %545 : vector<1x64xf32>
    %547 = vector.broadcast %537 : vector<1x64xf32> to vector<12x64xf32>
    %548 = arith.subf %533, %547 : vector<12x64xf32>
    %cst_202 = arith.constant 9.99999974E-6 : f32
    %549 = vector.broadcast %cst_202 : f32 to vector<1x64xf32>
    %550 = arith.addf %546, %549 : vector<1x64xf32>
    %551 = math.rsqrt %550 : vector<1x64xf32>
    %552 = vector.broadcast %551 : vector<1x64xf32> to vector<12x64xf32>
    %553 = arith.mulf %548, %552 : vector<12x64xf32>
    %c136 = arith.constant 136 : index
    %c0_203 = arith.constant 0 : index
    %554 = vector.load %arg4[%c136, %c0_203] : memref<152x64xf32, #tpu.memory_space<vmem>>, vector<1x64xf32>
    %555 = vector.broadcast %554 : vector<1x64xf32> to vector<12x64xf32>
    %556 = arith.mulf %553, %555 : vector<12x64xf32>
    %c144 = arith.constant 144 : index
    %c0_204 = arith.constant 0 : index
    %557 = vector.load %arg4[%c144, %c0_204] : memref<152x64xf32, #tpu.memory_space<vmem>>, vector<1x64xf32>
    %558 = vector.broadcast %557 : vector<1x64xf32> to vector<12x64xf32>
    %559 = arith.addf %556, %558 : vector<12x64xf32>
    %560 = arith.addf %477, %559 : vector<12x64xf32>
    %561 = arith.truncf %560 : vector<12x64xf32> to vector<12x64xbf16>
    %c576 = arith.constant 576 : index
    %c0_205 = arith.constant 0 : index
    %562 = vector.load %arg3[%c576, %c0_205] : memref<688x384xbf16, #tpu.memory_space<vmem>>, vector<64x384xbf16>
    %cst_206 = arith.constant dense<0.000000e+00> : vector<12x384xf32>
    %563 = tpu.matmul %561, %562, %cst_206 {dimension_numbers = #tpu.dot_dimension_numbers<[1], [0], [0], [1], [0, 0, 1, 1], [], []>} : vector<12x64xbf16>, vector<64x384xbf16>, vector<12x384xf32> -> vector<12x384xf32>
    %564 = vector.extract_strided_slice %563 {offsets = [0, 0], sizes = [12, 32], strides = [1, 1]} : vector<12x384xf32> to vector<12x32xf32>
    %c112_207 = arith.constant 112 : index
    %c0_208 = arith.constant 0 : index
    %565 = vector.load %arg2[%c112_207, %c0_208] : memref<848x64xbf16, #tpu.memory_space<vmem>>, vector<26x12xbf16>
    %566 = arith.truncf %564 : vector<12x32xf32> to vector<12x32xbf16>
    %cst_209 = arith.constant dense<0.000000e+00> : vector<26x32xf32>
    %567 = tpu.matmul %565, %566, %cst_209 {dimension_numbers = #tpu.dot_dimension_numbers<[1], [0], [0], [1], [0, 0, 1, 1], [], []>} : vector<26x12xbf16>, vector<12x32xbf16>, vector<26x32xf32> -> vector<26x32xf32>
    %568 = vector.extract_strided_slice %563 {offsets = [0, 128], sizes = [12, 32], strides = [1, 1]} : vector<12x384xf32> to vector<12x32xf32>
    %c384_210 = arith.constant 384 : index
    %c0_211 = arith.constant 0 : index
    %569 = vector.load %arg2[%c384_210, %c0_211] : memref<848x64xbf16, #tpu.memory_space<vmem>>, vector<26x12xbf16>
    %570 = arith.truncf %568 : vector<12x32xf32> to vector<12x32xbf16>
    %cst_212 = arith.constant dense<0.000000e+00> : vector<26x32xf32>
    %571 = tpu.matmul %569, %570, %cst_212 {dimension_numbers = #tpu.dot_dimension_numbers<[1], [0], [0], [1], [0, 0, 1, 1], [], []>} : vector<26x12xbf16>, vector<12x32xbf16>, vector<26x32xf32> -> vector<26x32xf32>
    %572 = arith.addf %567, %571 : vector<26x32xf32>
    %573 = vector.extract_strided_slice %563 {offsets = [0, 256], sizes = [12, 32], strides = [1, 1]} : vector<12x384xf32> to vector<12x32xf32>
    %c656 = arith.constant 656 : index
    %c0_213 = arith.constant 0 : index
    %574 = vector.load %arg2[%c656, %c0_213] : memref<848x64xbf16, #tpu.memory_space<vmem>>, vector<26x12xbf16>
    %575 = arith.truncf %573 : vector<12x32xf32> to vector<12x32xbf16>
    %cst_214 = arith.constant dense<0.000000e+00> : vector<26x32xf32>
    %576 = tpu.matmul %574, %575, %cst_214 {dimension_numbers = #tpu.dot_dimension_numbers<[1], [0], [0], [1], [0, 0, 1, 1], [], []>} : vector<26x12xbf16>, vector<12x32xbf16>, vector<26x32xf32> -> vector<26x32xf32>
    %577 = arith.addf %572, %576 : vector<26x32xf32>
    %578 = tpu.iota {dimensions = array<i32: 0>} : vector<26x32xi32>
    %c0_i32_215 = arith.constant 0 : i32
    %579 = vector.broadcast %c0_i32_215 : i32 to vector<26x32xi32>
    %580 = arith.cmpi sge, %578, %579 : vector<26x32xi32>
    %c13_i32 = arith.constant 13 : i32
    %581 = vector.broadcast %c13_i32 : i32 to vector<26x32xi32>
    %582 = arith.cmpi slt, %578, %581 : vector<26x32xi32>
    %583 = arith.andi %580, %582 : vector<26x32xi1>
    %cst_216 = arith.constant 1.000000e+00 : f32
    %cst_217 = arith.constant 0.000000e+00 : f32
    %584 = vector.broadcast %cst_216 : f32 to vector<26x32xf32>
    %585 = vector.broadcast %cst_217 : f32 to vector<26x32xf32>
    %586 = arith.select %583, %584, %585 : vector<26x32xi1>, vector<26x32xf32>
    %c13_i32_218 = arith.constant 13 : i32
    %587 = vector.broadcast %c13_i32_218 : i32 to vector<26x32xi32>
    %588 = arith.cmpi sge, %578, %587 : vector<26x32xi32>
    %c26_i32 = arith.constant 26 : i32
    %589 = vector.broadcast %c26_i32 : i32 to vector<26x32xi32>
    %590 = arith.cmpi slt, %578, %589 : vector<26x32xi32>
    %591 = arith.andi %588, %590 : vector<26x32xi1>
    %cst_219 = arith.constant 1.000000e+00 : f32
    %cst_220 = arith.constant 0.000000e+00 : f32
    %592 = vector.broadcast %cst_219 : f32 to vector<26x32xf32>
    %593 = vector.broadcast %cst_220 : f32 to vector<26x32xf32>
    %594 = arith.select %591, %592, %593 : vector<26x32xi1>, vector<26x32xf32>
    %595 = arith.mulf %577, %586 : vector<26x32xf32>
    %cst_221 = arith.constant dense<0.000000e+00> : vector<32xf32>
    %596 = vector.multi_reduction <add>, %595, %cst_221 [0] : vector<26x32xf32> to vector<32xf32>
    %597 = vector.shape_cast %596 : vector<32xf32> to vector<1x32xf32>
    %cst_222 = arith.constant 0.0769230798 : f32
    %598 = vector.broadcast %cst_222 : f32 to vector<1x32xf32>
    %599 = arith.mulf %597, %598 : vector<1x32xf32>
    %600 = vector.broadcast %599 : vector<1x32xf32> to vector<26x32xf32>
    %601 = arith.mulf %600, %586 : vector<26x32xf32>
    %602 = arith.mulf %577, %594 : vector<26x32xf32>
    %cst_223 = arith.constant dense<0.000000e+00> : vector<32xf32>
    %603 = vector.multi_reduction <add>, %602, %cst_223 [0] : vector<26x32xf32> to vector<32xf32>
    %604 = vector.shape_cast %603 : vector<32xf32> to vector<1x32xf32>
    %cst_224 = arith.constant 0.0769230798 : f32
    %605 = vector.broadcast %cst_224 : f32 to vector<1x32xf32>
    %606 = arith.mulf %604, %605 : vector<1x32xf32>
    %607 = vector.broadcast %606 : vector<1x32xf32> to vector<26x32xf32>
    %608 = arith.mulf %607, %594 : vector<26x32xf32>
    %609 = arith.addf %601, %608 : vector<26x32xf32>
    %610 = arith.subf %577, %609 : vector<26x32xf32>
    %611 = arith.mulf %610, %610 : vector<26x32xf32>
    %612 = arith.mulf %611, %586 : vector<26x32xf32>
    %cst_225 = arith.constant dense<0.000000e+00> : vector<32xf32>
    %613 = vector.multi_reduction <add>, %612, %cst_225 [0] : vector<26x32xf32> to vector<32xf32>
    %614 = vector.shape_cast %613 : vector<32xf32> to vector<1x32xf32>
    %cst_226 = arith.constant 0.0769230798 : f32
    %615 = vector.broadcast %cst_226 : f32 to vector<1x32xf32>
    %616 = arith.mulf %614, %615 : vector<1x32xf32>
    %617 = vector.broadcast %616 : vector<1x32xf32> to vector<26x32xf32>
    %618 = arith.mulf %617, %586 : vector<26x32xf32>
    %619 = arith.mulf %610, %610 : vector<26x32xf32>
    %620 = arith.mulf %619, %594 : vector<26x32xf32>
    %cst_227 = arith.constant dense<0.000000e+00> : vector<32xf32>
    %621 = vector.multi_reduction <add>, %620, %cst_227 [0] : vector<26x32xf32> to vector<32xf32>
    %622 = vector.shape_cast %621 : vector<32xf32> to vector<1x32xf32>
    %cst_228 = arith.constant 0.0769230798 : f32
    %623 = vector.broadcast %cst_228 : f32 to vector<1x32xf32>
    %624 = arith.mulf %622, %623 : vector<1x32xf32>
    %625 = vector.broadcast %624 : vector<1x32xf32> to vector<26x32xf32>
    %626 = arith.mulf %625, %594 : vector<26x32xf32>
    %627 = arith.addf %618, %626 : vector<26x32xf32>
    %cst_229 = arith.constant 9.99999974E-6 : f32
    %628 = vector.broadcast %cst_229 : f32 to vector<26x32xf32>
    %629 = arith.addf %627, %628 : vector<26x32xf32>
    %630 = math.rsqrt %629 : vector<26x32xf32>
    %631 = arith.mulf %610, %630 : vector<26x32xf32>
    %cst_230 = arith.constant 0.000000e+00 : f32
    %632 = vector.broadcast %cst_230 : f32 to vector<26x32xf32>
    %633 = arith.maximumf %631, %632 : vector<26x32xf32>
    %634 = arith.truncf %633 : vector<26x32xf32> to vector<26x32xbf16>
    %c640_231 = arith.constant 640 : index
    %c0_232 = arith.constant 0 : index
    %635 = vector.load %arg3[%c640_231, %c0_232] : memref<688x384xbf16, #tpu.memory_space<vmem>>, vector<32x384xbf16>
    %cst_233 = arith.constant dense<0.000000e+00> : vector<26x384xf32>
    %636 = tpu.matmul %634, %635, %cst_233 {dimension_numbers = #tpu.dot_dimension_numbers<[1], [0], [0], [1], [0, 0, 1, 1], [], []>} : vector<26x32xbf16>, vector<32x384xbf16>, vector<26x384xf32> -> vector<26x384xf32>
    %637 = vector.extract_strided_slice %636 {offsets = [0, 0], sizes = [26, 16], strides = [1, 1]} : vector<26x384xf32> to vector<26x16xf32>
    %c144_234 = arith.constant 144 : index
    %c0_235 = arith.constant 0 : index
    %638 = vector.load %arg2[%c144_234, %c0_235] : memref<848x64xbf16, #tpu.memory_space<vmem>>, vector<54x26xbf16>
    %639 = arith.truncf %637 : vector<26x16xf32> to vector<26x16xbf16>
    %cst_236 = arith.constant dense<0.000000e+00> : vector<54x16xf32>
    %640 = tpu.matmul %638, %639, %cst_236 {dimension_numbers = #tpu.dot_dimension_numbers<[1], [0], [0], [1], [0, 0, 1, 1], [], []>} : vector<54x26xbf16>, vector<26x16xbf16>, vector<54x16xf32> -> vector<54x16xf32>
    %641 = vector.extract_strided_slice %636 {offsets = [0, 128], sizes = [26, 16], strides = [1, 1]} : vector<26x384xf32> to vector<26x16xf32>
    %c416 = arith.constant 416 : index
    %c0_237 = arith.constant 0 : index
    %642 = vector.load %arg2[%c416, %c0_237] : memref<848x64xbf16, #tpu.memory_space<vmem>>, vector<54x26xbf16>
    %643 = arith.truncf %641 : vector<26x16xf32> to vector<26x16xbf16>
    %cst_238 = arith.constant dense<0.000000e+00> : vector<54x16xf32>
    %644 = tpu.matmul %642, %643, %cst_238 {dimension_numbers = #tpu.dot_dimension_numbers<[1], [0], [0], [1], [0, 0, 1, 1], [], []>} : vector<54x26xbf16>, vector<26x16xbf16>, vector<54x16xf32> -> vector<54x16xf32>
    %645 = arith.addf %640, %644 : vector<54x16xf32>
    %646 = vector.extract_strided_slice %636 {offsets = [0, 256], sizes = [26, 16], strides = [1, 1]} : vector<26x384xf32> to vector<26x16xf32>
    %c688 = arith.constant 688 : index
    %c0_239 = arith.constant 0 : index
    %647 = vector.load %arg2[%c688, %c0_239] : memref<848x64xbf16, #tpu.memory_space<vmem>>, vector<54x26xbf16>
    %648 = arith.truncf %646 : vector<26x16xf32> to vector<26x16xbf16>
    %cst_240 = arith.constant dense<0.000000e+00> : vector<54x16xf32>
    %649 = tpu.matmul %647, %648, %cst_240 {dimension_numbers = #tpu.dot_dimension_numbers<[1], [0], [0], [1], [0, 0, 1, 1], [], []>} : vector<54x26xbf16>, vector<26x16xbf16>, vector<54x16xf32> -> vector<54x16xf32>
    %650 = arith.addf %645, %649 : vector<54x16xf32>
    %651 = tpu.iota {dimensions = array<i32: 0>} : vector<54x16xi32>
    %c0_i32_241 = arith.constant 0 : i32
    %652 = vector.broadcast %c0_i32_241 : i32 to vector<54x16xi32>
    %653 = arith.cmpi sge, %651, %652 : vector<54x16xi32>
    %c27_i32 = arith.constant 27 : i32
    %654 = vector.broadcast %c27_i32 : i32 to vector<54x16xi32>
    %655 = arith.cmpi slt, %651, %654 : vector<54x16xi32>
    %656 = arith.andi %653, %655 : vector<54x16xi1>
    %cst_242 = arith.constant 1.000000e+00 : f32
    %cst_243 = arith.constant 0.000000e+00 : f32
    %657 = vector.broadcast %cst_242 : f32 to vector<54x16xf32>
    %658 = vector.broadcast %cst_243 : f32 to vector<54x16xf32>
    %659 = arith.select %656, %657, %658 : vector<54x16xi1>, vector<54x16xf32>
    %c27_i32_244 = arith.constant 27 : i32
    %660 = vector.broadcast %c27_i32_244 : i32 to vector<54x16xi32>
    %661 = arith.cmpi sge, %651, %660 : vector<54x16xi32>
    %c54_i32 = arith.constant 54 : i32
    %662 = vector.broadcast %c54_i32 : i32 to vector<54x16xi32>
    %663 = arith.cmpi slt, %651, %662 : vector<54x16xi32>
    %664 = arith.andi %661, %663 : vector<54x16xi1>
    %cst_245 = arith.constant 1.000000e+00 : f32
    %cst_246 = arith.constant 0.000000e+00 : f32
    %665 = vector.broadcast %cst_245 : f32 to vector<54x16xf32>
    %666 = vector.broadcast %cst_246 : f32 to vector<54x16xf32>
    %667 = arith.select %664, %665, %666 : vector<54x16xi1>, vector<54x16xf32>
    %668 = arith.mulf %650, %659 : vector<54x16xf32>
    %cst_247 = arith.constant dense<0.000000e+00> : vector<16xf32>
    %669 = vector.multi_reduction <add>, %668, %cst_247 [0] : vector<54x16xf32> to vector<16xf32>
    %670 = vector.shape_cast %669 : vector<16xf32> to vector<1x16xf32>
    %cst_248 = arith.constant 0.0370370373 : f32
    %671 = vector.broadcast %cst_248 : f32 to vector<1x16xf32>
    %672 = arith.mulf %670, %671 : vector<1x16xf32>
    %673 = vector.broadcast %672 : vector<1x16xf32> to vector<54x16xf32>
    %674 = arith.mulf %673, %659 : vector<54x16xf32>
    %675 = arith.mulf %650, %667 : vector<54x16xf32>
    %cst_249 = arith.constant dense<0.000000e+00> : vector<16xf32>
    %676 = vector.multi_reduction <add>, %675, %cst_249 [0] : vector<54x16xf32> to vector<16xf32>
    %677 = vector.shape_cast %676 : vector<16xf32> to vector<1x16xf32>
    %cst_250 = arith.constant 0.0370370373 : f32
    %678 = vector.broadcast %cst_250 : f32 to vector<1x16xf32>
    %679 = arith.mulf %677, %678 : vector<1x16xf32>
    %680 = vector.broadcast %679 : vector<1x16xf32> to vector<54x16xf32>
    %681 = arith.mulf %680, %667 : vector<54x16xf32>
    %682 = arith.addf %674, %681 : vector<54x16xf32>
    %683 = arith.subf %650, %682 : vector<54x16xf32>
    %684 = arith.mulf %683, %683 : vector<54x16xf32>
    %685 = arith.mulf %684, %659 : vector<54x16xf32>
    %cst_251 = arith.constant dense<0.000000e+00> : vector<16xf32>
    %686 = vector.multi_reduction <add>, %685, %cst_251 [0] : vector<54x16xf32> to vector<16xf32>
    %687 = vector.shape_cast %686 : vector<16xf32> to vector<1x16xf32>
    %cst_252 = arith.constant 0.0370370373 : f32
    %688 = vector.broadcast %cst_252 : f32 to vector<1x16xf32>
    %689 = arith.mulf %687, %688 : vector<1x16xf32>
    %690 = vector.broadcast %689 : vector<1x16xf32> to vector<54x16xf32>
    %691 = arith.mulf %690, %659 : vector<54x16xf32>
    %692 = arith.mulf %683, %683 : vector<54x16xf32>
    %693 = arith.mulf %692, %667 : vector<54x16xf32>
    %cst_253 = arith.constant dense<0.000000e+00> : vector<16xf32>
    %694 = vector.multi_reduction <add>, %693, %cst_253 [0] : vector<54x16xf32> to vector<16xf32>
    %695 = vector.shape_cast %694 : vector<16xf32> to vector<1x16xf32>
    %cst_254 = arith.constant 0.0370370373 : f32
    %696 = vector.broadcast %cst_254 : f32 to vector<1x16xf32>
    %697 = arith.mulf %695, %696 : vector<1x16xf32>
    %698 = vector.broadcast %697 : vector<1x16xf32> to vector<54x16xf32>
    %699 = arith.mulf %698, %667 : vector<54x16xf32>
    %700 = arith.addf %691, %699 : vector<54x16xf32>
    %cst_255 = arith.constant 9.99999974E-6 : f32
    %701 = vector.broadcast %cst_255 : f32 to vector<54x16xf32>
    %702 = arith.addf %700, %701 : vector<54x16xf32>
    %703 = math.rsqrt %702 : vector<54x16xf32>
    %704 = arith.mulf %683, %703 : vector<54x16xf32>
    %cst_256 = arith.constant 0.000000e+00 : f32
    %705 = vector.broadcast %cst_256 : f32 to vector<54x16xf32>
    %706 = arith.maximumf %704, %705 : vector<54x16xf32>
    %707 = arith.truncf %706 : vector<54x16xf32> to vector<54x16xbf16>
    %c672 = arith.constant 672 : index
    %c0_257 = arith.constant 0 : index
    %708 = vector.load %arg3[%c672, %c0_257] : memref<688x384xbf16, #tpu.memory_space<vmem>>, vector<16x384xbf16>
    %cst_258 = arith.constant dense<0.000000e+00> : vector<54x384xf32>
    %709 = tpu.matmul %707, %708, %cst_258 {dimension_numbers = #tpu.dot_dimension_numbers<[1], [0], [0], [1], [0, 0, 1, 1], [], []>} : vector<54x16xbf16>, vector<16x384xbf16>, vector<54x384xf32> -> vector<54x384xf32>
    %710 = vector.extract_strided_slice %709 {offsets = [0, 0], sizes = [54, 4], strides = [1, 1]} : vector<54x384xf32> to vector<54x4xf32>
    %c208 = arith.constant 208 : index
    %c0_259 = arith.constant 0 : index
    %711 = vector.load %arg2[%c208, %c0_259] : memref<848x64xbf16, #tpu.memory_space<vmem>>, vector<58x54xbf16>
    %712 = arith.truncf %710 : vector<54x4xf32> to vector<54x4xbf16>
    %cst_260 = arith.constant dense<0.000000e+00> : vector<58x4xf32>
    %713 = tpu.matmul %711, %712, %cst_260 {dimension_numbers = #tpu.dot_dimension_numbers<[1], [0], [0], [1], [0, 0, 1, 1], [], []>} : vector<58x54xbf16>, vector<54x4xbf16>, vector<58x4xf32> -> vector<58x4xf32>
    %714 = vector.extract_strided_slice %709 {offsets = [0, 128], sizes = [54, 4], strides = [1, 1]} : vector<54x384xf32> to vector<54x4xf32>
    %c480 = arith.constant 480 : index
    %c0_261 = arith.constant 0 : index
    %715 = vector.load %arg2[%c480, %c0_261] : memref<848x64xbf16, #tpu.memory_space<vmem>>, vector<58x54xbf16>
    %716 = arith.truncf %714 : vector<54x4xf32> to vector<54x4xbf16>
    %cst_262 = arith.constant dense<0.000000e+00> : vector<58x4xf32>
    %717 = tpu.matmul %715, %716, %cst_262 {dimension_numbers = #tpu.dot_dimension_numbers<[1], [0], [0], [1], [0, 0, 1, 1], [], []>} : vector<58x54xbf16>, vector<54x4xbf16>, vector<58x4xf32> -> vector<58x4xf32>
    %718 = arith.addf %713, %717 : vector<58x4xf32>
    %719 = vector.extract_strided_slice %709 {offsets = [0, 256], sizes = [54, 4], strides = [1, 1]} : vector<54x384xf32> to vector<54x4xf32>
    %c752 = arith.constant 752 : index
    %c0_263 = arith.constant 0 : index
    %720 = vector.load %arg2[%c752, %c0_263] : memref<848x64xbf16, #tpu.memory_space<vmem>>, vector<58x54xbf16>
    %721 = arith.truncf %719 : vector<54x4xf32> to vector<54x4xbf16>
    %cst_264 = arith.constant dense<0.000000e+00> : vector<58x4xf32>
    %722 = tpu.matmul %720, %721, %cst_264 {dimension_numbers = #tpu.dot_dimension_numbers<[1], [0], [0], [1], [0, 0, 1, 1], [], []>} : vector<58x54xbf16>, vector<54x4xbf16>, vector<58x4xf32> -> vector<58x4xf32>
    %723 = arith.addf %718, %722 : vector<58x4xf32>
    %c0_265 = arith.constant 0 : index
    %c0_266 = arith.constant 0 : index
    %724 = vector.load %arg5[%c0_265, %c0_266] : memref<58x4xf32, #tpu.memory_space<vmem>>, vector<58x4xf32>
    tpu.vector_store %arg5[%c0_265, %c0_266], %723 {strides = array<i32>} : memref<58x4xf32, #tpu.memory_space<vmem>>, vector<58x4xf32>,
    return
  }
  func.func @transform_0(%arg0: i32) -> (i32, i32) {
    %c0_i32 = arith.constant 0 : i32
    %c0_i32_0 = arith.constant 0 : i32
    %c0_i32_1 = arith.constant 0 : i32
    return %c0_i32, %c0_i32_0 : i32, i32
  }
  func.func @transform_1(%arg0: i32) -> (i32, i32) {
    %c0_i32 = arith.constant 0 : i32
    %c0_i32_0 = arith.constant 0 : i32
    %c0_i32_1 = arith.constant 0 : i32
    return %c0_i32, %c0_i32_0 : i32, i32
  }
  func.func @transform_2(%arg0: i32) -> (i32, i32) {
    %c0_i32 = arith.constant 0 : i32
    %c0_i32_0 = arith.constant 0 : i32
    %c0_i32_1 = arith.constant 0 : i32
    return %c0_i32, %c0_i32_0 : i32, i32
  }
  func.func @transform_3(%arg0: i32) -> (i32, i32) {
    %c0_i32 = arith.constant 0 : i32
    %c0_i32_0 = arith.constant 0 : i32
    %c0_i32_1 = arith.constant 0 : i32
    return %c0_i32, %c0_i32_0 : i32, i32
  }
  func.func @transform_4(%arg0: i32) -> (i32, i32) {
    %c0_i32 = arith.constant 0 : i32
    %c0_i32_0 = arith.constant 0 : i32
    %c0_i32_1 = arith.constant 0 : i32
    return %c0_i32, %c0_i32_0 : i32, i32
  }
}

</mosaic_0001>

<bundles_post_ra>
// kernel: _run.1
= control target key start
LH: loop header
LB: loop body
LE: loop exit
PB: predicated region body
PF: predicated region fallthrough
CT: control target
= control target key end

     0   :  { %9 = vsyncpa [#allocation3], 0  ;;  %s7447_s15 = smov [#allocation2]   ;;  %s8554_s0 = inlined_call_operand.vmem [shape: f32[64,4], index: 0, kind: input, shape index: {}]   ;;  %s8555_s1 = inlined_call_operand.vmem [shape: bf16[848,64], index: 1, kind: input, shape index: {}]   ;;  %s8556_s2 = inlined_call_operand.hbm [shape: bf16[688,384], index: 2, kind: input, shape index: {}]   ;;  %s8557_s3 = inlined_call_operand.vmem [shape: f32[152,64], index: 3, kind: input, shape index: {}]   ;;  %s8558_s4 = inlined_call_operand.vmem [shape: f32[58,4], index: 4, kind: output, shape index: {}]  }
   0x1   :  { %s19_s16 = sshll.u32 %s7447_s15, 4  ;;  %s7423_s19 = scalar_lea.hbm %s8556_s2, 16512  ;;  %s20_s16 = int_to_ptr.vmem [resolvable:$true] %s19_s16 }
   0x2   :  { %p7424_p0 = scmp.ne.s32.totalorder %s8556_s2, %s7423_s19  ;;  %p7427_p1 = scmp.lt.u32.totalorder %s7423_s19, %s8556_s2 }
   0x4   :  { %p7429_p2 = pnand %p7427_p1, %p7424_p0 }
   0x6   :  { %7432 = shalt.err (!%p7429_p2)
}
   0x7   :  { %s7433_s24 = scalar_lea.vmem %s20_s16, 16512  ;;  %p7438_p4 = scmp.lt.s32.totalorder %s20_s16, %s20_s16 }
   0x8   :  { %p7434_p3 = scmp.ne.s32.totalorder %s20_s16, %s7433_s24  ;;  %p7439_p5 = scmp.lt.s32.totalorder %s7433_s24, %s7433_s24 }
   0xa   :  { %p7440_p6 = por %p7439_p5, %p7438_p4 }
   0xc   :  { %p7441_p7 = pnand %p7440_p6, %p7434_p3 }
   0xe   :  { %7444 = shalt.err (!%p7441_p7)
}
   0xf   :  { %s7448_s25 = smov 192   ;;  %s7449_s26 = smov 12  }
  0x10   :  { %25 = dma.hbm_to_vmem [thread:$0]  %s8556_s2, 16512, %s20_s16, [#allocation3], %s7448_s25, %s7448_s25, %s7449_s26  }
  0x11   :  { %7445 = dma.done.wait [#allocation3], 16512  }
  0x12   :  { %7446 = vsyncadd [#allocation3], 4294950784  ;;  %v7450_v0 = vmov 0   ;;  %v44_v1 = vld [vmem:[#allocation2] sm:$0x33]  ;;  %vm67_vm0 = vcmask 1041408  }
  0x13   :  { %109 = vmatprep.mubr.bf16.mxu0 %v7450_v0  ;;  %v32_v2 = vld [vmem:[%s8554_s0] sm:$0xff]  ;;  %v33_v3 = vld [vmem:[%s8554_s0 + $0x8] sm:$0xff]  ;;  %v6082_v4 = vcombine.high %v44_v1, %v44_v1  ;;  %v6081_v5 = vcombine.low %v44_v1, %v44_v1  ;;  %vm54_vm1 = vcmask 31744   ;;  %v34_v7 = vld [vmem:[%s8554_s0 + $0x10] sm:$0xff]  ;;  %vm259_vm2 = vcmask 523264  }
  0x14   :  { %v40_v6 = vpack.c.bf16 %v33_v3, %v32_v2  ;;  %v35_v8 = vld [vmem:[%s8554_s0 + $0x18] sm:$0xff]  ;;  %v7147_v9 = vld [vmem:[#allocation2 + $0x8] ss:$0 sps:$4 sm:$0x33]   ;;  %v36_v11 = vld [vmem:[%s8554_s0 + $0x20] sm:$0xff]  ;;  %vm645_vm5 = vcmask 130048  }
  0x15   :  { %6084 = vmatprep.subr.msk.bf16.mxu0 %vm67_vm0, %v6082_v4  ;;  %v69_v10 = vsel %vm67_vm0, %v6081_v5, 0  ;;  %v37_v12 = vld [vmem:[%s8554_s0 + $0x28] sm:$0xff]  ;;  %7126 = vmatprep.subr.msk.bf16.mxu1 %vm67_vm0, %v7147_v9  ;;  %v75_v13 = vsel %vm67_vm0, %v7147_v9, 0  ;;  %v41_v14 = vpack.c.bf16 %v35_v8, %v34_v7  ;;  %v38_v16 = vld [vmem:[%s8554_s0 + $0x30] sm:$0xff]  ;;  %v39_v17 = vld [vmem:[%s8554_s0 + $0x38] sm:$0xff]  ;;  %vm659_vm7 = vcmask 125952  }
  0x16   :  { %6604 = vmatprep.mubr.msk.bf16.mxu1 %vm54_vm1, %v40_v6  ;;  %78 = vmatpush1.bf16.msra.mxu0 %v69_v10  ;;  %v42_v15 = vpack.c.bf16 %v37_v12, %v36_v11  ;;  %v43_v18 = vpack.c.bf16 %v39_v17, %v38_v16  ;;  %v7148_v19 = vld [vmem:[%s8555_s1] sm:$0xff]   ;;  %v7152_v20 = vld [vmem:[%s8555_s1 + $0x88] sm:$0xff]   ;;  %v7150_v58 = vld [vmem:[%s8555_s1 + $0x10] sm:$0xff]   ;;  %v564_v10 = vlaneseq  ;;  %vm1055_vm8 = vcmask 490496  }
  0x17   :  { %6603 = vmatpush3.bf16.msra.mxu1 %v75_v13  ;;  %v7149_v57 = vld [vmem:[%s8555_s1 + $0x8] sm:$0xff]   ;;  %v7153_v59 = vld [vmem:[%s8555_s1 + $0x90] sm:$0xff]   ;;  %v7156_v60 = vld [vmem:[%s8555_s1 + $0x98] sm:$0xff]   ;;  %vm1062_vm9 = vcmask 1045504   ;;  %vm1304_vm13 = vcmask 261120   ;;  %vm1310_vm14 = vcmask 257024  }
  0x18   :  { %v7151_v61 = vld [vmem:[%s8555_s1 + $0x18] sm:$0x3f]   ;;  %v7154_v62 = vld [vmem:[%s8555_s1 + $0x110] sm:$0xff]   ;;  %v7157_v63 = vld [vmem:[%s8555_s1 + $0xa0] sm:$0x3f]   ;;  %v7581_v12 = vshrl.u32 %v564_v10, 7 }
  0x19   :  { %6085 = vmatmul.mubr.msk.bf16.vlgmr.msra.gmra.mrb[0].mxu0 %vm54_vm1, %v40_v6  ;;  %v7155_v1 = vld [vmem:[%s8555_s1 + $0x118] sm:$0xff]   ;;  %v7158_v2 = vld [vmem:[%s8555_s1 + $0x120] sm:$0xff]   ;;  %v7159_v3 = vld [vmem:[%s8555_s1 + $0x128] sm:$0x3f]   ;;  %vm7452_vm15 = vmmov 0   ;;  %vm1585_vm0 = vcmask 228352  }
  0x1a   :  { %119 = vmatprep.mubr.bf16.mxu0 %v7450_v0  ;;  %6605 = vmatmul.mubr.msk.bf16.vlgmr.msra.gmra.mrb[0].mxu1 %vm54_vm1, %v41_v14  ;;  %v7160_v4 = vld [vmem:[#allocation2 + $0x18] ss:$12 sps:$4 sm:$0xff]   ;;  %v7162_v5 = vld [vmem:[#allocation2 + $0x1c] ss:$12 sps:$4 sm:$0xff]   ;;  %v7579_v11 = vld [vmem:[#allocation2 + $0x20] ss:$12 sps:$4 sm:$0xff]  }
  0x1b   :  { %6608 = vmatprep.mubr.msk.bf16.mxu1 %vm54_vm1, %v42_v15  ;;  %v7585_v17 = vadd.s32 24, %v7581_v12 }
  0x1d   :  { %vm584_vm3 = vcmp.lt.s32.totalorder %v7585_v17, 30  ;;  %vm608_vm4 = vcmp.ge.s32.totalorder %v7585_v17, 30  ;;  %vm1291_vm12 = vcmp.lt.s32.totalorder %v7585_v17, 28 }
  0x21   :  { %6086 = vmatmul.mubr.msk.bf16.gmra.mrb[4].mxu0 %vm54_vm1, %v41_v14 }
  0x22   :  { %129 = vmatprep.mubr.bf16.mxu0 %v7450_v0  ;;  %6609 = vmatmul.mubr.msk.bf16.gmra.mrb[4].mxu1 %vm54_vm1, %v43_v18 }
  0x23   :  { %6636 = vmatprep.mubr.msk.bf16.mxu1 %vm259_vm2, %v7148_v19  ;;  %v6117_v19 = vld [vmem:[%s8557_s3] ss:$0 sm:$0xff] }
  0x29   :  { %6087 = vmatmul.mubr.msk.bf16.gmra.mrb[8].mxu0 %vm54_vm1, %v42_v15 }
  0x2a   :  { %139 = vmatprep.mubr.bf16.mxu0 %v7450_v0 }
  0x31   :  { %6088 = vmatmul.mubr.msk.bf16.gmra.mrb[12].mxu0 %vm54_vm1, %v43_v18 }
  0x32   :  { %6620 = vmatprep.mubr.msk.bf16.mxu0 %vm259_vm2, %v7152_v20 }
  0xec   :  { %v111_v21 = vpop.f32.mrb[0].mxu0 }
  0xed   :  { %v113_v22 = vpop.f32.mrb[1].mxu0  ;;  %v6606_v23 = vpop.f32.mrb[0].mxu1 }
  0xee   :  { %v115_v24 = vpop.f32.mrb[2].mxu0  ;;  %v184_v25 = vpop.f32.mrb[1].mxu1 }
  0xef   :  { %v223_v26 = vpack.c.bf16 %v115_v24, %v111_v21  ;;  %v117_v27 = vpop.f32.mrb[3].mxu0  ;;  %v6607_v28 = vpop.f32.mrb[2].mxu1 }
  0xf0   :  { %v235_v29 = vpack.c.bf16 %v117_v27, %v113_v22  ;;  %v443_v30 = vpack.c.bf16 %v6607_v28, %v6606_v23  ;;  %v187_v31 = vpop.f32.mrb[3].mxu1 }
  0xf1   :  { %6628 = vmatprep.subr.bf16.mxu1 %v223_v26  ;;  %v442_v32 = vpack.c.bf16 %v187_v31, %v184_v25 }
  0xf2   :  { %6612 = vmatprep.subr.bf16.mxu0 %v235_v29  ;;  %6629 = vmatpush3.bf16.msra.mxu1 %v223_v26 }
  0xf3   :  { %6613 = vmatpush3.bf16.msra.mxu0 %v235_v29 }
  0xf4   :  { %v121_v33 = vpop.f32.mrb[4].mxu0 }
  0xf5   :  { %v123_v34 = vpop.f32.mrb[5].mxu0  ;;  %v6610_v35 = vpop.f32.mrb[4].mxu1 }
  0xf6   :  { %v125_v36 = vpop.f32.mrb[6].mxu0  ;;  %v200_v37 = vpop.f32.mrb[5].mxu1 }
  0xf7   :  { %v224_v38 = vpack.c.bf16 %v125_v36, %v121_v33  ;;  %v127_v39 = vpop.f32.mrb[7].mxu0  ;;  %v6611_v40 = vpop.f32.mrb[6].mxu1 }
  0xf8   :  { %v236_v41 = vpack.c.bf16 %v127_v39, %v123_v34  ;;  %v445_v42 = vpack.c.bf16 %v6611_v40, %v6610_v35  ;;  %v203_v43 = vpop.f32.mrb[7].mxu1 }
  0xf9   :  { %6630 = vmatprep.subr.bf16.mxu1 %v224_v38  ;;  %v444_v44 = vpack.c.bf16 %v203_v43, %v200_v37 }
  0xfa   :  { %6614 = vmatprep.subr.bf16.mxu0 %v236_v41  ;;  %6631 = vmatpush3.bf16.msra.mxu1 %v224_v38 }
  0xfb   :  { %6615 = vmatpush3.bf16.msra.mxu0 %v236_v41 }
  0xfc   :  { %v131_v45 = vpop.f32.mrb[8].mxu0 }
  0xfd   :  { %v133_v46 = vpop.f32.mrb[9].mxu0 }
  0xfe   :  { %v135_v47 = vpop.f32.mrb[10].mxu0 }
  0xff   :  { %v225_v48 = vpack.c.bf16 %v135_v47, %v131_v45  ;;  %v137_v49 = vpop.f32.mrb[11].mxu0 }
 0x100   :  { %v237_v50 = vpack.c.bf16 %v137_v49, %v133_v46 }
 0x101   :  { %6632 = vmatprep.subr.bf16.mxu1 %v225_v48 }
 0x102   :  { %6616 = vmatprep.subr.bf16.mxu0 %v237_v50  ;;  %6633 = vmatpush3.bf16.msra.mxu1 %v225_v48 }
 0x103   :  { %6617 = vmatpush3.bf16.msra.mxu0 %v237_v50 }
 0x104   :  { %v141_v51 = vpop.f32.mrb[12].mxu0 }
 0x105   :  { %v143_v52 = vpop.f32.mrb[13].mxu0 }
 0x106   :  { %v145_v53 = vpop.f32.mrb[14].mxu0 }
 0x107   :  { %v226_v54 = vpack.c.bf16 %v145_v53, %v141_v51  ;;  %v147_v55 = vpop.f32.mrb[15].mxu0 }
 0x108   :  { %v238_v56 = vpack.c.bf16 %v147_v55, %v143_v52 }
 0x109   :  { %6634 = vmatprep.subr.bf16.mxu1 %v226_v54 }
 0x10a   :  { %6618 = vmatprep.subr.bf16.mxu0 %v238_v56  ;;  %6635 = vmatpush3.bf16.msra.mxu1 %v226_v54 }
 0x10b   :  { %6619 = vmatpush3.bf16.msra.mxu0 %v238_v56  ;;  %6644 = vmatprep.subr.bf16.mxu1 %v442_v32 }
 0x10c   :  { %891 = vmatprep.subr.bf16.mxu0 %v7162_v5 }
 0x10d   :  { %6637 = vmatmul.mubr.msk.bf16.vlgmr.msra.gmra.mrb[8].mxu1 %vm259_vm2, %v7149_v57 }
 0x10e   :  { %6645 = vmatpush3.bf16.msra.mxu1 %v442_v32  ;;  %6640 = vmatprep.mubr.msk.bf16.mxu1 %vm259_vm2, %v7150_v58  ;;  %v572_v32 = vadd.s32 56, %v7581_v12 }
 0x10f   :  { %6646 = vmatprep.subr.bf16.mxu1 %v443_v30  ;;  %6621 = vmatmul.mubr.msk.bf16.vlgmr.msra.gmra.mrb[16].mxu0 %vm259_vm2, %v7153_v59 }
 0x110   :  { %6624 = vmatprep.mubr.msk.bf16.mxu0 %vm259_vm2, %v7156_v60  ;;  %892 = vmatpush1.bf16.msra.mxu0 %v7160_v4  ;;  %vm620_vm6 = vcmp.lt.s32.totalorder %v572_v32, 60 }
 0x111   :  { %6660 = vmatprep.subr.bf16.mxu0 %v7579_v11 }
 0x112   :  { %6647 = vmatpush3.bf16.msra.mxu1 %v443_v30  ;;  %v7451_v30 = vmov 0.0  }
 0x113   :  { %6648 = vmatprep.subr.bf16.mxu1 %v444_v44  ;;  %v7599_v31 = vsel %vm584_vm3, 1.0, %v7451_v30  ;;  %v7607_v36 = vsel %vm608_vm4, 1.0, %v7451_v30  ;;  %v7627_v4 = vsel %vm620_vm6, 1.0, %v7451_v30  ;;  %vm1750_vm3 = vcmp.lt.s32.totalorder %v7581_v12, 6 }
 0x114   :  { %vm1756_vm4 = vcmp.ge.s32.totalorder %v7581_v12, 6 }
 0x115   :  { %6641 = vmatmul.mubr.msk.bf16.gmra.mrb[12].mxu1 %vm259_vm2, %v7151_v61 }
 0x116   :  { %6649 = vmatpush3.bf16.msra.mxu1 %v444_v44  ;;  %6652 = vmatprep.mubr.msk.bf16.mxu1 %vm259_vm2, %v7154_v62 }
 0x117   :  { %6650 = vmatprep.subr.bf16.mxu1 %v445_v42  ;;  %6625 = vmatmul.mubr.msk.bf16.gmra.mrb[20].mxu0 %vm259_vm2, %v7157_v63 }
 0x118   :  { %923 = vmatprep.mubr.bf16.mxu0 %v7450_v0 }
 0x11a   :  { %6651 = vmatpush3.bf16.msra.mxu1 %v445_v42 }
 0x11d   :  { %6653 = vmatmul.mubr.msk.bf16.vlgmr.msra.gmra.mrb[8].mxu1 %vm259_vm2, %v7155_v1 }
 0x11e   :  { %6656 = vmatprep.mubr.msk.bf16.mxu1 %vm259_vm2, %v7158_v2 }
 0x125   :  { %6657 = vmatmul.mubr.msk.bf16.gmra.mrb[12].mxu1 %vm259_vm2, %v7159_v3 }
 0x1e2   :  { %v6622_v6 = vpop.f32.mrb[16].mxu0 }
 0x1e3   :  { %v306_v7 = vpop.f32.mrb[17].mxu0 }
 0x1e4   :  { %v6623_v8 = vpop.f32.mrb[18].mxu0 }
 0x1e5   :  { %v309_v9 = vpop.f32.mrb[19].mxu0 }
 0x1ea   :  { %v6626_v13 = vpop.f32.mrb[20].mxu0 }
 0x1eb   :  { %v322_v14 = vpop.f32.mrb[21].mxu0 }
 0x1ec   :  { %v6627_v15 = vpop.f32.mrb[22].mxu0 }
 0x1ed   :  { %v325_v16 = vpop.f32.mrb[23].mxu0 }
 0x1f0   :  { %v6654_v18 = vpop.f32.mrb[8].mxu1 }
 0x1f1   :  { %v7062_v20 = vadd.f32 %v6654_v18, %v6622_v6  ;;  %v512_v21 = vpop.f32.mrb[9].mxu1 }
 0x1f2   :  { %v7063_v22 = vadd.f32 %v512_v21, %v306_v7  ;;  %v6655_v23 = vpop.f32.mrb[10].mxu1 }
 0x1f3   :  { %v7591_v24 = vadd.f32 %v7062_v20, %v6117_v19  ;;  %v7064_v25 = vadd.f32 %v6655_v23, %v6623_v8  ;;  %v515_v26 = vpop.f32.mrb[11].mxu1 }
 0x1f4   :  { %v7593_v27 = vadd.f32 %v7063_v22, %v6117_v19  ;;  %v7065_v28 = vadd.f32 %v515_v26, %v309_v9 }
 0x1f5   :  { %v7596_v29 = vadd.f32 %v7064_v25, %v6117_v19  ;;  %v679_v35 = vmul.f32 0.0, %v7591_v24  ;;  %v649_v42 = vsel %vm645_vm5, %v7591_v24, 0.0 }
 0x1f6   :  { %v677_v33 = vmul.f32 0.0, %v7593_v27  ;;  %v7603_v34 = vadd.f32 %v7065_v28, %v6117_v19  ;;  %v646_v37 = vsel %vm645_vm5, %v7593_v27, 0.0 }
 0x1f7   :  { %v640_v38 = vmul.f32 %v7599_v31, %v7596_v29  ;;  %v680_v47 = vmul.f32 %v7607_v36, %v7596_v29  ;;  %v688_v51 = vsel %vm645_vm5, %v679_v35, 0.0 }
 0x1f8   :  { %v647_v39 = vsel %vm645_vm5, %v7603_v34, 0.0  ;;  %v678_v40 = vmul.f32 0.0, %v7603_v34  ;;  %v6658_v41 = vpop.f32.mrb[12].mxu1  ;;  %v685_v46 = vsel %vm645_vm5, %v677_v33, 0.0 }
 0x1f9   :  { %v648_v43 = vadd.f32 %v647_v39, %v646_v37  ;;  %v7066_v44 = vadd.f32 %v6658_v41, %v6626_v13  ;;  %v528_v45 = vpop.f32.mrb[13].mxu1  ;;  %v651_v56 = vsel %vm645_vm5, %v640_v38, 0.0  ;;  %v690_v62 = vsel %vm645_vm5, %v680_v47, 0.0 }
 0x1fa   :  { %v686_v48 = vsel %vm645_vm5, %v678_v40, 0.0  ;;  %v7067_v49 = vadd.f32 %v528_v45, %v322_v14  ;;  %v6659_v50 = vpop.f32.mrb[14].mxu1 }
 0x1fb   :  { %v650_v52 = vadd.f32 %v649_v42, %v648_v43  ;;  %v687_v53 = vadd.f32 %v686_v48, %v685_v46  ;;  %v7068_v54 = vadd.f32 %v6659_v50, %v6627_v15  ;;  %v531_v55 = vpop.f32.mrb[15].mxu1  ;;  %v562_v57 = vadd.f32 %v7066_v44, %v6117_v19 }
 0x1fc   :  { %v560_v58 = vadd.f32 %v7067_v49, %v6117_v19  ;;  %v7069_v59 = vadd.f32 %v531_v55, %v325_v16 }
 0x1fd   :  { %v652_v60 = vadd.f32 %v651_v56, %v650_v52  ;;  %v689_v61 = vadd.f32 %v688_v51, %v687_v53  ;;  %v563_v1 = vadd.f32 %v7068_v54, %v6117_v19  ;;  %v643_v5 = vmul.f32 0.0, %v562_v57 }
 0x1fe   :  { %v641_v63 = vmul.f32 0.0, %v560_v58  ;;  %v561_v2 = vadd.f32 %v7069_v59, %v6117_v19  ;;  %v692_v7 = vsel %vm645_vm5, %v560_v58, 0.0  ;;  %v696_v21 = vsel %vm645_vm5, %v562_v57, 0.0 }
 0x1ff   :  { %v691_v3 = vadd.f32 %v690_v62, %v689_v61  ;;  %v644_v13 = vmul.f32 0.0, %v563_v1  ;;  %v684_v14 = vmul.f32 %v7627_v4, %v563_v1  ;;  %v657_v20 = vsel %vm645_vm5, %v643_v5, 0.0 }
 0x200   :  { %v653_v6 = vsel %vm645_vm5, %v641_v63, 0.0  ;;  %v642_v8 = vmul.f32 0.0, %v561_v2  ;;  %v694_v16 = vsel %vm645_vm5, %v561_v2, 0.0 }
 0x201   :  { %v654_v9 = vadd.f32 %v653_v6, %v652_v60  ;;  %v693_v10 = vadd.f32 %v692_v7, %v691_v3  ;;  %v660_v25 = vsel %vm659_vm7, %v644_v13, 0.0  ;;  %v698_v26 = vsel %vm659_vm7, %v684_v14, 0.0 }
 0x202   :  { %v655_v15 = vsel %vm645_vm5, %v642_v8, 0.0 }
 0x203   :  { %v656_v18 = vadd.f32 %v655_v15, %v654_v9  ;;  %v695_v19 = vadd.f32 %v694_v16, %v693_v10 }
 0x205   :  { %v658_v22 = vadd.f32 %v657_v20, %v656_v18  ;;  %v697_v23 = vadd.f32 %v696_v21, %v695_v19 }
 0x207   :  { %v661_v28 = vadd.f32 %v660_v25, %v658_v22  ;;  %v699_v32 = vadd.f32 %v698_v26, %v697_v23 }
 0x209   :  { %v662_v33 = vrot.slane %v661_v28, 4  ;;  %v700_v35 = vrot.slane %v699_v32, 4 }
 0x20b   :  { %v663_v37 = vadd.f32 %v662_v33, %v661_v28  ;;  %v701_v38 = vadd.f32 %v700_v35, %v699_v32 }
 0x20d   :  { %v664_v39 = vrot.slane %v663_v37, 2  ;;  %v702_v40 = vrot.slane %v701_v38, 2 }
 0x20f   :  { %v665_v41 = vadd.f32 %v664_v39, %v663_v37  ;;  %v703_v42 = vadd.f32 %v702_v40, %v701_v38 }
 0x211   :  { %v666_v43 = vrot.slane %v665_v41, 1  ;;  %v704_v44 = vrot.slane %v703_v42, 1 }
 0x213   :  { %v667_v45 = vadd.f32 %v666_v43, %v665_v41  ;;  %v705_v46 = vadd.f32 %v704_v44, %v703_v42 }
 0x215   :  { %v668_v47 = vmul.f32 0.033333335, %v667_v45  ;;  %v706_v48 = vmul.f32 0.033333335, %v705_v46 }
 0x217   :  { %v672_v49 = vmul.f32 %v668_v47, %v7599_v31  ;;  %v673_v50 = vmul.f32 0.0, %v668_v47  ;;  %v707_v51 = vmul.f32 0.0, %v706_v48  ;;  %v710_v52 = vmul.f32 %v706_v48, %v7607_v36 }
 0x218   :  { %v714_v53 = vmul.f32 %v706_v48, %v7627_v4 }
 0x219   :  { %v715_v54 = vadd.f32 %v707_v51, %v668_v47  ;;  %v718_v55 = vadd.f32 %v710_v52, %v672_v49  ;;  %v719_v56 = vadd.f32 %v706_v48, %v673_v50 }
 0x21a   :  { %v722_v59 = vadd.f32 %v714_v53, %v673_v50 }
 0x21b   :  { %v7642_v60 = vsub.f32 %v7593_v27, %v715_v54  ;;  %v7645_v61 = vsub.f32 %v7603_v34, %v715_v54  ;;  %v7648_v62 = vsub.f32 %v7591_v24, %v715_v54  ;;  %v7651_v63 = vsub.f32 %v7596_v29, %v718_v55 }
 0x21c   :  { %v7653_v3 = vsub.f32 %v560_v58, %v719_v56  ;;  %v7655_v5 = vsub.f32 %v561_v2, %v719_v56  ;;  %v7657_v6 = vsub.f32 %v562_v57, %v719_v56  ;;  %v7659_v7 = vsub.f32 %v563_v1, %v722_v59 }
 0x21d   :  { %v731_v27 = vmul.f32 %v7642_v60, %v7642_v60  ;;  %v732_v34 = vmul.f32 %v7645_v61, %v7645_v61  ;;  %v734_v24 = vmul.f32 %v7651_v63, %v7651_v63  ;;  %v733_v29 = vmul.f32 %v7648_v62, %v7648_v62 }
 0x21e   :  { %v735_v58 = vmul.f32 %v7653_v3, %v7653_v3  ;;  %v736_v57 = vmul.f32 %v7655_v5, %v7655_v5  ;;  %v737_v14 = vmul.f32 %v7657_v6, %v7657_v6  ;;  %v738_v18 = vmul.f32 %v7659_v7, %v7659_v7 }
 0x21f   :  { %v747_v1 = vsel %vm645_vm5, %v731_v27, 0.0  ;;  %v748_v2 = vsel %vm645_vm5, %v732_v34, 0.0  ;;  %v742_v8 = vmul.f32 %v734_v24, %v7599_v31  ;;  %v777_v10 = vmul.f32 0.0, %v731_v27 }
 0x220   :  { %v749_v9 = vadd.f32 %v748_v2, %v747_v1  ;;  %v778_v13 = vmul.f32 0.0, %v732_v34  ;;  %v743_v15 = vmul.f32 0.0, %v735_v58  ;;  %v750_v16 = vsel %vm645_vm5, %v733_v29, 0.0 }
 0x221   :  { %v744_v19 = vmul.f32 0.0, %v736_v57  ;;  %v779_v21 = vmul.f32 0.0, %v733_v29  ;;  %v752_v22 = vsel %vm645_vm5, %v742_v8, 0.0  ;;  %v780_v23 = vmul.f32 %v734_v24, %v7607_v36 }
 0x222   :  { %v751_v20 = vadd.f32 %v750_v16, %v749_v9  ;;  %v785_v25 = vsel %vm645_vm5, %v777_v10, 0.0  ;;  %v786_v26 = vsel %vm645_vm5, %v778_v13, 0.0  ;;  %v745_v33 = vmul.f32 0.0, %v737_v14 }
 0x223   :  { %v787_v32 = vadd.f32 %v786_v26, %v785_v25  ;;  %v754_v35 = vsel %vm645_vm5, %v743_v15, 0.0  ;;  %v788_v37 = vsel %vm645_vm5, %v779_v21, 0.0  ;;  %v746_v40 = vmul.f32 0.0, %v738_v18 }
 0x224   :  { %v753_v28 = vadd.f32 %v752_v22, %v751_v20  ;;  %v756_v41 = vsel %vm645_vm5, %v744_v19, 0.0  ;;  %v790_v42 = vsel %vm645_vm5, %v780_v23, 0.0  ;;  %v758_v45 = vsel %vm645_vm5, %v745_v33, 0.0 }
 0x225   :  { %v789_v39 = vadd.f32 %v788_v37, %v787_v32  ;;  %v792_v46 = vsel %vm645_vm5, %v735_v58, 0.0  ;;  %v760_v49 = vsel %vm659_vm7, %v746_v40, 0.0  ;;  %v784_v50 = vmul.f32 %v738_v18, %v7627_v4 }
 0x226   :  { %v755_v38 = vadd.f32 %v754_v35, %v753_v28  ;;  %v794_v51 = vsel %vm645_vm5, %v736_v57, 0.0  ;;  %v796_v54 = vsel %vm645_vm5, %v737_v14, 0.0 }
 0x227   :  { %v791_v44 = vadd.f32 %v790_v42, %v789_v39  ;;  %v798_v59 = vsel %vm659_vm7, %v784_v50, 0.0  ;;  %vm1767_vm7 = vcmask 519168  }
 0x228   :  { %v757_v43 = vadd.f32 %v756_v41, %v755_v38 }
 0x229   :  { %v793_v48 = vadd.f32 %v792_v46, %v791_v44 }
 0x22a   :  { %v759_v47 = vadd.f32 %v758_v45, %v757_v43 }
 0x22b   :  { %v795_v53 = vadd.f32 %v794_v51, %v793_v48 }
 0x22c   :  { %v761_v52 = vadd.f32 %v760_v49, %v759_v47 }
 0x22d   :  { %v797_v56 = vadd.f32 %v796_v54, %v795_v53 }
 0x22e   :  { %v762_v55 = vrot.slane %v761_v52, 4 }
 0x22f   :  { %v799_v34 = vadd.f32 %v798_v59, %v797_v56 }
 0x230   :  { %v763_v27 = vadd.f32 %v762_v55, %v761_v52 }
 0x231   :  { %v800_v29 = vrot.slane %v799_v34, 4 }
 0x232   :  { %v764_v24 = vrot.slane %v763_v27, 2 }
 0x233   :  { %v801_v1 = vadd.f32 %v800_v29, %v799_v34 }
 0x234   :  { %v765_v58 = vadd.f32 %v764_v24, %v763_v27 }
 0x235   :  { %v802_v8 = vrot.slane %v801_v1, 2 }
 0x236   :  { %v766_v2 = vrot.slane %v765_v58, 1 }
 0x237   :  { %v803_v10 = vadd.f32 %v802_v8, %v801_v1 }
 0x238   :  { %v767_v9 = vadd.f32 %v766_v2, %v765_v58 }
 0x239   :  { %v804_v57 = vrot.slane %v803_v10, 1 }
 0x23a   :  { %v768_v13 = vmul.f32 0.033333335, %v767_v9 }
 0x23b   :  { %v805_v16 = vadd.f32 %v804_v57, %v803_v10 }
 0x23c   :  { %v773_v15 = vmul.f32 0.0, %v768_v13  ;;  %v772_v14 = vmul.f32 %v768_v13, %v7599_v31 }
 0x23d   :  { %v806_v18 = vmul.f32 0.033333335, %v805_v16 }
 0x23f   :  { %v807_v19 = vmul.f32 0.0, %v806_v18  ;;  %v819_v20 = vadd.f32 %v806_v18, %v773_v15  ;;  %v810_v21 = vmul.f32 %v806_v18, %v7607_v36  ;;  %v814_v22 = vmul.f32 %v806_v18, %v7627_v4 }
 0x241   :  { %v815_v23 = vadd.f32 %v807_v19, %v768_v13  ;;  %v827_v25 = vadd.f32 1e-05, %v819_v20  ;;  %v818_v26 = vadd.f32 %v810_v21, %v772_v14  ;;  %v822_v28 = vadd.f32 %v814_v22, %v773_v15  ;;  %v7165_v20 = vld [vmem:[%s8555_s1 + $0xb0] sm:$0x3f]   ;;  %v7166_v21 = vld [vmem:[%s8555_s1 + $0x20] sm:$0xff]  }
 0x243   :  { %v823_v32 = vadd.f32 1e-05, %v815_v23  ;;  %7369 = vrsqrt.f32 %v827_v25  ;;  %v826_v33 = vadd.f32 1e-05, %v818_v26  ;;  %v830_v35 = vadd.f32 1e-05, %v822_v28 }
 0x245   :  { %7371 = vrsqrt.f32 %v823_v32 }
 0x246   :  { %7373 = vrsqrt.f32 %v826_v33 }
 0x247   :  { %7375 = vrsqrt.f32 %v830_v35 }
 0x24d   :  { %v7370_v37 = vpop.eup %7369 }
 0x24e   :  { %v844_v31 = vmul.f32 %v7370_v37, %v7655_v5  ;;  %v843_v38 = vmul.f32 %v7370_v37, %v7653_v3  ;;  %v845_v36 = vmul.f32 %v7370_v37, %v7657_v6 }
 0x24f   :  { %v7372_v39 = vpop.eup %7371 }
 0x250   :  { %v7374_v4 = vpop.eup %7373  ;;  %v839_v40 = vmul.f32 %v7372_v39, %v7642_v60  ;;  %v840_v41 = vmul.f32 %v7372_v39, %v7645_v61  ;;  %v841_v42 = vmul.f32 %v7372_v39, %v7648_v62  ;;  %v851_v43 = vmax.f32 %v843_v38, 0.0 }
 0x251   :  { %v7376_v44 = vpop.eup %7375  ;;  %v842_v45 = vmul.f32 %v7374_v4, %v7651_v63  ;;  %v852_v46 = vmax.f32 %v844_v31, 0.0  ;;  %v853_v51 = vmax.f32 %v845_v36, 0.0  ;;  %v7167_v4 = vld [vmem:[%s8555_s1 + $0x28] sm:$0x3f]  }
 0x252   :  { %v847_v47 = vmax.f32 %v839_v40, 0.0  ;;  %v848_v48 = vmax.f32 %v840_v41, 0.0  ;;  %v849_v5 = vmax.f32 %v841_v42, 0.0  ;;  %v846_v3 = vmul.f32 %v7376_v44, %v7659_v7  ;;  %v7168_v40 = vld [vmem:[%s8555_s1 + $0x130] sm:$0xff]   ;;  %v7169_v42 = vld [vmem:[%s8555_s1 + $0x138] sm:$0x3f]  }
 0x253   :  { %v850_v49 = vmax.f32 %v842_v45, 0.0  ;;  %v857_v6 = vpack.c.bf16 %v852_v46, %v851_v43  ;;  %v7172_v43 = vld [vmem:[#allocation2 + $0x34] ss:$12 sps:$4 sm:$0xff]   ;;  %v7170_v44 = vld [vmem:[#allocation2 + $0x30] ss:$12 sps:$4 sm:$0xff]  }
 0x254   :  { %v855_v50 = vpack.c.bf16 %v848_v48, %v847_v47  ;;  %v854_v52 = vmax.f32 %v846_v3, 0.0  ;;  %v7175_v45 = vld [vmem:[#allocation2 + $0x4c] ss:$12 sps:$4 sm:$0xff]   ;;  %v7173_v46 = vld [vmem:[#allocation2 + $0x48] ss:$12 sps:$4 sm:$0xff]   ;;  %v7755_v48 = vadd.s32 8, %v7581_v12 }
 0x255   :  { %v856_v60 = vpack.c.bf16 %v850_v49, %v849_v5  ;;  %v7751_v47 = vld [vmem:[#allocation2 + $0x38] ss:$12 sps:$4 sm:$0xff]   ;;  %v6141_v5 = vld [vmem:[%s8557_s3 + $0x8] ss:$0 sm:$0xff] }
 0x256   :  { %6121 = vmatmul.mubr.msk.bf16.vlgmr.msra.gmra.mrb[24].mxu0 %vm645_vm5, %v855_v50  ;;  %v858_v61 = vpack.c.bf16 %v854_v52, %v853_v51  ;;  %vm1273_vm10 = vcmp.lt.s32.totalorder %v7755_v48, 14  ;;  %vm1285_vm11 = vcmp.ge.s32.totalorder %v7755_v48, 14  ;;  %vm1759_vm6 = vcmp.lt.s32.totalorder %v7755_v48, 12 }
 0x257   :  { %933 = vmatprep.mubr.bf16.mxu0 %v7450_v0  ;;  %6661 = vmatpush3.bf16.msra.mxu0 %v7579_v11  ;;  %v7164_v11 = vld [vmem:[%s8555_s1 + $0xa8] sm:$0xff]  }
 0x258   :  { %6678 = vmatprep.mubr.msk.bf16.mxu1 %vm1055_vm8, %v7164_v11  ;;  %1470 = vmatprep.subr.bf16.mxu0 %v7172_v43  ;;  %v7767_v11 = vsel %vm1285_vm11, 1.0, %v7451_v30  ;;  %vm4719_vm11 = vcmask 254976  }
 0x25e   :  { %6122 = vmatmul.mubr.msk.bf16.gmra.mrb[28].mxu0 %vm645_vm5, %v856_v60 }
 0x25f   :  { %943 = vmatprep.mubr.bf16.mxu0 %v7450_v0 }
 0x266   :  { %6123 = vmatmul.mubr.msk.bf16.gmra.mrb[32].mxu0 %vm645_vm5, %v857_v6 }
 0x267   :  { %953 = vmatprep.mubr.bf16.mxu0 %v7450_v0 }
 0x26e   :  { %6124 = vmatmul.mubr.msk.bf16.gmra.mrb[36].mxu0 %vm645_vm5, %v858_v61 }
 0x26f   :  { %6662 = vmatprep.mubr.msk.bf16.mxu0 %vm645_vm5, %v855_v50 }
 0x276   :  { %6663 = vmatmul.mubr.msk.bf16.vlgmr.msra.gmra.mrb[40].mxu0 %vm645_vm5, %v856_v60 }
 0x277   :  { %6666 = vmatprep.mubr.msk.bf16.mxu0 %vm645_vm5, %v857_v6  ;;  %1471 = vmatpush1.bf16.msra.mxu0 %v7170_v44 }
 0x278   :  { %1472 = vmatprep.subr.bf16.mxu0 %v7175_v45 }
 0x27b   :  { %1473 = vmatpush1.bf16.msra.mxu0 %v7173_v46 }
 0x27c   :  { %6706 = vmatprep.subr.bf16.mxu0 %v7751_v47 }
 0x27e   :  { %6667 = vmatmul.mubr.msk.bf16.gmra.mrb[44].mxu0 %vm645_vm5, %v858_v61  ;;  %v7764_v61 = vsel %vm1273_vm10, 1.0, %v7451_v30  ;;  %vm4701_vm10 = vcmp.lt.s32.totalorder %v7585_v17, 26 }
 0x27f   :  { %1502 = vmatprep.mubr.bf16.mxu0 %v7450_v0 }
 0x329   :  { %v925_v62 = vpop.f32.mrb[24].mxu0 }
 0x32a   :  { %v927_v63 = vpop.f32.mrb[25].mxu0 }
 0x32b   :  { %v929_v7 = vpop.f32.mrb[26].mxu0 }
 0x32c   :  { %v1033_v53 = vpack.c.bf16 %v929_v7, %v925_v62  ;;  %v931_v54 = vpop.f32.mrb[27].mxu0  ;;  %v7770_v7 = vsel %vm1291_vm12, 1.0, %v7451_v30  ;;  %vm5017_vm12 = vcmask 211968  }
 0x32d   :  { %v1041_v55 = vpack.c.bf16 %v931_v54, %v927_v63 }
 0x32f   :  { %6670 = vmatprep.subr.bf16.mxu1 %v1041_v55 }
 0x330   :  { %6671 = vmatpush3.bf16.msra.mxu1 %v1041_v55 }
 0x331   :  { %v935_v56 = vpop.f32.mrb[28].mxu0 }
 0x332   :  { %v937_v59 = vpop.f32.mrb[29].mxu0 }
 0x333   :  { %v939_v27 = vpop.f32.mrb[30].mxu0 }
 0x334   :  { %v1034_v34 = vpack.c.bf16 %v939_v27, %v935_v56  ;;  %v941_v24 = vpop.f32.mrb[31].mxu0 }
 0x335   :  { %v1042_v29 = vpack.c.bf16 %v941_v24, %v937_v59 }
 0x337   :  { %6672 = vmatprep.subr.bf16.mxu1 %v1042_v29 }
 0x338   :  { %6673 = vmatpush3.bf16.msra.mxu1 %v1042_v29 }
 0x339   :  { %v945_v58 = vpop.f32.mrb[32].mxu0 }
 0x33a   :  { %v947_v1 = vpop.f32.mrb[33].mxu0 }
 0x33b   :  { %v949_v2 = vpop.f32.mrb[34].mxu0 }
 0x33c   :  { %v1035_v8 = vpack.c.bf16 %v949_v2, %v945_v58  ;;  %v951_v9 = vpop.f32.mrb[35].mxu0 }
 0x33d   :  { %v1043_v10 = vpack.c.bf16 %v951_v9, %v947_v1 }
 0x33f   :  { %6674 = vmatprep.subr.bf16.mxu1 %v1043_v10 }
 0x340   :  { %6675 = vmatpush3.bf16.msra.mxu1 %v1043_v10 }
 0x341   :  { %v955_v13 = vpop.f32.mrb[36].mxu0 }
 0x342   :  { %v957_v57 = vpop.f32.mrb[37].mxu0 }
 0x343   :  { %v959_v15 = vpop.f32.mrb[38].mxu0 }
 0x344   :  { %v1036_v16 = vpack.c.bf16 %v959_v15, %v955_v13  ;;  %v961_v18 = vpop.f32.mrb[39].mxu0 }
 0x345   :  { %v1044_v14 = vpack.c.bf16 %v961_v18, %v957_v57 }
 0x346   :  { %v1132_v39 = vsel %vm1062_vm9, %v1036_v16, 0 }
 0x347   :  { %v1064_v19 = vsel %vm1062_vm9, %v1044_v14, 0  ;;  %7127 = vmatprep.subr.msk.bf16.mxu1 %vm1062_vm9, %v1044_v14 }
 0x348   :  { %6677 = vmatpush3.bf16.msra.mxu1 %v1064_v19 }
 0x349   :  { %v6664_v22 = vpop.f32.mrb[40].mxu0  ;;  %6682 = vmatprep.subr.bf16.mxu1 %v1033_v53 }
 0x34a   :  { %v998_v23 = vpop.f32.mrb[41].mxu0 }
 0x34b   :  { %v6665_v25 = vpop.f32.mrb[42].mxu0  ;;  %6679 = vmatmul.mubr.msk.bf16.vlgmr.msra.gmra.mrb[16].mxu1 %vm1055_vm8, %v7165_v20 }
 0x34c   :  { %v1188_v26 = vpack.c.bf16 %v6665_v25, %v6664_v22  ;;  %v1001_v28 = vpop.f32.mrb[43].mxu0  ;;  %6683 = vmatpush3.bf16.msra.mxu1 %v1033_v53  ;;  %6690 = vmatprep.mubr.msk.bf16.mxu1 %vm1055_vm8, %v7166_v21 }
 0x34d   :  { %v1187_v32 = vpack.c.bf16 %v1001_v28, %v998_v23  ;;  %6684 = vmatprep.subr.bf16.mxu1 %v1034_v34 }
 0x350   :  { %6685 = vmatpush3.bf16.msra.mxu1 %v1034_v34 }
 0x351   :  { %v6668_v33 = vpop.f32.mrb[44].mxu0  ;;  %6686 = vmatprep.subr.bf16.mxu1 %v1035_v8 }
 0x352   :  { %v1014_v35 = vpop.f32.mrb[45].mxu0 }
 0x353   :  { %v6669_v37 = vpop.f32.mrb[46].mxu0 }
 0x354   :  { %v1190_v31 = vpack.c.bf16 %v6669_v37, %v6668_v33  ;;  %v1017_v38 = vpop.f32.mrb[47].mxu0  ;;  %6687 = vmatpush3.bf16.msra.mxu1 %v1035_v8 }
 0x355   :  { %v1189_v36 = vpack.c.bf16 %v1017_v38, %v1014_v35  ;;  %7128 = vmatprep.subr.msk.bf16.mxu1 %vm1062_vm9, %v1036_v16 }
 0x356   :  { %v1208_v41 = vsel %vm1062_vm9, %v1190_v31, 0 }
 0x358   :  { %6689 = vmatpush3.bf16.msra.mxu1 %v1132_v39 }
 0x359   :  { %6694 = vmatprep.subr.bf16.mxu1 %v1187_v32 }
 0x35b   :  { %6691 = vmatmul.mubr.msk.bf16.vlgmr.msra.gmra.mrb[16].mxu1 %vm1055_vm8, %v7167_v4 }
 0x35c   :  { %6695 = vmatpush3.bf16.msra.mxu1 %v1187_v32  ;;  %6702 = vmatprep.mubr.msk.bf16.mxu1 %vm1055_vm8, %v7168_v40 }
 0x35d   :  { %6696 = vmatprep.subr.bf16.mxu1 %v1188_v26 }
 0x360   :  { %6697 = vmatpush3.bf16.msra.mxu1 %v1188_v26 }
 0x361   :  { %6698 = vmatprep.subr.bf16.mxu1 %v1189_v36 }
 0x364   :  { %6699 = vmatpush3.bf16.msra.mxu1 %v1189_v36 }
 0x365   :  { %7129 = vmatprep.subr.msk.bf16.mxu1 %vm1062_vm9, %v1190_v31 }
 0x368   :  { %6701 = vmatpush3.bf16.msra.mxu1 %v1208_v41 }
 0x369   :  { %6722 = vmatprep.subr.bf16.mxu1 %v7451_v30 }
 0x36b   :  { %6703 = vmatmul.mubr.msk.bf16.vlgmr.msra.gmra.mrb[16].mxu1 %vm1055_vm8, %v7169_v42  ;;  %vm2013_vm8 = vcmask 97280  }
 0x36c   :  { %6726 = vmatprep.mubr.msk.bf16.mxu1 %vm7452_vm15, %v7451_v30 }
 0x43e   :  { %v6704_v3 = vpop.f32.mrb[16].mxu1 }
 0x43f   :  { %v1244_v49 = vpop.f32.mrb[17].mxu1  ;;  %v1270_v6 = vadd.f32 %v6704_v3, %v6141_v5 }
 0x440   :  { %v1268_v50 = vadd.f32 %v6141_v5, %v1244_v49  ;;  %v6705_v51 = vpop.f32.mrb[18].mxu1 }
 0x441   :  { %v1271_v52 = vadd.f32 %v6705_v51, %v6141_v5  ;;  %v1247_v60 = vpop.f32.mrb[19].mxu1  ;;  %v1302_v53 = vmul.f32 0.0, %v1270_v6  ;;  %v1331_v8 = vsel %vm1304_vm13, %v1270_v6, 0.0 }
 0x442   :  { %v1324_v62 = vmul.f32 0.0, %v1268_v50  ;;  %v1269_v63 = vadd.f32 %v6141_v5, %v1247_v60  ;;  %v1305_v56 = vsel %vm1304_vm13, %v1268_v50, 0.0 }
 0x443   :  { %v1303_v59 = vmul.f32 0.0, %v1271_v52  ;;  %v1327_v34 = vmul.f32 %v7770_v7, %v1271_v52  ;;  %v1308_v2 = vsel %vm1304_vm13, %v1302_v53, 0.0 }
 0x444   :  { %v1301_v54 = vmul.f32 %v7764_v61, %v1269_v63  ;;  %v1325_v55 = vmul.f32 %v7767_v11, %v1269_v63  ;;  %v1328_v27 = vsel %vm1304_vm13, %v1324_v62, 0.0 }
 0x445   :  { %v1311_v13 = vsel %vm1310_vm14, %v1303_v59, 0.0  ;;  %v1333_v57 = vsel %vm1310_vm14, %v1327_v34, 0.0 }
 0x446   :  { %v1306_v24 = vsel %vm1304_vm13, %v1301_v54, 0.0  ;;  %v1329_v29 = vsel %vm1304_vm13, %v1325_v55, 0.0 }
 0x447   :  { %v1307_v58 = vadd.f32 %v1306_v24, %v1305_v56  ;;  %v1330_v1 = vadd.f32 %v1329_v29, %v1328_v27 }
 0x449   :  { %v1309_v9 = vadd.f32 %v1308_v2, %v1307_v58  ;;  %v1332_v10 = vadd.f32 %v1331_v8, %v1330_v1 }
 0x44b   :  { %v1312_v15 = vadd.f32 %v1311_v13, %v1309_v9  ;;  %v1334_v16 = vadd.f32 %v1333_v57, %v1332_v10 }
 0x44d   :  { %v1313_v18 = vrot.slane %v1312_v15, 4  ;;  %v1335_v14 = vrot.slane %v1334_v16, 4 }
 0x44f   :  { %v1314_v19 = vadd.f32 %v1313_v18, %v1312_v15  ;;  %v1336_v20 = vadd.f32 %v1335_v14, %v1334_v16 }
 0x451   :  { %v1315_v21 = vrot.slane %v1314_v19, 2  ;;  %v1337_v22 = vrot.slane %v1336_v20, 2 }
 0x453   :  { %v1316_v23 = vadd.f32 %v1315_v21, %v1314_v19  ;;  %v1338_v25 = vadd.f32 %v1337_v22, %v1336_v20 }
 0x455   :  { %v1317_v26 = vrot.slane %v1316_v23, 1  ;;  %v1339_v28 = vrot.slane %v1338_v25, 1 }
 0x457   :  { %v1318_v32 = vadd.f32 %v1317_v26, %v1316_v23  ;;  %v1340_v33 = vadd.f32 %v1339_v28, %v1338_v25 }
 0x459   :  { %v1319_v35 = vmul.f32 0.071428575, %v1318_v32  ;;  %v1341_v37 = vmul.f32 0.071428575, %v1340_v33 }
 0x45b   :  { %v1321_v31 = vmul.f32 %v1319_v35, %v7764_v61  ;;  %v1322_v38 = vmul.f32 0.0, %v1319_v35  ;;  %v1342_v36 = vmul.f32 0.0, %v1341_v37  ;;  %v1343_v39 = vmul.f32 %v1341_v37, %v7767_v11 }
 0x45c   :  { %v1345_v4 = vmul.f32 %v1341_v37, %v7770_v7 }
 0x45d   :  { %v1346_v40 = vadd.f32 %v1342_v36, %v1319_v35  ;;  %v1347_v41 = vadd.f32 %v1343_v39, %v1321_v31  ;;  %v1348_v42 = vadd.f32 %v1341_v37, %v1322_v38 }
 0x45e   :  { %v1349_v43 = vadd.f32 %v1345_v4, %v1322_v38 }
 0x45f   :  { %v7786_v44 = vsub.f32 %v1268_v50, %v1346_v40  ;;  %v7788_v45 = vsub.f32 %v1269_v63, %v1347_v41  ;;  %v1352_v46 = vsub.f32 %v1270_v6, %v1348_v42 }
 0x460   :  { %v7790_v5 = vsub.f32 %v1271_v52, %v1349_v43 }
 0x461   :  { %v1354_v3 = vmul.f32 %v7786_v44, %v7786_v44  ;;  %v1355_v49 = vmul.f32 %v7788_v45, %v7788_v45  ;;  %v1356_v51 = vmul.f32 %v1352_v46, %v1352_v46 }
 0x462   :  { %v1357_v60 = vmul.f32 %v7790_v5, %v7790_v5 }
 0x463   :  { %v1359_v62 = vmul.f32 %v1355_v49, %v7764_v61  ;;  %v1360_v53 = vmul.f32 0.0, %v1356_v51  ;;  %v1380_v50 = vmul.f32 0.0, %v1354_v3  ;;  %v1381_v63 = vmul.f32 %v1355_v49, %v7767_v11 }
 0x464   :  { %v1361_v54 = vmul.f32 0.0, %v1357_v60  ;;  %v1362_v6 = vsel %vm1304_vm13, %v1354_v3, 0.0  ;;  %v1383_v59 = vmul.f32 %v1357_v60, %v7770_v7  ;;  %v1387_v58 = vsel %vm1304_vm13, %v1356_v51, 0.0 }
 0x465   :  { %v1363_v52 = vsel %vm1304_vm13, %v1359_v62, 0.0  ;;  %v1384_v55 = vsel %vm1304_vm13, %v1380_v50, 0.0  ;;  %v1385_v27 = vsel %vm1304_vm13, %v1381_v63, 0.0  ;;  %v1365_v34 = vsel %vm1304_vm13, %v1360_v53, 0.0 }
 0x466   :  { %v1364_v56 = vadd.f32 %v1363_v52, %v1362_v6  ;;  %v1386_v24 = vadd.f32 %v1385_v27, %v1384_v55  ;;  %v1367_v1 = vsel %vm1310_vm14, %v1361_v54, 0.0  ;;  %v1389_v9 = vsel %vm1310_vm14, %v1383_v59, 0.0  ;;  %v7177_v52 = vld [vmem:[#allocation2 + $0x50] ss:$12 sps:$4 sm:$0xff]  }
 0x467   :  { %vm5311_vm14 = vcmp.lt.s32.totalorder %v7585_v17, 27 }
 0x468   :  { %v1366_v29 = vadd.f32 %v1365_v34, %v1364_v56  ;;  %v1388_v2 = vadd.f32 %v1387_v58, %v1386_v24 }
 0x46a   :  { %v1368_v8 = vadd.f32 %v1367_v1, %v1366_v29  ;;  %v1390_v10 = vadd.f32 %v1389_v9, %v1388_v2  ;;  %v7179_v2 = vld [vmem:[%s8555_s1 + $0x30] sm:$0x3f]   ;;  %v7178_v9 = vld [vmem:[%s8555_s1 + $0xb8] sm:$0x3f]  }
 0x46c   :  { %v1369_v13 = vrot.slane %v1368_v8, 4  ;;  %v1391_v57 = vrot.slane %v1390_v10, 4 }
 0x46e   :  { %v1370_v15 = vadd.f32 %v1369_v13, %v1368_v8  ;;  %v1392_v16 = vadd.f32 %v1391_v57, %v1390_v10 }
 0x470   :  { %v1371_v18 = vrot.slane %v1370_v15, 2  ;;  %v1393_v14 = vrot.slane %v1392_v16, 2 }
 0x472   :  { %v1372_v19 = vadd.f32 %v1371_v18, %v1370_v15  ;;  %v1394_v20 = vadd.f32 %v1393_v14, %v1392_v16 }
 0x474   :  { %v1373_v21 = vrot.slane %v1372_v19, 1  ;;  %v1395_v22 = vrot.slane %v1394_v20, 1 }
 0x476   :  { %v1374_v23 = vadd.f32 %v1373_v21, %v1372_v19  ;;  %v1396_v25 = vadd.f32 %v1395_v22, %v1394_v20  ;;  %v7180_v19 = vld [vmem:[%s8555_s1 + $0x140] sm:$0x3f]   ;;  %v7184_v22 = vld [vmem:[#allocation2 + $0x68] ss:$12 sps:$4 sm:$0xff]  }
 0x477   :  { %v7183_v20 = vld [vmem:[#allocation2 + $0x64] ss:$12 sps:$4 sm:$0xff]   ;;  %v7181_v21 = vld [vmem:[#allocation2 + $0x60] ss:$12 sps:$4 sm:$0xff]  }
 0x478   :  { %v1375_v26 = vmul.f32 0.071428575, %v1374_v23  ;;  %v1397_v28 = vmul.f32 0.071428575, %v1396_v25  ;;  %v7187_v23 = vld [vmem:[#allocation2 + $0x7c] ss:$12 sps:$4 sm:$0xff]  }
 0x479   :  { %v7185_v25 = vld [vmem:[#allocation2 + $0x78] ss:$12 sps:$4 sm:$0xff]  }
 0x47a   :  { %v1377_v32 = vmul.f32 %v1375_v26, %v7764_v61  ;;  %v1378_v33 = vmul.f32 0.0, %v1375_v26  ;;  %v1398_v35 = vmul.f32 0.0, %v1397_v28  ;;  %v1399_v37 = vmul.f32 %v1397_v28, %v7767_v11 }
 0x47b   :  { %v1401_v31 = vmul.f32 %v1397_v28, %v7770_v7 }
 0x47c   :  { %v1404_v38 = vadd.f32 %v1397_v28, %v1378_v33  ;;  %v1402_v36 = vadd.f32 %v1398_v35, %v1375_v26  ;;  %v1403_v39 = vadd.f32 %v1399_v37, %v1377_v32  ;;  %v7188_v26 = vld [vmem:[#allocation2 + $0x80] ss:$12 sps:$4 sm:$0xff]   ;;  %v7189_v32 = vld [vmem:[#allocation2 + $0x90] ss:$12 sps:$4 sm:$0xff]   ;;  %v7193_v37 = vld [vmem:[#allocation2 + $0xa8] ss:$12 sps:$4 sm:$0xff]  }
 0x47d   :  { %v1405_v4 = vadd.f32 %v1401_v31, %v1378_v33  ;;  %v7191_v28 = vld [vmem:[#allocation2 + $0x94] ss:$12 sps:$4 sm:$0xff]   ;;  %v7192_v33 = vld [vmem:[#allocation2 + $0x98] ss:$12 sps:$4 sm:$0xff]   ;;  %v7196_v31 = vld [vmem:[#allocation2 + $0xb0] ss:$12 sps:$4 sm:$0xff]  }
 0x47e   :  { %v1408_v40 = vadd.f32 1e-05, %v1404_v38  ;;  %v1406_v41 = vadd.f32 1e-05, %v1402_v36  ;;  %v1407_v42 = vadd.f32 1e-05, %v1403_v39 }
 0x47f   :  { %v1409_v43 = vadd.f32 1e-05, %v1405_v4  ;;  %v7195_v35 = vld [vmem:[#allocation2 + $0xac] ss:$12 sps:$4 sm:$0xff]  }
 0x480   :  { %7377 = vrsqrt.f32 %v1408_v40 }
 0x481   :  { %7379 = vrsqrt.f32 %v1406_v41 }
 0x482   :  { %7381 = vrsqrt.f32 %v1407_v42 }
 0x483   :  { %7383 = vrsqrt.f32 %v1409_v43 }
 0x48a   :  { %v7378_v3 = vpop.eup %7377 }
 0x48b   :  { %v7380_v61 = vpop.eup %7379  ;;  %v1416_v49 = vmul.f32 %v7378_v3, %v1352_v46 }
 0x48c   :  { %v7382_v51 = vpop.eup %7381  ;;  %v1414_v11 = vmul.f32 %v7380_v61, %v7786_v44 }
 0x48d   :  { %v7384_v60 = vpop.eup %7383  ;;  %v1415_v7 = vmul.f32 %v7382_v51, %v7788_v45  ;;  %v1420_v50 = vmax.f32 %v1416_v49, 0.0  ;;  %v6158_v51 = vld [vmem:[%s8557_s3 + $0x10] ss:$0 sm:$0xff] }
 0x48e   :  { %v1418_v62 = vmax.f32 %v1414_v11, 0.0  ;;  %v1417_v53 = vmul.f32 %v7384_v60, %v7790_v5 }
 0x48f   :  { %v1419_v63 = vmax.f32 %v1415_v7, 0.0  ;;  %v7863_v7 = vsel %vm1750_vm3, 1.0, %v7451_v30  ;;  %vm5375_vm3 = vcmask 128000  }
 0x490   :  { %v1421_v54 = vmax.f32 %v1417_v53, 0.0 }
 0x491   :  { %v1422_v6 = vpack.c.bf16 %v1419_v63, %v1418_v62  ;;  %v7866_v62 = vsel %vm1756_vm4, 1.0, %v7451_v30  ;;  %vm5765_vm4 = vcmask 441344  }
 0x492   :  { %v1423_v55 = vpack.c.bf16 %v1421_v54, %v1420_v50 }
 0x493   :  { %6148 = vmatmul.mubr.msk.bf16.vlgmr.msra.gmra.mrb[48].mxu0 %vm1304_vm13, %v1422_v6 }
 0x494   :  { %6707 = vmatpush3.bf16.msra.mxu0 %v7751_v47  ;;  %1512 = vmatprep.mubr.bf16.mxu0 %v7450_v0 }
 0x495   :  { %6708 = vmatprep.subr.bf16.mxu0 %v7177_v52 }
 0x498   :  { %6709 = vmatpush3.bf16.msra.mxu0 %v7177_v52 }
 0x499   :  { %6714 = vmatprep.subr.bf16.mxu0 %v7451_v30 }
 0x49b   :  { %6149 = vmatmul.mubr.msk.bf16.gmra.mrb[52].mxu0 %vm1304_vm13, %v1423_v55 }
 0x49c   :  { %6710 = vmatprep.mubr.msk.bf16.mxu0 %vm1304_vm13, %v1422_v6  ;;  %v7869_v6 = vsel %vm1759_vm6, 1.0, %v7451_v30  ;;  %vm6074_vm6 = vcmask 25600  }
 0x4a3   :  { %6711 = vmatmul.mubr.msk.bf16.vlgmr.msra.gmra.mrb[56].mxu0 %vm1304_vm13, %v1423_v55 }
 0x4a4   :  { %6718 = vmatprep.mubr.msk.bf16.mxu0 %vm7452_vm15, %v7451_v30 }
 0x566   :  { %v1504_v47 = vpop.f32.mrb[48].mxu0 }
 0x567   :  { %v1506_v44 = vpop.f32.mrb[49].mxu0 }
 0x568   :  { %v1508_v45 = vpop.f32.mrb[50].mxu0 }
 0x569   :  { %v1574_v46 = vpack.c.bf16 %v1508_v45, %v1504_v47  ;;  %v1510_v5 = vpop.f32.mrb[51].mxu0 }
 0x56a   :  { %v1578_v56 = vpack.c.bf16 %v1510_v5, %v1506_v44 }
 0x56b   :  { %6723 = vmatpush3.bf16.msra.mxu1 %v1574_v46 }
 0x56c   :  { %6715 = vmatpush3.bf16.msra.mxu0 %v1578_v56  ;;  %6724 = vmatprep.subr.bf16.mxu1 %v7451_v30 }
 0x56d   :  { %6716 = vmatprep.subr.bf16.mxu0 %v7451_v30 }
 0x56e   :  { %v1514_v59 = vpop.f32.mrb[52].mxu0 }
 0x56f   :  { %v1516_v27 = vpop.f32.mrb[53].mxu0 }
 0x570   :  { %v1518_v34 = vpop.f32.mrb[54].mxu0 }
 0x571   :  { %v1575_v24 = vpack.c.bf16 %v1518_v34, %v1514_v59  ;;  %v1520_v29 = vpop.f32.mrb[55].mxu0 }
 0x572   :  { %v1579_v58 = vpack.c.bf16 %v1520_v29, %v1516_v27 }
 0x573   :  { %v1642_v1 = vsel %vm1062_vm9, %v1575_v24, 0 }
 0x574   :  { %v1590_v8 = vsel %vm1062_vm9, %v1579_v58, 0  ;;  %6725 = vmatpush3.bf16.msra.mxu1 %v1642_v1 }
 0x575   :  { %6717 = vmatpush3.bf16.msra.mxu0 %v1590_v8  ;;  %1921 = vmatprep.subr.bf16.mxu1 %v7183_v20 }
 0x576   :  { %v6712_v10 = vpop.f32.mrb[56].mxu0  ;;  %6730 = vmatprep.subr.bf16.mxu0 %v7451_v30 }
 0x577   :  { %v1557_v13 = vpop.f32.mrb[57].mxu0  ;;  %6727 = vmatmul.mubr.msk.bf16.vlgmr.msra.gmra.mrb[20].mxu1 %vm1585_vm0, %v7179_v2 }
 0x578   :  { %v6713_v57 = vpop.f32.mrb[58].mxu0  ;;  %6719 = vmatmul.mubr.msk.bf16.vlgmr.msra.gmra.mrb[60].mxu0 %vm1585_vm0, %v7178_v9  ;;  %1953 = vmatprep.mubr.bf16.mxu1 %v7450_v0 }
 0x579   :  { %v1688_v15 = vpack.c.bf16 %v6713_v57, %v6712_v10  ;;  %v1560_v16 = vpop.f32.mrb[59].mxu0  ;;  %6734 = vmatprep.mubr.msk.bf16.mxu0 %vm7452_vm15, %v7451_v30  ;;  %1922 = vmatpush1.bf16.msra.mxu1 %v7181_v21 }
 0x57a   :  { %v1687_v18 = vpack.c.bf16 %v1560_v16, %v1557_v13  ;;  %1923 = vmatprep.subr.bf16.mxu1 %v7187_v23 }
 0x57b   :  { %v1698_v14 = vsel %vm1062_vm9, %v1688_v15, 0 }
 0x57c   :  { %6731 = vmatpush3.bf16.msra.mxu0 %v1687_v18 }
 0x57d   :  { %6732 = vmatprep.subr.bf16.mxu0 %v7451_v30  ;;  %1924 = vmatpush1.bf16.msra.mxu1 %v7185_v25 }
 0x57e   :  { %1925 = vmatprep.subr.bf16.mxu1 %v7191_v28 }
 0x580   :  { %6733 = vmatpush3.bf16.msra.mxu0 %v1698_v14 }
 0x581   :  { %6738 = vmatprep.subr.bf16.mxu0 %v7451_v30  ;;  %1926 = vmatpush1.bf16.msra.mxu1 %v7189_v32 }
 0x582   :  { %1927 = vmatprep.subr.bf16.mxu1 %v7195_v35 }
 0x583   :  { %6735 = vmatmul.mubr.msk.bf16.vlgmr.msra.gmra.mrb[64].mxu0 %vm1585_vm0, %v7180_v19 }
 0x584   :  { %6746 = vmatprep.mubr.msk.bf16.mxu0 %vm7452_vm15, %v7451_v30  ;;  %6739 = vmatpush3.bf16.msra.mxu0 %v7184_v22 }
 0x585   :  { %6740 = vmatprep.subr.bf16.mxu0 %v7451_v30  ;;  %1928 = vmatpush1.bf16.msra.mxu1 %v7193_v37 }
 0x586   :  { %6750 = vmatprep.subr.bf16.mxu1 %v7451_v30 }
 0x588   :  { %6741 = vmatpush3.bf16.msra.mxu0 %v7188_v26 }
 0x589   :  { %6742 = vmatprep.subr.bf16.mxu0 %v7451_v30 }
 0x58c   :  { %6743 = vmatpush3.bf16.msra.mxu0 %v7192_v33 }
 0x58d   :  { %6744 = vmatprep.subr.bf16.mxu0 %v7451_v30 }
 0x590   :  { %6745 = vmatpush3.bf16.msra.mxu0 %v7196_v31 }
 0x591   :  { %6756 = vmatprep.subr.bf16.mxu0 %v7451_v30 }
 0x64a   :  { %v1678_v38 = vpop.f32.mrb[20].mxu1 }
 0x64b   :  { %v1626_v36 = vpop.f32.mrb[60].mxu0  ;;  %v6728_v39 = vpop.f32.mrb[21].mxu1 }
 0x64c   :  { %v6720_v4 = vpop.f32.mrb[61].mxu0  ;;  %v1679_v40 = vadd.f32 %v1678_v38, %v1626_v36  ;;  %v1681_v41 = vpop.f32.mrb[22].mxu1 }
 0x64d   :  { %v1629_v42 = vpop.f32.mrb[62].mxu0  ;;  %v6729_v43 = vpop.f32.mrb[23].mxu1 }
 0x64e   :  { %v6721_v3 = vpop.f32.mrb[63].mxu0  ;;  %v1682_v61 = vadd.f32 %v1681_v41, %v1629_v42 }
 0x656   :  { %v1734_v49 = vpop.f32.mrb[64].mxu0 }
 0x657   :  { %v1741_v11 = vadd.f32 %v1734_v49, %v1679_v40  ;;  %v6736_v60 = vpop.f32.mrb[65].mxu0 }
 0x658   :  { %v1737_v53 = vpop.f32.mrb[66].mxu0 }
 0x659   :  { %v1748_v50 = vadd.f32 %v6158_v51, %v1741_v11  ;;  %v1742_v63 = vadd.f32 %v1737_v53, %v1682_v61  ;;  %v6737_v54 = vpop.f32.mrb[67].mxu0 }
 0x65b   :  { %v1764_v52 = vmul.f32 %v7863_v7, %v1748_v50  ;;  %v1779_v55 = vmul.f32 %v7866_v62, %v1748_v50  ;;  %v1749_v47 = vadd.f32 %v6158_v51, %v1742_v63 }
 0x65d   :  { %v1765_v44 = vmul.f32 0.0, %v1749_v47  ;;  %v1780_v45 = vmul.f32 %v7869_v6, %v1749_v47  ;;  %v1766_v46 = vsel %vm259_vm2, %v1764_v52, 0.0  ;;  %v1781_v5 = vsel %vm259_vm2, %v1779_v55, 0.0 }
 0x65f   :  { %v1768_v56 = vsel %vm1767_vm7, %v1765_v44, 0.0  ;;  %v1782_v59 = vsel %vm1767_vm7, %v1780_v45, 0.0 }
 0x660   :  { %v1769_v27 = vadd.f32 %v1768_v56, %v1766_v46  ;;  %v1783_v34 = vadd.f32 %v1782_v59, %v1781_v5 }
 0x662   :  { %v1770_v24 = vrot.slane %v1769_v27, 4  ;;  %v1784_v29 = vrot.slane %v1783_v34, 4 }
 0x664   :  { %v1771_v58 = vadd.f32 %v1770_v24, %v1769_v27  ;;  %v1785_v1 = vadd.f32 %v1784_v29, %v1783_v34 }
 0x666   :  { %v1772_v2 = vrot.slane %v1771_v58, 2  ;;  %v1786_v8 = vrot.slane %v1785_v1, 2 }
 0x668   :  { %v1773_v9 = vadd.f32 %v1772_v2, %v1771_v58  ;;  %v1787_v10 = vadd.f32 %v1786_v8, %v1785_v1 }
 0x66a   :  { %v1774_v13 = vrot.slane %v1773_v9, 1  ;;  %v1788_v57 = vrot.slane %v1787_v10, 1 }
 0x66c   :  { %v1775_v15 = vadd.f32 %v1774_v13, %v1773_v9  ;;  %v1789_v16 = vadd.f32 %v1788_v57, %v1787_v10 }
 0x66e   :  { %v1776_v18 = vmul.f32 0.16666667, %v1775_v15  ;;  %v1790_v14 = vmul.f32 0.16666667, %v1789_v16 }
 0x670   :  { %v1777_v19 = vmul.f32 %v1776_v18, %v7863_v7  ;;  %v1778_v20 = vmul.f32 0.0, %v1776_v18  ;;  %v1791_v21 = vmul.f32 %v1790_v14, %v7866_v62  ;;  %v1792_v22 = vmul.f32 %v1790_v14, %v7869_v6 }
 0x672   :  { %v1793_v23 = vadd.f32 %v1791_v21, %v1777_v19  ;;  %v1794_v25 = vadd.f32 %v1792_v22, %v1778_v20  ;;  %v7912_v21 = vld [vmem:[%s8555_s1 + $0x198] sm:$0x3f]   ;;  %v7917_v22 = vld [vmem:[%s8555_s1 + $0x1a0] sm:$0x3f]  }
 0x674   :  { %v1795_v26 = vsub.f32 %v1748_v50, %v1793_v23  ;;  %v1796_v28 = vsub.f32 %v1749_v47, %v1794_v25  ;;  %v7201_v23 = vld [vmem:[#allocation2 + $0xc4] ss:$12 sps:$4 sm:$0xff]   ;;  %v7199_v25 = vld [vmem:[#allocation2 + $0xc0] ss:$12 sps:$4 sm:$0xff]  }
 0x676   :  { %v1797_v32 = vmul.f32 %v1795_v26, %v1795_v26  ;;  %v1798_v33 = vmul.f32 %v1796_v28, %v1796_v28 }
 0x678   :  { %v1799_v35 = vmul.f32 %v1797_v32, %v7863_v7  ;;  %v1800_v37 = vmul.f32 0.0, %v1798_v33  ;;  %v1813_v31 = vmul.f32 %v1797_v32, %v7866_v62  ;;  %v1814_v38 = vmul.f32 %v1798_v33, %v7869_v6  ;;  %v7203_v32 = vld [vmem:[#allocation2 + $0xd8] ss:$12 sps:$4 sm:$0xff]   ;;  %v7206_v33 = vld [vmem:[#allocation2 + $0xe0] ss:$12 sps:$4 sm:$0xff]  }
 0x67a   :  { %v1801_v36 = vsel %vm259_vm2, %v1799_v35, 0.0  ;;  %v1802_v39 = vsel %vm1767_vm7, %v1800_v37, 0.0  ;;  %v1815_v4 = vsel %vm259_vm2, %v1813_v31, 0.0  ;;  %v1816_v40 = vsel %vm1767_vm7, %v1814_v38, 0.0  ;;  %v7209_v35 = vld [vmem:[#allocation2 + $0xf4] ss:$12 sps:$4 sm:$0xff]  }
 0x67b   :  { %v1803_v41 = vadd.f32 %v1802_v39, %v1801_v36  ;;  %v1817_v42 = vadd.f32 %v1816_v40, %v1815_v4  ;;  %v7207_v37 = vld [vmem:[#allocation2 + $0xf0] ss:$12 sps:$4 sm:$0xff]   ;;  %v7210_v31 = vld [vmem:[#allocation2 + $0xf8] ss:$12 sps:$4 sm:$0xff]   ;;  %v7211_v36 = vld [vmem:[#allocation2 + $0x108] ss:$12 sps:$4 sm:$0xff]  }
 0x67c   :  { %v7213_v38 = vld [vmem:[#allocation2 + $0x10c] ss:$12 sps:$4 sm:$0xff]   ;;  %v7214_v39 = vld [vmem:[#allocation2 + $0x110] ss:$12 sps:$4 sm:$0xff]  }
 0x67d   :  { %v1804_v43 = vrot.slane %v1803_v41, 4  ;;  %v1818_v3 = vrot.slane %v1817_v42, 4 }
 0x67f   :  { %v1805_v61 = vadd.f32 %v1804_v43, %v1803_v41  ;;  %v1819_v49 = vadd.f32 %v1818_v3, %v1817_v42 }
 0x681   :  { %v1806_v51 = vrot.slane %v1805_v61, 2  ;;  %v1820_v11 = vrot.slane %v1819_v49, 2 }
 0x683   :  { %v1807_v60 = vadd.f32 %v1806_v51, %v1805_v61  ;;  %v1821_v53 = vadd.f32 %v1820_v11, %v1819_v49 }
 0x685   :  { %v1808_v50 = vrot.slane %v1807_v60, 1  ;;  %v1822_v63 = vrot.slane %v1821_v53, 1 }
 0x687   :  { %v1809_v54 = vadd.f32 %v1808_v50, %v1807_v60  ;;  %v1823_v52 = vadd.f32 %v1822_v63, %v1821_v53 }
 0x689   :  { %v1810_v55 = vmul.f32 0.16666667, %v1809_v54  ;;  %v1824_v47 = vmul.f32 0.16666667, %v1823_v52 }
 0x68b   :  { %v1811_v44 = vmul.f32 %v1810_v55, %v7863_v7  ;;  %v1812_v45 = vmul.f32 0.0, %v1810_v55  ;;  %v1825_v46 = vmul.f32 %v1824_v47, %v7866_v62  ;;  %v1826_v5 = vmul.f32 %v1824_v47, %v7869_v6 }
 0x68d   :  { %v1827_v56 = vadd.f32 %v1825_v46, %v1811_v44  ;;  %v1828_v59 = vadd.f32 %v1826_v5, %v1812_v45 }
 0x68f   :  { %v1829_v27 = vadd.f32 1e-05, %v1827_v56  ;;  %v1830_v34 = vadd.f32 1e-05, %v1828_v59 }
 0x691   :  { %7385 = vrsqrt.f32 %v1829_v27 }
 0x692   :  { %7387 = vrsqrt.f32 %v1830_v34 }
 0x69b   :  { %v7386_v24 = vpop.eup %7385 }
 0x69c   :  { %v7388_v29 = vpop.eup %7387  ;;  %v7891_v58 = vmul.f32 %v7386_v24, %v1795_v26  ;;  %v7202_v26 = vld [vmem:[#allocation2 + $0xc8] ss:$12 sps:$4 sm:$0xff]  }
 0x69d   :  { %v7893_v1 = vmul.f32 %v7388_v29, %v1796_v28  ;;  %v7205_v28 = vld [vmem:[#allocation2 + $0xdc] ss:$12 sps:$4 sm:$0xff]  }
 0x69e   :  { %v1835_v2 = vmax.f32 %v7891_v58, 0.0 }
 0x69f   :  { %v1836_v7 = vmax.f32 %v7893_v1, 0.0 }
 0x6a1   :  { %v1837_v62 = vpack.c.bf16 %v1836_v7, %v1835_v2 }
 0x6a3   :  { %6171 = vmatmul.mubr.msk.bf16.vlgmr.msra.gmra.mrb[24].mxu1 %vm259_vm2, %v1837_v62  ;;  %6747 = vmatmul.mubr.msk.bf16.vlgmr.msra.gmra.mrb[68].mxu0 %vm259_vm2, %v1837_v62 }
 0x6a4   :  { %6752 = vmatprep.mubr.msk.bf16.mxu1 %vm7452_vm15, %v7451_v30  ;;  %6758 = vmatprep.mubr.msk.bf16.mxu0 %vm7452_vm15, %v7451_v30 }
 0x776   :  { %v1955_v6 = vpop.f32.mrb[24].mxu1  ;;  %v1998_v8 = vpop.f32.mrb[68].mxu0 }
 0x777   :  { %v1957_v9 = vpop.f32.mrb[25].mxu1  ;;  %v6748_v10 = vpop.f32.mrb[69].mxu0 }
 0x778   :  { %v1959_v13 = vpop.f32.mrb[26].mxu1  ;;  %v2001_v57 = vpop.f32.mrb[70].mxu0 }
 0x779   :  { %v2007_v15 = vpack.c.bf16 %v1959_v13, %v1955_v6  ;;  %v2063_v16 = vpack.c.bf16 %v2001_v57, %v1998_v8  ;;  %v1961_v18 = vpop.f32.mrb[27].mxu1  ;;  %v6749_v14 = vpop.f32.mrb[71].mxu0 }
 0x77a   :  { %v6177_v14 = vld [vmem:[%s8557_s3 + $0x18] ss:$0 sm:$0xff] }
 0x77b   :  { %v2018_v19 = vsel %vm1062_vm9, %v2007_v15, 0  ;;  %v2073_v20 = vsel %vm1062_vm9, %v2063_v16, 0 }
 0x77c   :  { %6751 = vmatpush3.bf16.msra.mxu1 %v2018_v19  ;;  %6757 = vmatpush3.bf16.msra.mxu0 %v2073_v20 }
 0x77d   :  { %6762 = vmatprep.subr.bf16.mxu0 %v7451_v30  ;;  %2247 = vmatprep.subr.bf16.mxu1 %v7201_v23  ;;  %v6178_v23 = vld [vmem:[%s8557_s3 + $0x20] ss:$0 sm:$0xff] }
 0x77f   :  { %6753 = vmatmul.mubr.msk.bf16.vlgmr.msra.gmra.mrb[28].mxu1 %vm2013_vm8, %v7912_v21  ;;  %6759 = vmatmul.mubr.msk.bf16.vlgmr.msra.gmra.mrb[72].mxu0 %vm2013_vm8, %v7917_v22 }
 0x780   :  { %2279 = vmatprep.mubr.bf16.mxu1 %v7450_v0  ;;  %6770 = vmatprep.mubr.msk.bf16.mxu0 %vm7452_vm15, %v7451_v30 }
 0x781   :  { %2248 = vmatpush1.bf16.msra.mxu1 %v7199_v25  ;;  %6763 = vmatpush3.bf16.msra.mxu0 %v7202_v26 }
 0x782   :  { %6764 = vmatprep.subr.bf16.mxu0 %v7451_v30  ;;  %2249 = vmatprep.subr.bf16.mxu1 %v7205_v28 }
 0x785   :  { %2250 = vmatpush1.bf16.msra.mxu1 %v7203_v32  ;;  %6765 = vmatpush3.bf16.msra.mxu0 %v7206_v33 }
 0x786   :  { %6766 = vmatprep.subr.bf16.mxu0 %v7451_v30  ;;  %2251 = vmatprep.subr.bf16.mxu1 %v7209_v35 }
 0x789   :  { %2252 = vmatpush1.bf16.msra.mxu1 %v7207_v37  ;;  %6767 = vmatpush3.bf16.msra.mxu0 %v7210_v31 }
 0x78a   :  { %6768 = vmatprep.subr.bf16.mxu0 %v7451_v30  ;;  %2253 = vmatprep.subr.bf16.mxu1 %v7213_v38 }
 0x78d   :  { %2254 = vmatpush1.bf16.msra.mxu1 %v7211_v36  ;;  %6769 = vmatpush3.bf16.msra.mxu0 %v7214_v39 }
 0x78e   :  { %6774 = vmatprep.subr.bf16.mxu1 %v7451_v30  ;;  %6780 = vmatprep.subr.bf16.mxu0 %v7451_v30 }
 0x852   :  { %v2054_v4 = vpop.f32.mrb[28].mxu1  ;;  %v2109_v40 = vpop.f32.mrb[72].mxu0 }
 0x853   :  { %v2055_v41 = vadd.f32 %v2054_v4, %v1957_v9  ;;  %v6754_v42 = vpop.f32.mrb[29].mxu1  ;;  %v6760_v43 = vpop.f32.mrb[73].mxu0 }
 0x854   :  { %v2057_v3 = vpop.f32.mrb[30].mxu1  ;;  %v2112_v61 = vpop.f32.mrb[74].mxu0 }
 0x855   :  { %v2116_v49 = vadd.f32 %v2109_v40, %v2055_v41  ;;  %v2058_v51 = vadd.f32 %v2057_v3, %v1961_v18  ;;  %v6755_v11 = vpop.f32.mrb[31].mxu1  ;;  %v6761_v60 = vpop.f32.mrb[75].mxu0 }
 0x856   :  { %v7215_v11 = vld [vmem:[#allocation2 + $0x120] ss:$12 sps:$4 sm:$0xff]   ;;  %v7218_v60 = vld [vmem:[#allocation2 + $0x128] ss:$12 sps:$4 sm:$0xff]  }
 0x857   :  { %v2117_v53 = vadd.f32 %v2112_v61, %v2058_v51  ;;  %v2118_v50 = vsel %vm259_vm2, %v2116_v49, 0.0  ;;  %v7217_v51 = vld [vmem:[#allocation2 + $0x124] ss:$12 sps:$4 sm:$0xff]  }
 0x859   :  { %v2119_v63 = vsel %vm1767_vm7, %v2117_v53, 0.0 }
 0x85a   :  { %v2120_v54 = vadd.f32 %v2119_v63, %v2118_v50  ;;  %v7219_v50 = vld [vmem:[#allocation2 + $0x138] ss:$12 sps:$4 sm:$0xff]   ;;  %v7222_v63 = vld [vmem:[#allocation2 + $0x140] ss:$12 sps:$4 sm:$0xff]  }
 0x85c   :  { %v2121_v52 = vrot.slane %v2120_v54, 4 }
 0x85e   :  { %v2122_v55 = vadd.f32 %v2121_v52, %v2120_v54  ;;  %v7225_v54 = vld [vmem:[#allocation2 + $0x154] ss:$12 sps:$4 sm:$0xff]   ;;  %v7223_v52 = vld [vmem:[#allocation2 + $0x150] ss:$12 sps:$4 sm:$0xff]  }
 0x860   :  { %v2123_v47 = vrot.slane %v2122_v55, 2 }
 0x862   :  { %v2124_v44 = vadd.f32 %v2123_v47, %v2122_v55  ;;  %v7226_v55 = vld [vmem:[#allocation2 + $0x158] ss:$12 sps:$4 sm:$0xff]  }
 0x863   :  { %v7229_v47 = vld [vmem:[#allocation2 + $0x16c] ss:$12 sps:$4 sm:$0xff]  }
 0x864   :  { %v2125_v45 = vrot.slane %v2124_v44, 1 }
 0x866   :  { %v2126_v46 = vadd.f32 %v2125_v45, %v2124_v44  ;;  %v7227_v44 = vld [vmem:[#allocation2 + $0x168] ss:$12 sps:$4 sm:$0xff]   ;;  %v7230_v45 = vld [vmem:[#allocation2 + $0x170] ss:$12 sps:$4 sm:$0xff]  }
 0x868   :  { %v2128_v5 = vmul.f32 0.083333336, %v2126_v46 }
 0x86a   :  { %v2129_v56 = vsub.f32 %v2116_v49, %v2128_v5  ;;  %v2130_v59 = vsub.f32 %v2117_v53, %v2128_v5  ;;  %v7221_v53 = vld [vmem:[#allocation2 + $0x13c] ss:$12 sps:$4 sm:$0xff]  }
 0x86c   :  { %v2131_v27 = vmul.f32 %v2129_v56, %v2129_v56  ;;  %v2132_v34 = vmul.f32 %v2130_v59, %v2130_v59 }
 0x86e   :  { %v2133_v24 = vsel %vm259_vm2, %v2131_v27, 0.0  ;;  %v2134_v29 = vsel %vm1767_vm7, %v2132_v34, 0.0 }
 0x86f   :  { %v2135_v62 = vadd.f32 %v2134_v29, %v2133_v24 }
 0x871   :  { %v2136_v6 = vrot.slane %v2135_v62, 4 }
 0x873   :  { %v2137_v8 = vadd.f32 %v2136_v6, %v2135_v62 }
 0x875   :  { %v2138_v9 = vrot.slane %v2137_v8, 2 }
 0x877   :  { %v2139_v10 = vadd.f32 %v2138_v9, %v2137_v8 }
 0x879   :  { %v2140_v13 = vrot.slane %v2139_v10, 1 }
 0x87b   :  { %v2141_v57 = vadd.f32 %v2140_v13, %v2139_v10 }
 0x87d   :  { %v2142_v15 = vmul.f32 0.083333336, %v2141_v57 }
 0x87f   :  { %v2143_v16 = vadd.f32 1e-05, %v2142_v15 }
 0x881   :  { %7389 = vrsqrt.f32 %v2143_v16 }
 0x88b   :  { %v7390_v18 = vpop.eup %7389 }
 0x88c   :  { %v2145_v19 = vmul.f32 %v7390_v18, %v2129_v56  ;;  %v2146_v20 = vmul.f32 %v7390_v18, %v2130_v59 }
 0x88e   :  { %v2152_v25 = vmul.f32 %v6177_v14, %v2145_v19  ;;  %v2153_v26 = vmul.f32 %v6177_v14, %v2146_v20 }
 0x890   :  { %v2159_v28 = vadd.f32 %v6178_v23, %v2152_v25  ;;  %v2160_v32 = vadd.f32 %v6178_v23, %v2153_v26 }
 0x892   :  { %v2161_v33 = vmax.f32 %v2159_v28, 0.0  ;;  %v2162_v35 = vmax.f32 %v2160_v32, 0.0 }
 0x894   :  { %v2163_v37 = vpack.c.bf16 %v2162_v35, %v2161_v33 }
 0x896   :  { %6191 = vmatmul.mubr.msk.bf16.vlgmr.msra.gmra.mrb[32].mxu1 %vm259_vm2, %v2163_v37  ;;  %6771 = vmatmul.mubr.msk.bf16.vlgmr.msra.gmra.mrb[76].mxu0 %vm259_vm2, %v2163_v37 }
 0x897   :  { %6776 = vmatprep.mubr.msk.bf16.mxu1 %vm7452_vm15, %v7451_v30  ;;  %6782 = vmatprep.mubr.msk.bf16.mxu0 %vm7452_vm15, %v7451_v30 }
 0x969   :  { %v2281_v31 = vpop.f32.mrb[32].mxu1  ;;  %v2324_v38 = vpop.f32.mrb[76].mxu0 }
 0x96a   :  { %v2283_v36 = vpop.f32.mrb[33].mxu1  ;;  %v6772_v39 = vpop.f32.mrb[77].mxu0 }
 0x96b   :  { %v2285_v4 = vpop.f32.mrb[34].mxu1  ;;  %v2327_v40 = vpop.f32.mrb[78].mxu0 }
 0x96c   :  { %v2331_v41 = vpack.c.bf16 %v2285_v4, %v2281_v31  ;;  %v2376_v42 = vpack.c.bf16 %v2327_v40, %v2324_v38  ;;  %v2287_v43 = vpop.f32.mrb[35].mxu1  ;;  %v6773_v3 = vpop.f32.mrb[79].mxu0 }
 0x96d   :  { %v6195_v3 = vld [vmem:[%s8557_s3 + $0x28] ss:$0 sm:$0xff] }
 0x96e   :  { %v2333_v61 = vsel %vm1062_vm9, %v2331_v41, 0  ;;  %v2378_v49 = vsel %vm1062_vm9, %v2376_v42, 0 }
 0x96f   :  { %6775 = vmatpush3.bf16.msra.mxu1 %v2333_v61  ;;  %6781 = vmatpush3.bf16.msra.mxu0 %v2378_v49 }
 0x970   :  { %6786 = vmatprep.subr.bf16.mxu0 %v7451_v30  ;;  %2551 = vmatprep.subr.bf16.mxu1 %v7217_v51  ;;  %v6196_v51 = vld [vmem:[%s8557_s3 + $0x30] ss:$0 sm:$0xff] }
 0x972   :  { %6777 = vmatmul.mubr.msk.bf16.vlgmr.msra.gmra.mrb[36].mxu1 %vm2013_vm8, %v7912_v21  ;;  %6783 = vmatmul.mubr.msk.bf16.vlgmr.msra.gmra.mrb[80].mxu0 %vm2013_vm8, %v7917_v22 }
 0x973   :  { %2583 = vmatprep.mubr.bf16.mxu1 %v7450_v0  ;;  %6794 = vmatprep.mubr.msk.bf16.mxu0 %vm7452_vm15, %v7451_v30 }
 0x974   :  { %2552 = vmatpush1.bf16.msra.mxu1 %v7215_v11  ;;  %6787 = vmatpush3.bf16.msra.mxu0 %v7218_v60 }
 0x975   :  { %6788 = vmatprep.subr.bf16.mxu0 %v7451_v30  ;;  %2553 = vmatprep.subr.bf16.mxu1 %v7221_v53 }
 0x978   :  { %2554 = vmatpush1.bf16.msra.mxu1 %v7219_v50  ;;  %6789 = vmatpush3.bf16.msra.mxu0 %v7222_v63 }
 0x979   :  { %6790 = vmatprep.subr.bf16.mxu0 %v7451_v30  ;;  %2555 = vmatprep.subr.bf16.mxu1 %v7225_v54 }
 0x97c   :  { %2556 = vmatpush1.bf16.msra.mxu1 %v7223_v52  ;;  %6791 = vmatpush3.bf16.msra.mxu0 %v7226_v55 }
 0x97d   :  { %6792 = vmatprep.subr.bf16.mxu0 %v7451_v30  ;;  %2557 = vmatprep.subr.bf16.mxu1 %v7229_v47 }
 0x980   :  { %2558 = vmatpush1.bf16.msra.mxu1 %v7227_v44  ;;  %6793 = vmatpush3.bf16.msra.mxu0 %v7230_v45 }
 0x981   :  { %6798 = vmatprep.subr.bf16.mxu1 %v7451_v30  ;;  %6804 = vmatprep.subr.bf16.mxu0 %v7451_v30 }
 0xa45   :  { %v2369_v46 = vpop.f32.mrb[36].mxu1  ;;  %v2414_v5 = vpop.f32.mrb[80].mxu0 }
 0xa46   :  { %v2370_v56 = vadd.f32 %v2369_v46, %v2283_v36  ;;  %v6778_v59 = vpop.f32.mrb[37].mxu1  ;;  %v6784_v27 = vpop.f32.mrb[81].mxu0 }
 0xa47   :  { %v2372_v34 = vpop.f32.mrb[38].mxu1  ;;  %v2417_v24 = vpop.f32.mrb[82].mxu0  ;;  %v7233_v27 = vld [vmem:[#allocation2 + $0x184] ss:$12 sps:$4 sm:$0xff]  }
 0xa48   :  { %v2421_v29 = vadd.f32 %v2414_v5, %v2370_v56  ;;  %v2373_v62 = vadd.f32 %v2372_v34, %v2287_v43  ;;  %v6779_v6 = vpop.f32.mrb[39].mxu1  ;;  %v6785_v8 = vpop.f32.mrb[83].mxu0  ;;  %v7231_v34 = vld [vmem:[#allocation2 + $0x180] ss:$12 sps:$4 sm:$0xff]  }
 0xa49   :  { %v7238_v6 = vld [vmem:[#allocation2 + $0x1a0] ss:$12 sps:$4 sm:$0xff]  }
 0xa4a   :  { %v2422_v9 = vadd.f32 %v2417_v24, %v2373_v62  ;;  %v2423_v10 = vsel %vm259_vm2, %v2421_v29, 0.0  ;;  %v7234_v24 = vld [vmem:[#allocation2 + $0x188] ss:$12 sps:$4 sm:$0xff]   ;;  %v7235_v62 = vld [vmem:[#allocation2 + $0x198] ss:$12 sps:$4 sm:$0xff]  }
 0xa4b   :  { %v7241_v8 = vld [vmem:[#allocation2 + $0x1b4] ss:$12 sps:$4 sm:$0xff]  }
 0xa4c   :  { %v2424_v13 = vsel %vm1767_vm7, %v2422_v9, 0.0 }
 0xa4d   :  { %v2425_v57 = vadd.f32 %v2424_v13, %v2423_v10  ;;  %v7242_v10 = vld [vmem:[#allocation2 + $0x1b8] ss:$12 sps:$4 sm:$0xff]  }
 0xa4e   :  { %v7245_v13 = vld [vmem:[#allocation2 + $0x1cc] ss:$12 sps:$4 sm:$0xff]  }
 0xa4f   :  { %v2426_v15 = vrot.slane %v2425_v57, 4 }
 0xa51   :  { %v2427_v16 = vadd.f32 %v2426_v15, %v2425_v57  ;;  %v7243_v57 = vld [vmem:[#allocation2 + $0x1c8] ss:$12 sps:$4 sm:$0xff]   ;;  %v7246_v15 = vld [vmem:[#allocation2 + $0x1d0] ss:$12 sps:$4 sm:$0xff]  }
 0xa53   :  { %v2428_v18 = vrot.slane %v2427_v16, 2 }
 0xa55   :  { %v2429_v14 = vadd.f32 %v2428_v18, %v2427_v16 }
 0xa57   :  { %v2430_v19 = vrot.slane %v2429_v14, 1 }
 0xa59   :  { %v2431_v20 = vadd.f32 %v2430_v19, %v2429_v14 }
 0xa5b   :  { %v2432_v23 = vmul.f32 0.083333336, %v2431_v20 }
 0xa5d   :  { %v2433_v25 = vsub.f32 %v2421_v29, %v2432_v23  ;;  %v2434_v26 = vsub.f32 %v2422_v9, %v2432_v23  ;;  %v7237_v29 = vld [vmem:[#allocation2 + $0x19c] ss:$12 sps:$4 sm:$0xff]  }
 0xa5e   :  { %v7239_v9 = vld [vmem:[#allocation2 + $0x1b0] ss:$12 sps:$4 sm:$0xff]  }
 0xa5f   :  { %v2435_v28 = vmul.f32 %v2433_v25, %v2433_v25  ;;  %v2436_v32 = vmul.f32 %v2434_v26, %v2434_v26 }
 0xa61   :  { %v2437_v33 = vsel %vm259_vm2, %v2435_v28, 0.0  ;;  %v2438_v35 = vsel %vm1767_vm7, %v2436_v32, 0.0 }
 0xa62   :  { %v2439_v37 = vadd.f32 %v2438_v35, %v2437_v33 }
 0xa64   :  { %v2440_v31 = vrot.slane %v2439_v37, 4 }
 0xa66   :  { %v2441_v38 = vadd.f32 %v2440_v31, %v2439_v37 }
 0xa68   :  { %v2442_v36 = vrot.slane %v2441_v38, 2 }
 0xa6a   :  { %v2443_v39 = vadd.f32 %v2442_v36, %v2441_v38 }
 0xa6c   :  { %v2444_v4 = vrot.slane %v2443_v39, 1 }
 0xa6e   :  { %v2445_v40 = vadd.f32 %v2444_v4, %v2443_v39 }
 0xa70   :  { %v2446_v41 = vmul.f32 0.083333336, %v2445_v40 }
 0xa72   :  { %v2447_v42 = vadd.f32 1e-05, %v2446_v41 }
 0xa74   :  { %7391 = vrsqrt.f32 %v2447_v42 }
 0xa7e   :  { %v7392_v43 = vpop.eup %7391 }
 0xa7f   :  { %v2449_v61 = vmul.f32 %v7392_v43, %v2433_v25  ;;  %v2450_v49 = vmul.f32 %v7392_v43, %v2434_v26 }
 0xa81   :  { %v2456_v11 = vmul.f32 %v6195_v3, %v2449_v61  ;;  %v2457_v60 = vmul.f32 %v6195_v3, %v2450_v49 }
 0xa83   :  { %v2463_v53 = vadd.f32 %v6196_v51, %v2456_v11  ;;  %v2464_v50 = vadd.f32 %v6196_v51, %v2457_v60 }
 0xa85   :  { %v7975_v63 = vadd.f32 %v2463_v53, %v1835_v2  ;;  %v7979_v54 = vadd.f32 %v2464_v50, %v1836_v7 }
 0xa87   :  { %v2467_v52 = vpack.c.bf16 %v7979_v54, %v7975_v63 }
 0xa89   :  { %6209 = vmatmul.mubr.msk.bf16.vlgmr.msra.gmra.mrb[40].mxu1 %vm259_vm2, %v2467_v52  ;;  %6795 = vmatmul.mubr.msk.bf16.vlgmr.msra.gmra.mrb[84].mxu0 %vm259_vm2, %v2467_v52 }
 0xa8a   :  { %6800 = vmatprep.mubr.msk.bf16.mxu1 %vm7452_vm15, %v7451_v30  ;;  %6806 = vmatprep.mubr.msk.bf16.mxu0 %vm7452_vm15, %v7451_v30 }
 0xb5c   :  { %v2585_v58 = vpop.f32.mrb[40].mxu1  ;;  %v2628_v2 = vpop.f32.mrb[84].mxu0 }
 0xb5d   :  { %v2587_v55 = vpop.f32.mrb[41].mxu1  ;;  %v6796_v47 = vpop.f32.mrb[85].mxu0 }
 0xb5e   :  { %v2589_v1 = vpop.f32.mrb[42].mxu1  ;;  %v2631_v7 = vpop.f32.mrb[86].mxu0 }
 0xb5f   :  { %v2635_v44 = vpack.c.bf16 %v2589_v1, %v2585_v58  ;;  %v2680_v45 = vpack.c.bf16 %v2631_v7, %v2628_v2  ;;  %v2591_v46 = vpop.f32.mrb[43].mxu1  ;;  %v6797_v5 = vpop.f32.mrb[87].mxu0 }
 0xb61   :  { %v2637_v56 = vsel %vm1062_vm9, %v2635_v44, 0  ;;  %v2682_v59 = vsel %vm1062_vm9, %v2680_v45, 0  ;;  %v6213_v45 = vld [vmem:[%s8557_s3 + $0x38] ss:$0 sm:$0xff] }
 0xb62   :  { %6799 = vmatpush3.bf16.msra.mxu1 %v2637_v56  ;;  %6805 = vmatpush3.bf16.msra.mxu0 %v2682_v59  ;;  %v6214_v56 = vld [vmem:[%s8557_s3 + $0x40] ss:$0 sm:$0xff] }
 0xb63   :  { %6810 = vmatprep.subr.bf16.mxu0 %v7451_v30  ;;  %2855 = vmatprep.subr.bf16.mxu1 %v7233_v27 }
 0xb65   :  { %6801 = vmatmul.mubr.msk.bf16.vlgmr.msra.gmra.mrb[44].mxu1 %vm2013_vm8, %v7912_v21  ;;  %6807 = vmatmul.mubr.msk.bf16.vlgmr.msra.gmra.mrb[88].mxu0 %vm2013_vm8, %v7917_v22 }
 0xb66   :  { %2887 = vmatprep.mubr.bf16.mxu1 %v7450_v0  ;;  %6818 = vmatprep.mubr.msk.bf16.mxu0 %vm7452_vm15, %v7451_v30 }
 0xb67   :  { %2856 = vmatpush1.bf16.msra.mxu1 %v7231_v34  ;;  %6811 = vmatpush3.bf16.msra.mxu0 %v7234_v24 }
 0xb68   :  { %6812 = vmatprep.subr.bf16.mxu0 %v7451_v30  ;;  %2857 = vmatprep.subr.bf16.mxu1 %v7237_v29 }
 0xb6b   :  { %2858 = vmatpush1.bf16.msra.mxu1 %v7235_v62  ;;  %6813 = vmatpush3.bf16.msra.mxu0 %v7238_v6 }
 0xb6c   :  { %6814 = vmatprep.subr.bf16.mxu0 %v7451_v30  ;;  %2859 = vmatprep.subr.bf16.mxu1 %v7241_v8 }
 0xb6f   :  { %2860 = vmatpush1.bf16.msra.mxu1 %v7239_v9  ;;  %6815 = vmatpush3.bf16.msra.mxu0 %v7242_v10 }
 0xb70   :  { %6816 = vmatprep.subr.bf16.mxu0 %v7451_v30  ;;  %2861 = vmatprep.subr.bf16.mxu1 %v7245_v13 }
 0xb73   :  { %2862 = vmatpush1.bf16.msra.mxu1 %v7243_v57  ;;  %6817 = vmatpush3.bf16.msra.mxu0 %v7246_v15 }
 0xb74   :  { %6822 = vmatprep.subr.bf16.mxu1 %v7451_v30  ;;  %6828 = vmatprep.subr.bf16.mxu0 %v7451_v30 }
 0xc38   :  { %v2673_v16 = vpop.f32.mrb[44].mxu1  ;;  %v2718_v18 = vpop.f32.mrb[88].mxu0 }
 0xc39   :  { %v2674_v14 = vadd.f32 %v2673_v16, %v2587_v55  ;;  %v6802_v19 = vpop.f32.mrb[45].mxu1  ;;  %v6808_v20 = vpop.f32.mrb[89].mxu0 }
 0xc3a   :  { %v2676_v23 = vpop.f32.mrb[46].mxu1  ;;  %v2721_v25 = vpop.f32.mrb[90].mxu0 }
 0xc3b   :  { %v2725_v26 = vadd.f32 %v2718_v18, %v2674_v14  ;;  %v2677_v28 = vadd.f32 %v2676_v23, %v2591_v46  ;;  %v6803_v32 = vpop.f32.mrb[47].mxu1  ;;  %v6809_v33 = vpop.f32.mrb[91].mxu0 }
 0xc3c   :  { %v7253_v32 = vld [vmem:[#allocation2 + $0x1fc] ss:$12 sps:$4 sm:$0xff]   ;;  %v7251_v33 = vld [vmem:[#allocation2 + $0x1f8] ss:$12 sps:$4 sm:$0xff]  }
 0xc3d   :  { %v2726_v35 = vadd.f32 %v2721_v25, %v2677_v28  ;;  %v2727_v37 = vsel %vm259_vm2, %v2725_v26, 0.0  ;;  %v7249_v25 = vld [vmem:[#allocation2 + $0x1e4] ss:$12 sps:$4 sm:$0xff]   ;;  %v7250_v28 = vld [vmem:[#allocation2 + $0x1e8] ss:$12 sps:$4 sm:$0xff]  }
 0xc3f   :  { %v2728_v31 = vsel %vm1767_vm7, %v2726_v35, 0.0 }
 0xc40   :  { %v2729_v38 = vadd.f32 %v2728_v31, %v2727_v37  ;;  %v7257_v37 = vld [vmem:[#allocation2 + $0x214] ss:$12 sps:$4 sm:$0xff]   ;;  %v7255_v31 = vld [vmem:[#allocation2 + $0x210] ss:$12 sps:$4 sm:$0xff]  }
 0xc42   :  { %v2730_v36 = vrot.slane %v2729_v38, 4 }
 0xc44   :  { %v2731_v39 = vadd.f32 %v2730_v36, %v2729_v38  ;;  %v7258_v38 = vld [vmem:[#allocation2 + $0x218] ss:$12 sps:$4 sm:$0xff]  }
 0xc45   :  { %v7261_v36 = vld [vmem:[#allocation2 + $0x22c] ss:$12 sps:$4 sm:$0xff]  }
 0xc46   :  { %v2732_v4 = vrot.slane %v2731_v39, 2 }
 0xc48   :  { %v2733_v40 = vadd.f32 %v2732_v4, %v2731_v39  ;;  %v7259_v39 = vld [vmem:[#allocation2 + $0x228] ss:$12 sps:$4 sm:$0xff]   ;;  %v7262_v4 = vld [vmem:[#allocation2 + $0x230] ss:$12 sps:$4 sm:$0xff]  }
 0xc4a   :  { %v2734_v41 = vrot.slane %v2733_v40, 1 }
 0xc4c   :  { %v2735_v42 = vadd.f32 %v2734_v41, %v2733_v40 }
 0xc4e   :  { %v2736_v43 = vmul.f32 0.083333336, %v2735_v42 }
 0xc50   :  { %v2737_v3 = vsub.f32 %v2725_v26, %v2736_v43  ;;  %v2738_v61 = vsub.f32 %v2726_v35, %v2736_v43  ;;  %v7247_v26 = vld [vmem:[#allocation2 + $0x1e0] ss:$12 sps:$4 sm:$0xff]  }
 0xc51   :  { %v7254_v35 = vld [vmem:[#allocation2 + $0x200] ss:$12 sps:$4 sm:$0xff]  }
 0xc52   :  { %v2739_v49 = vmul.f32 %v2737_v3, %v2737_v3  ;;  %v2740_v51 = vmul.f32 %v2738_v61, %v2738_v61 }
 0xc54   :  { %v2741_v11 = vsel %vm259_vm2, %v2739_v49, 0.0  ;;  %v2742_v60 = vsel %vm1767_vm7, %v2740_v51, 0.0 }
 0xc55   :  { %v2743_v53 = vadd.f32 %v2742_v60, %v2741_v11 }
 0xc57   :  { %v2744_v50 = vrot.slane %v2743_v53, 4 }
 0xc59   :  { %v2745_v52 = vadd.f32 %v2744_v50, %v2743_v53 }
 0xc5b   :  { %v2746_v58 = vrot.slane %v2745_v52, 2 }
 0xc5d   :  { %v2747_v2 = vadd.f32 %v2746_v58, %v2745_v52 }
 0xc5f   :  { %v2748_v55 = vrot.slane %v2747_v2, 1 }
 0xc61   :  { %v2749_v47 = vadd.f32 %v2748_v55, %v2747_v2 }
 0xc63   :  { %v2750_v1 = vmul.f32 0.083333336, %v2749_v47 }
 0xc65   :  { %v2751_v7 = vadd.f32 1e-05, %v2750_v1 }
 0xc67   :  { %7393 = vrsqrt.f32 %v2751_v7 }
 0xc71   :  { %v7394_v44 = vpop.eup %7393 }
 0xc72   :  { %v2753_v46 = vmul.f32 %v7394_v44, %v2737_v3  ;;  %v2754_v5 = vmul.f32 %v7394_v44, %v2738_v61 }
 0xc74   :  { %v2760_v59 = vmul.f32 %v6213_v45, %v2753_v46  ;;  %v2761_v27 = vmul.f32 %v6213_v45, %v2754_v5 }
 0xc76   :  { %v2767_v34 = vadd.f32 %v6214_v56, %v2760_v59  ;;  %v2768_v24 = vadd.f32 %v6214_v56, %v2761_v27 }
 0xc78   :  { %v2769_v29 = vmax.f32 %v2767_v34, 0.0  ;;  %v2770_v62 = vmax.f32 %v2768_v24, 0.0 }
 0xc7a   :  { %v2771_v6 = vpack.c.bf16 %v2770_v62, %v2769_v29 }
 0xc7c   :  { %6227 = vmatmul.mubr.msk.bf16.vlgmr.msra.gmra.mrb[48].mxu1 %vm259_vm2, %v2771_v6  ;;  %6819 = vmatmul.mubr.msk.bf16.vlgmr.msra.gmra.mrb[92].mxu0 %vm259_vm2, %v2771_v6 }
 0xc7d   :  { %6824 = vmatprep.mubr.msk.bf16.mxu1 %vm7452_vm15, %v7451_v30  ;;  %6830 = vmatprep.mubr.msk.bf16.mxu0 %vm7452_vm15, %v7451_v30 }
 0xd4f   :  { %v2889_v8 = vpop.f32.mrb[48].mxu1  ;;  %v2932_v9 = vpop.f32.mrb[92].mxu0 }
 0xd50   :  { %v2891_v10 = vpop.f32.mrb[49].mxu1  ;;  %v6820_v13 = vpop.f32.mrb[93].mxu0 }
 0xd51   :  { %v2893_v57 = vpop.f32.mrb[50].mxu1  ;;  %v2935_v15 = vpop.f32.mrb[94].mxu0 }
 0xd52   :  { %v2939_v16 = vpack.c.bf16 %v2893_v57, %v2889_v8  ;;  %v2984_v18 = vpack.c.bf16 %v2935_v15, %v2932_v9  ;;  %v2895_v14 = vpop.f32.mrb[51].mxu1  ;;  %v6821_v19 = vpop.f32.mrb[95].mxu0 }
 0xd54   :  { %v2941_v20 = vsel %vm1062_vm9, %v2939_v16, 0  ;;  %v2986_v23 = vsel %vm1062_vm9, %v2984_v18, 0  ;;  %v6231_v18 = vld [vmem:[%s8557_s3 + $0x48] ss:$0 sm:$0xff] }
 0xd55   :  { %6823 = vmatpush3.bf16.msra.mxu1 %v2941_v20  ;;  %6829 = vmatpush3.bf16.msra.mxu0 %v2986_v23  ;;  %v6232_v20 = vld [vmem:[%s8557_s3 + $0x50] ss:$0 sm:$0xff] }
 0xd56   :  { %6834 = vmatprep.subr.bf16.mxu0 %v7451_v30  ;;  %3159 = vmatprep.subr.bf16.mxu1 %v7249_v25 }
 0xd58   :  { %6825 = vmatmul.mubr.msk.bf16.vlgmr.msra.gmra.mrb[52].mxu1 %vm2013_vm8, %v7912_v21  ;;  %6831 = vmatmul.mubr.msk.bf16.vlgmr.msra.gmra.mrb[96].mxu0 %vm2013_vm8, %v7917_v22 }
 0xd59   :  { %3191 = vmatprep.mubr.bf16.mxu1 %v7450_v0  ;;  %6842 = vmatprep.mubr.msk.bf16.mxu0 %vm7452_vm15, %v7451_v30 }
 0xd5a   :  { %3160 = vmatpush1.bf16.msra.mxu1 %v7247_v26  ;;  %6835 = vmatpush3.bf16.msra.mxu0 %v7250_v28 }
 0xd5b   :  { %6836 = vmatprep.subr.bf16.mxu0 %v7451_v30  ;;  %3161 = vmatprep.subr.bf16.mxu1 %v7253_v32 }
 0xd5e   :  { %3162 = vmatpush1.bf16.msra.mxu1 %v7251_v33  ;;  %6837 = vmatpush3.bf16.msra.mxu0 %v7254_v35 }
 0xd5f   :  { %6838 = vmatprep.subr.bf16.mxu0 %v7451_v30  ;;  %3163 = vmatprep.subr.bf16.mxu1 %v7257_v37 }
 0xd62   :  { %3164 = vmatpush1.bf16.msra.mxu1 %v7255_v31  ;;  %6839 = vmatpush3.bf16.msra.mxu0 %v7258_v38 }
 0xd63   :  { %6840 = vmatprep.subr.bf16.mxu0 %v7451_v30  ;;  %3165 = vmatprep.subr.bf16.mxu1 %v7261_v36 }
 0xd66   :  { %3166 = vmatpush1.bf16.msra.mxu1 %v7259_v39  ;;  %6841 = vmatpush3.bf16.msra.mxu0 %v7262_v4 }
 0xd67   :  { %6846 = vmatprep.subr.bf16.mxu1 %v7451_v30  ;;  %6852 = vmatprep.subr.bf16.mxu0 %v7451_v30 }
 0xe2b   :  { %v2977_v40 = vpop.f32.mrb[52].mxu1  ;;  %v3022_v41 = vpop.f32.mrb[96].mxu0 }
 0xe2c   :  { %v2978_v42 = vadd.f32 %v2977_v40, %v2891_v10  ;;  %v6826_v43 = vpop.f32.mrb[53].mxu1  ;;  %v6832_v3 = vpop.f32.mrb[97].mxu0 }
 0xe2d   :  { %v2980_v61 = vpop.f32.mrb[54].mxu1  ;;  %v3025_v49 = vpop.f32.mrb[98].mxu0  ;;  %v7265_v3 = vld [vmem:[#allocation2 + $0x244] ss:$12 sps:$4 sm:$0xff]  }
 0xe2e   :  { %v3029_v51 = vadd.f32 %v3022_v41, %v2978_v42  ;;  %v2981_v11 = vadd.f32 %v2980_v61, %v2895_v14  ;;  %v6827_v60 = vpop.f32.mrb[55].mxu1  ;;  %v6833_v53 = vpop.f32.mrb[99].mxu0  ;;  %v7263_v61 = vld [vmem:[#allocation2 + $0x240] ss:$12 sps:$4 sm:$0xff]  }
 0xe2f   :  { %v7270_v60 = vld [vmem:[#allocation2 + $0x260] ss:$12 sps:$4 sm:$0xff]   ;;  %v7274_v53 = vld [vmem:[#allocation2 + $0x278] ss:$12 sps:$4 sm:$0xff]  }
 0xe30   :  { %v3030_v50 = vadd.f32 %v3025_v49, %v2981_v11  ;;  %v3031_v52 = vsel %vm259_vm2, %v3029_v51, 0.0  ;;  %v7266_v49 = vld [vmem:[#allocation2 + $0x248] ss:$12 sps:$4 sm:$0xff]   ;;  %v7267_v11 = vld [vmem:[#allocation2 + $0x258] ss:$12 sps:$4 sm:$0xff]  }
 0xe32   :  { %v3032_v58 = vsel %vm1767_vm7, %v3030_v50, 0.0 }
 0xe33   :  { %v3033_v2 = vadd.f32 %v3032_v58, %v3031_v52  ;;  %v7275_v52 = vld [vmem:[#allocation2 + $0x288] ss:$12 sps:$4 sm:$0xff]   ;;  %v7278_v58 = vld [vmem:[#allocation2 + $0x290] ss:$12 sps:$4 sm:$0xff]  }
 0xe35   :  { %v3034_v55 = vrot.slane %v3033_v2, 4 }
 0xe37   :  { %v3035_v47 = vadd.f32 %v3034_v55, %v3033_v2 }
 0xe39   :  { %v3036_v1 = vrot.slane %v3035_v47, 2 }
 0xe3b   :  { %v3037_v7 = vadd.f32 %v3036_v1, %v3035_v47 }
 0xe3d   :  { %v3038_v44 = vrot.slane %v3037_v7, 1 }
 0xe3f   :  { %v3039_v45 = vadd.f32 %v3038_v44, %v3037_v7 }
 0xe41   :  { %v3040_v46 = vmul.f32 0.083333336, %v3039_v45 }
 0xe43   :  { %v3041_v5 = vsub.f32 %v3029_v51, %v3040_v46  ;;  %v3042_v56 = vsub.f32 %v3030_v50, %v3040_v46  ;;  %v7269_v51 = vld [vmem:[#allocation2 + $0x25c] ss:$12 sps:$4 sm:$0xff]   ;;  %v7277_v50 = vld [vmem:[#allocation2 + $0x28c] ss:$12 sps:$4 sm:$0xff]  }
 0xe45   :  { %v3043_v59 = vmul.f32 %v3041_v5, %v3041_v5  ;;  %v3044_v27 = vmul.f32 %v3042_v56, %v3042_v56 }
 0xe47   :  { %v3045_v34 = vsel %vm259_vm2, %v3043_v59, 0.0  ;;  %v3046_v24 = vsel %vm1767_vm7, %v3044_v27, 0.0 }
 0xe48   :  { %v3047_v29 = vadd.f32 %v3046_v24, %v3045_v34 }
 0xe4a   :  { %v3048_v62 = vrot.slane %v3047_v29, 4 }
 0xe4c   :  { %v3049_v6 = vadd.f32 %v3048_v62, %v3047_v29 }
 0xe4e   :  { %v3050_v8 = vrot.slane %v3049_v6, 2 }
 0xe50   :  { %v3051_v9 = vadd.f32 %v3050_v8, %v3049_v6 }
 0xe52   :  { %v3052_v10 = vrot.slane %v3051_v9, 1 }
 0xe54   :  { %v3053_v13 = vadd.f32 %v3052_v10, %v3051_v9 }
 0xe56   :  { %v3054_v57 = vmul.f32 0.083333336, %v3053_v13 }
 0xe58   :  { %v3055_v15 = vadd.f32 1e-05, %v3054_v57 }
 0xe5a   :  { %7395 = vrsqrt.f32 %v3055_v15 }
 0xe64   :  { %v7396_v16 = vpop.eup %7395 }
 0xe65   :  { %v3057_v14 = vmul.f32 %v7396_v16, %v3041_v5  ;;  %v3058_v19 = vmul.f32 %v7396_v16, %v3042_v56 }
 0xe67   :  { %v3064_v23 = vmul.f32 %v6231_v18, %v3057_v14  ;;  %v3065_v25 = vmul.f32 %v6231_v18, %v3058_v19 }
 0xe69   :  { %v3071_v26 = vadd.f32 %v6232_v20, %v3064_v23  ;;  %v3072_v28 = vadd.f32 %v6232_v20, %v3065_v25 }
 0xe6b   :  { %v8046_v32 = vadd.f32 %v3071_v26, %v7975_v63  ;;  %v8049_v33 = vadd.f32 %v3072_v28, %v7979_v54 }
 0xe6d   :  { %v3075_v35 = vpack.c.bf16 %v8049_v33, %v8046_v32 }
 0xe6f   :  { %6245 = vmatmul.mubr.msk.bf16.vlgmr.msra.gmra.mrb[56].mxu1 %vm259_vm2, %v3075_v35  ;;  %6843 = vmatmul.mubr.msk.bf16.vlgmr.msra.gmra.mrb[100].mxu0 %vm259_vm2, %v3075_v35 }
 0xe70   :  { %6848 = vmatprep.mubr.msk.bf16.mxu1 %vm7452_vm15, %v7451_v30  ;;  %6854 = vmatprep.mubr.msk.bf16.mxu0 %vm7452_vm15, %v7451_v30 }
 0xf42   :  { %v3193_v37 = vpop.f32.mrb[56].mxu1  ;;  %v3236_v31 = vpop.f32.mrb[100].mxu0 }
 0xf43   :  { %v3195_v63 = vpop.f32.mrb[57].mxu1  ;;  %v6844_v38 = vpop.f32.mrb[101].mxu0 }
 0xf44   :  { %v3197_v36 = vpop.f32.mrb[58].mxu1  ;;  %v3239_v54 = vpop.f32.mrb[102].mxu0 }
 0xf45   :  { %v3243_v39 = vpack.c.bf16 %v3197_v36, %v3193_v37  ;;  %v3288_v4 = vpack.c.bf16 %v3239_v54, %v3236_v31  ;;  %v3199_v40 = vpop.f32.mrb[59].mxu1  ;;  %v6845_v41 = vpop.f32.mrb[103].mxu0  ;;  %v6249_v54 = vld [vmem:[%s8557_s3 + $0x58] ss:$0 sm:$0xff] }
 0xf47   :  { %v3245_v42 = vsel %vm1062_vm9, %v3243_v39, 0  ;;  %v3290_v43 = vsel %vm1062_vm9, %v3288_v4, 0 }
 0xf48   :  { %6847 = vmatpush3.bf16.msra.mxu1 %v3245_v42  ;;  %6853 = vmatpush3.bf16.msra.mxu0 %v3290_v43 }
 0xf49   :  { %6858 = vmatprep.subr.bf16.mxu0 %v7451_v30  ;;  %3463 = vmatprep.subr.bf16.mxu1 %v7265_v3 }
 0xf4b   :  { %6849 = vmatmul.mubr.msk.bf16.vlgmr.msra.gmra.mrb[60].mxu1 %vm2013_vm8, %v7912_v21  ;;  %6855 = vmatmul.mubr.msk.bf16.vlgmr.msra.gmra.mrb[104].mxu0 %vm2013_vm8, %v7917_v22  ;;  %v7273_v21 = vld [vmem:[#allocation2 + $0x274] ss:$12 sps:$4 sm:$0xff]   ;;  %v7271_v22 = vld [vmem:[#allocation2 + $0x270] ss:$12 sps:$4 sm:$0xff]  }
 0xf4c   :  { %3495 = vmatprep.mubr.bf16.mxu1 %v7450_v0  ;;  %6866 = vmatprep.mubr.msk.bf16.mxu0 %vm7452_vm15, %v7451_v30 }
 0xf4d   :  { %3464 = vmatpush1.bf16.msra.mxu1 %v7263_v61  ;;  %6859 = vmatpush3.bf16.msra.mxu0 %v7266_v49 }
 0xf4e   :  { %6860 = vmatprep.subr.bf16.mxu0 %v7451_v30  ;;  %3465 = vmatprep.subr.bf16.mxu1 %v7269_v51 }
 0xf51   :  { %3466 = vmatpush1.bf16.msra.mxu1 %v7267_v11  ;;  %6861 = vmatpush3.bf16.msra.mxu0 %v7270_v60 }
 0xf52   :  { %6862 = vmatprep.subr.bf16.mxu0 %v7451_v30  ;;  %3467 = vmatprep.subr.bf16.mxu1 %v7273_v21 }
 0xf55   :  { %3468 = vmatpush1.bf16.msra.mxu1 %v7271_v22  ;;  %6863 = vmatpush3.bf16.msra.mxu0 %v7274_v53 }
 0xf56   :  { %6864 = vmatprep.subr.bf16.mxu0 %v7451_v30  ;;  %3469 = vmatprep.subr.bf16.mxu1 %v7277_v50 }
 0xf59   :  { %3470 = vmatpush1.bf16.msra.mxu1 %v7275_v52  ;;  %6865 = vmatpush3.bf16.msra.mxu0 %v7278_v58 }
 0xf5a   :  { %6870 = vmatprep.subr.bf16.mxu1 %v7451_v30  ;;  %6876 = vmatprep.subr.bf16.mxu0 %v7451_v30 }
0x101e   :  { %v3281_v2 = vpop.f32.mrb[60].mxu1  ;;  %v3326_v55 = vpop.f32.mrb[104].mxu0 }
0x101f   :  { %v3282_v47 = vadd.f32 %v3281_v2, %v3195_v63  ;;  %v6850_v1 = vpop.f32.mrb[61].mxu1  ;;  %v6856_v7 = vpop.f32.mrb[105].mxu0 }
0x1020   :  { %v3284_v44 = vpop.f32.mrb[62].mxu1  ;;  %v3329_v45 = vpop.f32.mrb[106].mxu0  ;;  %v8096_v7 = vld [vmem:[%s8555_s1 + $0x198] sm:$0x3f]  }
0x1021   :  { %v3333_v46 = vadd.f32 %v3326_v55, %v3282_v47  ;;  %v3285_v5 = vadd.f32 %v3284_v44, %v3199_v40  ;;  %v6851_v56 = vpop.f32.mrb[63].mxu1  ;;  %v6857_v59 = vpop.f32.mrb[107].mxu0  ;;  %v6250_v40 = vld [vmem:[%s8557_s3 + $0x60] ss:$0 sm:$0xff] }
0x1022   :  { %v8103_v44 = vld [vmem:[%s8555_s1 + $0x1a0] sm:$0x3f]   ;;  %v7285_v56 = vld [vmem:[#allocation2 + $0x2bc] ss:$12 sps:$4 sm:$0xff]  }
0x1023   :  { %v3334_v27 = vadd.f32 %v3329_v45, %v3285_v5  ;;  %v3335_v34 = vsel %vm259_vm2, %v3333_v46, 0.0  ;;  %v7281_v45 = vld [vmem:[#allocation2 + $0x2a4] ss:$12 sps:$4 sm:$0xff]   ;;  %v7282_v5 = vld [vmem:[#allocation2 + $0x2a8] ss:$12 sps:$4 sm:$0xff]  }
0x1024   :  { %v7283_v59 = vld [vmem:[#allocation2 + $0x2b8] ss:$12 sps:$4 sm:$0xff]  }
0x1025   :  { %v3336_v24 = vsel %vm1767_vm7, %v3334_v27, 0.0 }
0x1026   :  { %v3337_v29 = vadd.f32 %v3336_v24, %v3335_v34  ;;  %v7289_v34 = vld [vmem:[#allocation2 + $0x2d4] ss:$12 sps:$4 sm:$0xff]   ;;  %v7287_v24 = vld [vmem:[#allocation2 + $0x2d0] ss:$12 sps:$4 sm:$0xff]  }
0x1028   :  { %v3338_v62 = vrot.slane %v3337_v29, 4 }
0x102a   :  { %v3339_v6 = vadd.f32 %v3338_v62, %v3337_v29  ;;  %v7290_v29 = vld [vmem:[#allocation2 + $0x2d8] ss:$12 sps:$4 sm:$0xff]  }
0x102b   :  { %v7293_v62 = vld [vmem:[#allocation2 + $0x2ec] ss:$12 sps:$4 sm:$0xff]  }
0x102c   :  { %v3340_v8 = vrot.slane %v3339_v6, 2 }
0x102e   :  { %v3341_v9 = vadd.f32 %v3340_v8, %v3339_v6  ;;  %v7291_v6 = vld [vmem:[#allocation2 + $0x2e8] ss:$12 sps:$4 sm:$0xff]   ;;  %v7294_v8 = vld [vmem:[#allocation2 + $0x2f0] ss:$12 sps:$4 sm:$0xff]  }
0x1030   :  { %v3342_v10 = vrot.slane %v3341_v9, 1 }
0x1032   :  { %v3343_v13 = vadd.f32 %v3342_v10, %v3341_v9 }
0x1034   :  { %v3344_v57 = vmul.f32 0.083333336, %v3343_v13 }
0x1036   :  { %v3345_v15 = vsub.f32 %v3333_v46, %v3344_v57  ;;  %v3346_v16 = vsub.f32 %v3334_v27, %v3344_v57  ;;  %v7279_v46 = vld [vmem:[#allocation2 + $0x2a0] ss:$12 sps:$4 sm:$0xff]  }
0x1037   :  { %v7286_v27 = vld [vmem:[#allocation2 + $0x2c0] ss:$12 sps:$4 sm:$0xff]  }
0x1038   :  { %v3347_v18 = vmul.f32 %v3345_v15, %v3345_v15  ;;  %v3348_v14 = vmul.f32 %v3346_v16, %v3346_v16 }
0x103a   :  { %v3349_v19 = vsel %vm259_vm2, %v3347_v18, 0.0  ;;  %v3350_v20 = vsel %vm1767_vm7, %v3348_v14, 0.0 }
0x103b   :  { %v3351_v23 = vadd.f32 %v3350_v20, %v3349_v19 }
0x103d   :  { %v3352_v25 = vrot.slane %v3351_v23, 4 }
0x103f   :  { %v3353_v26 = vadd.f32 %v3352_v25, %v3351_v23 }
0x1041   :  { %v3354_v28 = vrot.slane %v3353_v26, 2 }
0x1043   :  { %v3355_v35 = vadd.f32 %v3354_v28, %v3353_v26 }
0x1045   :  { %v3356_v37 = vrot.slane %v3355_v35, 1 }
0x1047   :  { %v3357_v31 = vadd.f32 %v3356_v37, %v3355_v35 }
0x1049   :  { %v3358_v63 = vmul.f32 0.083333336, %v3357_v31 }
0x104b   :  { %v3359_v38 = vadd.f32 1e-05, %v3358_v63 }
0x104d   :  { %7397 = vrsqrt.f32 %v3359_v38 }
0x1057   :  { %v7398_v36 = vpop.eup %7397 }
0x1058   :  { %v3361_v39 = vmul.f32 %v7398_v36, %v3345_v15  ;;  %v3362_v4 = vmul.f32 %v7398_v36, %v3346_v16 }
0x105a   :  { %v3368_v41 = vmul.f32 %v6249_v54, %v3361_v39  ;;  %v3369_v42 = vmul.f32 %v6249_v54, %v3362_v4 }
0x105c   :  { %v3375_v43 = vadd.f32 %v6250_v40, %v3368_v41  ;;  %v3376_v3 = vadd.f32 %v6250_v40, %v3369_v42 }
0x105e   :  { %v3377_v61 = vmax.f32 %v3375_v43, 0.0  ;;  %v3378_v49 = vmax.f32 %v3376_v3, 0.0 }
0x1060   :  { %v3379_v51 = vpack.c.bf16 %v3378_v49, %v3377_v61 }
0x1062   :  { %6263 = vmatmul.mubr.msk.bf16.vlgmr.msra.gmra.mrb[64].mxu1 %vm259_vm2, %v3379_v51  ;;  %6867 = vmatmul.mubr.msk.bf16.vlgmr.msra.gmra.mrb[108].mxu0 %vm259_vm2, %v3379_v51 }
0x1063   :  { %6872 = vmatprep.mubr.msk.bf16.mxu1 %vm7452_vm15, %v7451_v30  ;;  %6878 = vmatprep.mubr.msk.bf16.mxu0 %vm7452_vm15, %v7451_v30 }
0x1135   :  { %v3497_v11 = vpop.f32.mrb[64].mxu1  ;;  %v3540_v60 = vpop.f32.mrb[108].mxu0 }
0x1136   :  { %v3499_v21 = vpop.f32.mrb[65].mxu1  ;;  %v6868_v22 = vpop.f32.mrb[109].mxu0 }
0x1137   :  { %v3501_v53 = vpop.f32.mrb[66].mxu1  ;;  %v3543_v50 = vpop.f32.mrb[110].mxu0 }
0x1138   :  { %v3547_v52 = vpack.c.bf16 %v3501_v53, %v3497_v11  ;;  %v3592_v58 = vpack.c.bf16 %v3543_v50, %v3540_v60  ;;  %v3503_v2 = vpop.f32.mrb[67].mxu1  ;;  %v6869_v55 = vpop.f32.mrb[111].mxu0 }
0x113a   :  { %v3549_v47 = vsel %vm1062_vm9, %v3547_v52, 0  ;;  %v3594_v1 = vsel %vm1062_vm9, %v3592_v58, 0  ;;  %v6267_v58 = vld [vmem:[%s8557_s3 + $0x68] ss:$0 sm:$0xff] }
0x113b   :  { %6871 = vmatpush3.bf16.msra.mxu1 %v3549_v47  ;;  %6877 = vmatpush3.bf16.msra.mxu0 %v3594_v1  ;;  %v6268_v47 = vld [vmem:[%s8557_s3 + $0x70] ss:$0 sm:$0xff] }
0x113c   :  { %6882 = vmatprep.subr.bf16.mxu0 %v7451_v30  ;;  %3767 = vmatprep.subr.bf16.mxu1 %v7281_v45 }
0x113e   :  { %6873 = vmatmul.mubr.msk.bf16.vlgmr.msra.gmra.mrb[68].mxu1 %vm2013_vm8, %v8096_v7  ;;  %6879 = vmatmul.mubr.msk.bf16.vlgmr.msra.gmra.mrb[112].mxu0 %vm2013_vm8, %v8103_v44 }
0x113f   :  { %3799 = vmatprep.mubr.bf16.mxu1 %v7450_v0  ;;  %6890 = vmatprep.mubr.msk.bf16.mxu0 %vm7452_vm15, %v7451_v30 }
0x1140   :  { %3768 = vmatpush1.bf16.msra.mxu1 %v7279_v46  ;;  %6883 = vmatpush3.bf16.msra.mxu0 %v7282_v5 }
0x1141   :  { %6884 = vmatprep.subr.bf16.mxu0 %v7451_v30  ;;  %3769 = vmatprep.subr.bf16.mxu1 %v7285_v56 }
0x1144   :  { %3770 = vmatpush1.bf16.msra.mxu1 %v7283_v59  ;;  %6885 = vmatpush3.bf16.msra.mxu0 %v7286_v27 }
0x1145   :  { %6886 = vmatprep.subr.bf16.mxu0 %v7451_v30  ;;  %3771 = vmatprep.subr.bf16.mxu1 %v7289_v34 }
0x1148   :  { %3772 = vmatpush1.bf16.msra.mxu1 %v7287_v24  ;;  %6887 = vmatpush3.bf16.msra.mxu0 %v7290_v29 }
0x1149   :  { %6888 = vmatprep.subr.bf16.mxu0 %v7451_v30  ;;  %3773 = vmatprep.subr.bf16.mxu1 %v7293_v62 }
0x114c   :  { %3774 = vmatpush1.bf16.msra.mxu1 %v7291_v6  ;;  %6889 = vmatpush3.bf16.msra.mxu0 %v7294_v8 }
0x114d   :  { %6894 = vmatprep.subr.bf16.mxu1 %v7451_v30  ;;  %6900 = vmatprep.subr.bf16.mxu0 %v7451_v30 }
0x1211   :  { %v3585_v9 = vpop.f32.mrb[68].mxu1  ;;  %v3630_v10 = vpop.f32.mrb[112].mxu0 }
0x1212   :  { %v3586_v13 = vadd.f32 %v3585_v9, %v3499_v21  ;;  %v6874_v57 = vpop.f32.mrb[69].mxu1  ;;  %v6880_v15 = vpop.f32.mrb[113].mxu0 }
0x1213   :  { %v3588_v16 = vpop.f32.mrb[70].mxu1  ;;  %v3633_v18 = vpop.f32.mrb[114].mxu0  ;;  %v7297_v15 = vld [vmem:[#allocation2 + $0x304] ss:$12 sps:$4 sm:$0xff]  }
0x1214   :  { %v3637_v14 = vadd.f32 %v3630_v10, %v3586_v13  ;;  %v3589_v19 = vadd.f32 %v3588_v16, %v3503_v2  ;;  %v6875_v20 = vpop.f32.mrb[71].mxu1  ;;  %v6881_v23 = vpop.f32.mrb[115].mxu0  ;;  %v7295_v16 = vld [vmem:[#allocation2 + $0x300] ss:$12 sps:$4 sm:$0xff]  }
0x1215   :  { %v7302_v20 = vld [vmem:[#allocation2 + $0x320] ss:$12 sps:$4 sm:$0xff]  }
0x1216   :  { %v3638_v25 = vadd.f32 %v3633_v18, %v3589_v19  ;;  %v3639_v26 = vsel %vm259_vm2, %v3637_v14, 0.0  ;;  %v7298_v18 = vld [vmem:[#allocation2 + $0x308] ss:$12 sps:$4 sm:$0xff]   ;;  %v7299_v19 = vld [vmem:[#allocation2 + $0x318] ss:$12 sps:$4 sm:$0xff]  }
0x1217   :  { %v7305_v23 = vld [vmem:[#allocation2 + $0x334] ss:$12 sps:$4 sm:$0xff]  }
0x1218   :  { %v3640_v28 = vsel %vm1767_vm7, %v3638_v25, 0.0 }
0x1219   :  { %v3641_v35 = vadd.f32 %v3640_v28, %v3639_v26  ;;  %v7306_v26 = vld [vmem:[#allocation2 + $0x338] ss:$12 sps:$4 sm:$0xff]  }
0x121a   :  { %v7309_v28 = vld [vmem:[#allocation2 + $0x34c] ss:$12 sps:$4 sm:$0xff]  }
0x121b   :  { %v3642_v37 = vrot.slane %v3641_v35, 4 }
0x121d   :  { %v3643_v31 = vadd.f32 %v3642_v37, %v3641_v35  ;;  %v7307_v35 = vld [vmem:[#allocation2 + $0x348] ss:$12 sps:$4 sm:$0xff]   ;;  %v7310_v37 = vld [vmem:[#allocation2 + $0x350] ss:$12 sps:$4 sm:$0xff]  }
0x121f   :  { %v3644_v63 = vrot.slane %v3643_v31, 2 }
0x1221   :  { %v3645_v38 = vadd.f32 %v3644_v63, %v3643_v31 }
0x1223   :  { %v3646_v36 = vrot.slane %v3645_v38, 1 }
0x1225   :  { %v3647_v54 = vadd.f32 %v3646_v36, %v3645_v38 }
0x1227   :  { %v3648_v39 = vmul.f32 0.083333336, %v3647_v54 }
0x1229   :  { %v3649_v4 = vsub.f32 %v3637_v14, %v3648_v39  ;;  %v3650_v40 = vsub.f32 %v3638_v25, %v3648_v39  ;;  %v7301_v14 = vld [vmem:[#allocation2 + $0x31c] ss:$12 sps:$4 sm:$0xff]  }
0x122a   :  { %v7303_v25 = vld [vmem:[#allocation2 + $0x330] ss:$12 sps:$4 sm:$0xff]  }
0x122b   :  { %v3651_v41 = vmul.f32 %v3649_v4, %v3649_v4  ;;  %v3652_v42 = vmul.f32 %v3650_v40, %v3650_v40 }
0x122d   :  { %v3653_v43 = vsel %vm259_vm2, %v3651_v41, 0.0  ;;  %v3654_v3 = vsel %vm1767_vm7, %v3652_v42, 0.0 }
0x122e   :  { %v3655_v61 = vadd.f32 %v3654_v3, %v3653_v43 }
0x1230   :  { %v3656_v49 = vrot.slane %v3655_v61, 4 }
0x1232   :  { %v3657_v51 = vadd.f32 %v3656_v49, %v3655_v61 }
0x1234   :  { %v3658_v11 = vrot.slane %v3657_v51, 2 }
0x1236   :  { %v3659_v60 = vadd.f32 %v3658_v11, %v3657_v51 }
0x1238   :  { %v3660_v21 = vrot.slane %v3659_v60, 1 }
0x123a   :  { %v3661_v22 = vadd.f32 %v3660_v21, %v3659_v60 }
0x123c   :  { %v3662_v53 = vmul.f32 0.083333336, %v3661_v22 }
0x123e   :  { %v3663_v50 = vadd.f32 1e-05, %v3662_v53 }
0x1240   :  { %7399 = vrsqrt.f32 %v3663_v50 }
0x124a   :  { %v7400_v52 = vpop.eup %7399 }
0x124b   :  { %v3665_v2 = vmul.f32 %v7400_v52, %v3649_v4  ;;  %v3666_v55 = vmul.f32 %v7400_v52, %v3650_v40 }
0x124d   :  { %v3672_v1 = vmul.f32 %v6267_v58, %v3665_v2  ;;  %v3673_v45 = vmul.f32 %v6267_v58, %v3666_v55 }
0x124f   :  { %v3679_v46 = vadd.f32 %v6268_v47, %v3672_v1  ;;  %v3680_v5 = vadd.f32 %v6268_v47, %v3673_v45 }
0x1251   :  { %v8126_v56 = vadd.f32 %v3679_v46, %v8046_v32  ;;  %v8129_v59 = vadd.f32 %v3680_v5, %v8049_v33 }
0x1253   :  { %v3683_v27 = vpack.c.bf16 %v8129_v59, %v8126_v56 }
0x1255   :  { %6281 = vmatmul.mubr.msk.bf16.vlgmr.msra.gmra.mrb[72].mxu1 %vm259_vm2, %v3683_v27  ;;  %6891 = vmatmul.mubr.msk.bf16.vlgmr.msra.gmra.mrb[116].mxu0 %vm259_vm2, %v3683_v27 }
0x1256   :  { %6896 = vmatprep.mubr.msk.bf16.mxu1 %vm7452_vm15, %v7451_v30  ;;  %6902 = vmatprep.mubr.msk.bf16.mxu0 %vm7452_vm15, %v7451_v30 }
0x1328   :  { %v3801_v34 = vpop.f32.mrb[72].mxu1  ;;  %v3844_v24 = vpop.f32.mrb[116].mxu0 }
0x1329   :  { %v3803_v32 = vpop.f32.mrb[73].mxu1  ;;  %v6892_v29 = vpop.f32.mrb[117].mxu0 }
0x132a   :  { %v3805_v62 = vpop.f32.mrb[74].mxu1  ;;  %v3847_v33 = vpop.f32.mrb[118].mxu0 }
0x132b   :  { %v3851_v6 = vpack.c.bf16 %v3805_v62, %v3801_v34  ;;  %v3896_v8 = vpack.c.bf16 %v3847_v33, %v3844_v24  ;;  %v3807_v9 = vpop.f32.mrb[75].mxu1  ;;  %v6893_v10 = vpop.f32.mrb[119].mxu0 }
0x132d   :  { %v3853_v13 = vsel %vm1062_vm9, %v3851_v6, 0  ;;  %v3898_v57 = vsel %vm1062_vm9, %v3896_v8, 0  ;;  %v6285_v8 = vld [vmem:[%s8557_s3 + $0x78] ss:$0 sm:$0xff] }
0x132e   :  { %6895 = vmatpush3.bf16.msra.mxu1 %v3853_v13  ;;  %6901 = vmatpush3.bf16.msra.mxu0 %v3898_v57  ;;  %v6286_v13 = vld [vmem:[%s8557_s3 + $0x80] ss:$0 sm:$0xff] }
0x132f   :  { %6906 = vmatprep.subr.bf16.mxu0 %v7451_v30  ;;  %4071 = vmatprep.subr.bf16.mxu1 %v7297_v15 }
0x1331   :  { %6897 = vmatmul.mubr.msk.bf16.vlgmr.msra.gmra.mrb[76].mxu1 %vm2013_vm8, %v8096_v7  ;;  %6903 = vmatmul.mubr.msk.bf16.vlgmr.msra.gmra.mrb[120].mxu0 %vm2013_vm8, %v8103_v44 }
0x1332   :  { %4103 = vmatprep.mubr.bf16.mxu1 %v7450_v0  ;;  %6914 = vmatprep.mubr.msk.bf16.mxu0 %vm7452_vm15, %v7451_v30 }
0x1333   :  { %4072 = vmatpush1.bf16.msra.mxu1 %v7295_v16  ;;  %6907 = vmatpush3.bf16.msra.mxu0 %v7298_v18 }
0x1334   :  { %6908 = vmatprep.subr.bf16.mxu0 %v7451_v30  ;;  %4073 = vmatprep.subr.bf16.mxu1 %v7301_v14 }
0x1337   :  { %4074 = vmatpush1.bf16.msra.mxu1 %v7299_v19  ;;  %6909 = vmatpush3.bf16.msra.mxu0 %v7302_v20 }
0x1338   :  { %6910 = vmatprep.subr.bf16.mxu0 %v7451_v30  ;;  %4075 = vmatprep.subr.bf16.mxu1 %v7305_v23 }
0x133b   :  { %4076 = vmatpush1.bf16.msra.mxu1 %v7303_v25  ;;  %6911 = vmatpush3.bf16.msra.mxu0 %v7306_v26 }
0x133c   :  { %6912 = vmatprep.subr.bf16.mxu0 %v7451_v30  ;;  %4077 = vmatprep.subr.bf16.mxu1 %v7309_v28 }
0x133f   :  { %4078 = vmatpush1.bf16.msra.mxu1 %v7307_v35  ;;  %6913 = vmatpush3.bf16.msra.mxu0 %v7310_v37 }
0x1340   :  { %6918 = vmatprep.subr.bf16.mxu1 %v7451_v30  ;;  %6924 = vmatprep.subr.bf16.mxu0 %v7451_v30 }
0x1404   :  { %v3889_v31 = vpop.f32.mrb[76].mxu1  ;;  %v3934_v63 = vpop.f32.mrb[120].mxu0 }
0x1405   :  { %v3890_v38 = vadd.f32 %v3889_v31, %v3803_v32  ;;  %v6898_v36 = vpop.f32.mrb[77].mxu1  ;;  %v6904_v54 = vpop.f32.mrb[121].mxu0 }
0x1406   :  { %v3892_v39 = vpop.f32.mrb[78].mxu1  ;;  %v3937_v4 = vpop.f32.mrb[122].mxu0 }
0x1407   :  { %v3941_v40 = vadd.f32 %v3934_v63, %v3890_v38  ;;  %v3893_v41 = vadd.f32 %v3892_v39, %v3807_v9  ;;  %v6899_v42 = vpop.f32.mrb[79].mxu1  ;;  %v6905_v43 = vpop.f32.mrb[123].mxu0 }
0x1408   :  { %v7317_v42 = vld [vmem:[#allocation2 + $0x37c] ss:$12 sps:$4 sm:$0xff]   ;;  %v7315_v43 = vld [vmem:[#allocation2 + $0x378] ss:$12 sps:$4 sm:$0xff]  }
0x1409   :  { %v3942_v3 = vadd.f32 %v3937_v4, %v3893_v41  ;;  %v3943_v61 = vsel %vm259_vm2, %v3941_v40, 0.0  ;;  %v7313_v4 = vld [vmem:[#allocation2 + $0x364] ss:$12 sps:$4 sm:$0xff]   ;;  %v7314_v41 = vld [vmem:[#allocation2 + $0x368] ss:$12 sps:$4 sm:$0xff]  }
0x140b   :  { %v3944_v49 = vsel %vm1767_vm7, %v3942_v3, 0.0 }
0x140c   :  { %v3945_v51 = vadd.f32 %v3944_v49, %v3943_v61  ;;  %v7322_v61 = vld [vmem:[#allocation2 + $0x398] ss:$12 sps:$4 sm:$0xff]  }
0x140d   :  { %v7325_v49 = vld [vmem:[#allocation2 + $0x3ac] ss:$12 sps:$4 sm:$0xff]  }
0x140e   :  { %v3946_v11 = vrot.slane %v3945_v51, 4 }
0x1410   :  { %v3947_v60 = vadd.f32 %v3946_v11, %v3945_v51  ;;  %v7323_v51 = vld [vmem:[#allocation2 + $0x3a8] ss:$12 sps:$4 sm:$0xff]   ;;  %v7326_v11 = vld [vmem:[#allocation2 + $0x3b0] ss:$12 sps:$4 sm:$0xff]  }
0x1412   :  { %v3948_v21 = vrot.slane %v3947_v60, 2 }
0x1414   :  { %v3949_v22 = vadd.f32 %v3948_v21, %v3947_v60 }
0x1416   :  { %v3950_v53 = vrot.slane %v3949_v22, 1 }
0x1418   :  { %v3951_v50 = vadd.f32 %v3950_v53, %v3949_v22 }
0x141a   :  { %v3952_v52 = vmul.f32 0.083333336, %v3951_v50 }
0x141c   :  { %v3953_v58 = vsub.f32 %v3941_v40, %v3952_v52  ;;  %v3954_v2 = vsub.f32 %v3942_v3, %v3952_v52  ;;  %v7311_v40 = vld [vmem:[#allocation2 + $0x360] ss:$12 sps:$4 sm:$0xff]  }
0x141d   :  { %v7318_v3 = vld [vmem:[#allocation2 + $0x380] ss:$12 sps:$4 sm:$0xff]  }
0x141e   :  { %v3955_v55 = vmul.f32 %v3953_v58, %v3953_v58  ;;  %v3956_v47 = vmul.f32 %v3954_v2, %v3954_v2 }
0x1420   :  { %v3957_v1 = vsel %vm259_vm2, %v3955_v55, 0.0  ;;  %v3958_v45 = vsel %vm1767_vm7, %v3956_v47, 0.0 }
0x1421   :  { %v3959_v46 = vadd.f32 %v3958_v45, %v3957_v1 }
0x1423   :  { %v3960_v5 = vrot.slane %v3959_v46, 4 }
0x1425   :  { %v3961_v27 = vadd.f32 %v3960_v5, %v3959_v46 }
0x1427   :  { %v3962_v34 = vrot.slane %v3961_v27, 2 }
0x1429   :  { %v3963_v24 = vadd.f32 %v3962_v34, %v3961_v27 }
0x142b   :  { %v3964_v32 = vrot.slane %v3963_v24, 1 }
0x142d   :  { %v3965_v29 = vadd.f32 %v3964_v32, %v3963_v24 }
0x142f   :  { %v3966_v62 = vmul.f32 0.083333336, %v3965_v29 }
0x1431   :  { %v3967_v33 = vadd.f32 1e-05, %v3966_v62 }
0x1433   :  { %7401 = vrsqrt.f32 %v3967_v33 }
0x143d   :  { %v7402_v6 = vpop.eup %7401 }
0x143e   :  { %v3969_v9 = vmul.f32 %v7402_v6, %v3953_v58  ;;  %v3970_v10 = vmul.f32 %v7402_v6, %v3954_v2 }
0x1440   :  { %v3976_v57 = vmul.f32 %v6285_v8, %v3969_v9  ;;  %v3977_v15 = vmul.f32 %v6285_v8, %v3970_v10 }
0x1442   :  { %v3983_v16 = vadd.f32 %v6286_v13, %v3976_v57  ;;  %v3984_v18 = vadd.f32 %v6286_v13, %v3977_v15 }
0x1444   :  { %v3985_v14 = vmax.f32 %v3983_v16, 0.0  ;;  %v3986_v19 = vmax.f32 %v3984_v18, 0.0 }
0x1446   :  { %v3987_v20 = vpack.c.bf16 %v3986_v19, %v3985_v14 }
0x1448   :  { %6299 = vmatmul.mubr.msk.bf16.vlgmr.msra.gmra.mrb[80].mxu1 %vm259_vm2, %v3987_v20  ;;  %6915 = vmatmul.mubr.msk.bf16.vlgmr.msra.gmra.mrb[124].mxu0 %vm259_vm2, %v3987_v20 }
0x1449   :  { %6920 = vmatprep.mubr.msk.bf16.mxu1 %vm7452_vm15, %v7451_v30  ;;  %6926 = vmatprep.mubr.msk.bf16.mxu0 %vm7452_vm15, %v7451_v30 }
0x151b   :  { %v4105_v23 = vpop.f32.mrb[80].mxu1  ;;  %v4148_v25 = vpop.f32.mrb[124].mxu0 }
0x151c   :  { %v4107_v26 = vpop.f32.mrb[81].mxu1  ;;  %v6916_v28 = vpop.f32.mrb[125].mxu0 }
0x151d   :  { %v4109_v35 = vpop.f32.mrb[82].mxu1  ;;  %v4151_v37 = vpop.f32.mrb[126].mxu0 }
0x151e   :  { %v4155_v31 = vpack.c.bf16 %v4109_v35, %v4105_v23  ;;  %v4200_v63 = vpack.c.bf16 %v4151_v37, %v4148_v25  ;;  %v4111_v38 = vpop.f32.mrb[83].mxu1  ;;  %v6917_v36 = vpop.f32.mrb[127].mxu0  ;;  %v6303_v37 = vld [vmem:[%s8557_s3 + $0x88] ss:$0 sm:$0xff] }
0x1520   :  { %v4157_v54 = vsel %vm1062_vm9, %v4155_v31, 0  ;;  %v4202_v39 = vsel %vm1062_vm9, %v4200_v63, 0 }
0x1521   :  { %6919 = vmatpush3.bf16.msra.mxu1 %v4157_v54  ;;  %6925 = vmatpush3.bf16.msra.mxu0 %v4202_v39 }
0x1522   :  { %6930 = vmatprep.subr.bf16.mxu0 %v7451_v30  ;;  %4375 = vmatprep.subr.bf16.mxu1 %v7313_v4 }
0x1524   :  { %6921 = vmatmul.mubr.msk.bf16.vlgmr.msra.gmra.mrb[84].mxu1 %vm2013_vm8, %v8096_v7  ;;  %6927 = vmatmul.mubr.msk.bf16.vlgmr.msra.gmra.mrb[128].mxu0 %vm2013_vm8, %v8103_v44  ;;  %v7321_v7 = vld [vmem:[#allocation2 + $0x394] ss:$12 sps:$4 sm:$0xff]   ;;  %v7319_v44 = vld [vmem:[#allocation2 + $0x390] ss:$12 sps:$4 sm:$0xff]  }
0x1525   :  { %4407 = vmatprep.mubr.bf16.mxu1 %v7450_v0  ;;  %6938 = vmatprep.mubr.msk.bf16.mxu0 %vm7452_vm15, %v7451_v30  ;;  %vm5332_vm15 = vcmp.ge.s32.totalorder %v7585_v17, 27 }
0x1526   :  { %4376 = vmatpush1.bf16.msra.mxu1 %v7311_v40  ;;  %6931 = vmatpush3.bf16.msra.mxu0 %v7314_v41 }
0x1527   :  { %6932 = vmatprep.subr.bf16.mxu0 %v7451_v30  ;;  %4377 = vmatprep.subr.bf16.mxu1 %v7317_v42 }
0x152a   :  { %4378 = vmatpush1.bf16.msra.mxu1 %v7315_v43  ;;  %6933 = vmatpush3.bf16.msra.mxu0 %v7318_v3  ;;  %v7327_v43 = vld [vmem:[%s8555_s1 + $0xc0] sm:$0xff]  }
0x152b   :  { %6934 = vmatprep.subr.bf16.mxu0 %v7451_v30  ;;  %4379 = vmatprep.subr.bf16.mxu1 %v7321_v7 }
0x152e   :  { %4380 = vmatpush1.bf16.msra.mxu1 %v7319_v44  ;;  %6935 = vmatpush3.bf16.msra.mxu0 %v7322_v61 }
0x152f   :  { %6936 = vmatprep.subr.bf16.mxu0 %v7451_v30  ;;  %4381 = vmatprep.subr.bf16.mxu1 %v7325_v49 }
0x1532   :  { %4382 = vmatpush1.bf16.msra.mxu1 %v7323_v51  ;;  %6937 = vmatpush3.bf16.msra.mxu0 %v7326_v11 }
0x15f7   :  { %v4193_v60 = vpop.f32.mrb[84].mxu1  ;;  %v4238_v21 = vpop.f32.mrb[128].mxu0 }
0x15f8   :  { %v4194_v22 = vadd.f32 %v4193_v60, %v4107_v26  ;;  %v6922_v53 = vpop.f32.mrb[85].mxu1  ;;  %v6928_v50 = vpop.f32.mrb[129].mxu0 }
0x15f9   :  { %v4196_v52 = vpop.f32.mrb[86].mxu1  ;;  %v4241_v58 = vpop.f32.mrb[130].mxu0  ;;  %v7328_v53 = vld [vmem:[%s8555_s1 + $0xc8] sm:$0x1f]   ;;  %v7329_v50 = vld [vmem:[%s8555_s1 + $0x38] sm:$0xff]  }
0x15fa   :  { %v4245_v2 = vadd.f32 %v4238_v21, %v4194_v22  ;;  %v4197_v55 = vadd.f32 %v4196_v52, %v4111_v38  ;;  %v6923_v47 = vpop.f32.mrb[87].mxu1  ;;  %v6929_v1 = vpop.f32.mrb[131].mxu0  ;;  %v6304_v38 = vld [vmem:[%s8557_s3 + $0x90] ss:$0 sm:$0xff] }
0x15fb   :  { %v7332_v47 = vld [vmem:[%s8555_s1 + $0x150] sm:$0x1f]  }
0x15fc   :  { %v4246_v45 = vadd.f32 %v4241_v58, %v4197_v55  ;;  %v4247_v46 = vsel %vm259_vm2, %v4245_v2, 0.0  ;;  %v7330_v58 = vld [vmem:[%s8555_s1 + $0x40] sm:$0x1f]  }
0x15fd   :  { %v7335_v1 = vld [vmem:[#allocation2 + $0x3c4] ss:$12 sps:$4 sm:$0xff]  }
0x15fe   :  { %v4248_v5 = vsel %vm1767_vm7, %v4246_v45, 0.0  ;;  %4879 = vmatprep.subr.bf16.mxu0 %v7335_v1 }
0x15ff   :  { %v4249_v27 = vadd.f32 %v4248_v5, %v4247_v46  ;;  %v7338_v46 = vld [vmem:[#allocation2 + $0x3dc] ss:$12 sps:$4 sm:$0xff]   ;;  %v7336_v5 = vld [vmem:[#allocation2 + $0x3d8] ss:$12 sps:$4 sm:$0xff]  }
0x1601   :  { %v4250_v34 = vrot.slane %v4249_v27, 4 }
0x1603   :  { %v4251_v24 = vadd.f32 %v4250_v34, %v4249_v27  ;;  %v8228_v27 = vld [vmem:[#allocation2 + $0x3c8] ss:$12 sps:$4 sm:$0xff]  }
0x1605   :  { %v4252_v32 = vrot.slane %v4251_v24, 2 }
0x1607   :  { %v4253_v29 = vadd.f32 %v4252_v32, %v4251_v24 }
0x1609   :  { %v4254_v62 = vrot.slane %v4253_v29, 1 }
0x160b   :  { %v4255_v33 = vadd.f32 %v4254_v62, %v4253_v29 }
0x160d   :  { %v4256_v6 = vmul.f32 0.083333336, %v4255_v33 }
0x160f   :  { %v4257_v8 = vsub.f32 %v4245_v2, %v4256_v6  ;;  %v4258_v9 = vsub.f32 %v4246_v45, %v4256_v6  ;;  %v7331_v2 = vld [vmem:[%s8555_s1 + $0x148] sm:$0xff]   ;;  %v8241_v6 = vsel %vm4701_vm10, 1.0, %v7451_v30 }
0x1610   :  { %v7333_v45 = vld [vmem:[#allocation2 + $0x3c0] ss:$12 sps:$4 sm:$0xff]  }
0x1611   :  { %v4259_v10 = vmul.f32 %v4257_v8, %v4257_v8  ;;  %v4260_v13 = vmul.f32 %v4258_v9, %v4258_v9 }
0x1613   :  { %v4261_v57 = vsel %vm259_vm2, %v4259_v10, 0.0  ;;  %v4262_v15 = vsel %vm1767_vm7, %v4260_v13, 0.0 }
0x1614   :  { %v4263_v16 = vadd.f32 %v4262_v15, %v4261_v57 }
0x1616   :  { %v4264_v18 = vrot.slane %v4263_v16, 4 }
0x1618   :  { %v4265_v14 = vadd.f32 %v4264_v18, %v4263_v16 }
0x161a   :  { %v4266_v19 = vrot.slane %v4265_v14, 2 }
0x161c   :  { %v4267_v20 = vadd.f32 %v4266_v19, %v4265_v14 }
0x161e   :  { %v4268_v23 = vrot.slane %v4267_v20, 1 }
0x1620   :  { %v4269_v25 = vadd.f32 %v4268_v23, %v4267_v20 }
0x1622   :  { %v4270_v26 = vmul.f32 0.083333336, %v4269_v25 }
0x1624   :  { %v4271_v28 = vadd.f32 1e-05, %v4270_v26 }
0x1626   :  { %7403 = vrsqrt.f32 %v4271_v28 }
0x1630   :  { %v7404_v35 = vpop.eup %7403 }
0x1631   :  { %v4273_v31 = vmul.f32 %v7404_v35, %v4257_v8  ;;  %v4274_v63 = vmul.f32 %v7404_v35, %v4258_v9 }
0x1633   :  { %v4280_v36 = vmul.f32 %v6303_v37, %v4273_v31  ;;  %v4281_v54 = vmul.f32 %v6303_v37, %v4274_v63 }
0x1635   :  { %v4287_v39 = vadd.f32 %v6304_v38, %v4280_v36  ;;  %v4288_v4 = vadd.f32 %v6304_v38, %v4281_v54 }
0x1637   :  { %v4289_v40 = vadd.f32 %v4287_v39, %v8126_v56  ;;  %v4290_v41 = vadd.f32 %v4288_v4, %v8129_v59 }
0x1639   :  { %v4291_v42 = vpack.c.bf16 %v4290_v41, %v4289_v40 }
0x163b   :  { %6317 = vmatmul.mubr.msk.bf16.vlgmr.msra.gmra.mrb[88].mxu1 %vm259_vm2, %v4291_v42  ;;  %6939 = vmatmul.mubr.msk.bf16.vlgmr.msra.gmra.mrb[132].mxu0 %vm259_vm2, %v4291_v42  ;;  %vm4683_vm2 = vcmp.lt.s32.totalorder %v7755_v48, 13 }
0x163c   :  { %4911 = vmatprep.mubr.bf16.mxu0 %v7450_v0  ;;  %6944 = vmatprep.mubr.msk.bf16.mxu1 %vm2013_vm8, %v7327_v43  ;;  %v8235_v32 = vsel %vm4683_vm2, 1.0, %v7451_v30 }
0x163d   :  { %4880 = vmatpush1.bf16.msra.mxu0 %v7333_v45 }
0x163e   :  { %4881 = vmatprep.subr.bf16.mxu0 %v7338_v46 }
0x1641   :  { %4882 = vmatpush1.bf16.msra.mxu0 %v7336_v5 }
0x1642   :  { %6960 = vmatprep.subr.bf16.mxu0 %v8228_v27 }
0x170e   :  { %v4409_v3 = vpop.f32.mrb[88].mxu1  ;;  %v4452_v7 = vpop.f32.mrb[132].mxu0 }
0x170f   :  { %v4411_v44 = vpop.f32.mrb[89].mxu1  ;;  %v6940_v61 = vpop.f32.mrb[133].mxu0 }
0x1710   :  { %v4413_v56 = vpop.f32.mrb[90].mxu1  ;;  %v4455_v49 = vpop.f32.mrb[134].mxu0 }
0x1711   :  { %v4463_v59 = vpack.c.bf16 %v4413_v56, %v4409_v3  ;;  %v4609_v51 = vpack.c.bf16 %v4455_v49, %v4452_v7  ;;  %v4415_v11 = vpop.f32.mrb[91].mxu1  ;;  %v6941_v60 = vpop.f32.mrb[135].mxu0 }
0x1712   :  { %v4468_v21 = vpack.c.bf16 %v4415_v11, %v4411_v44 }
0x1713   :  { %v4554_v52 = vsel %vm1062_vm9, %v4463_v59, 0  ;;  %v4627_v55 = vsel %vm1062_vm9, %v4609_v51, 0 }
0x1714   :  { %v4486_v22 = vsel %vm1062_vm9, %v4468_v21, 0  ;;  %7130 = vmatprep.subr.msk.bf16.mxu1 %vm1062_vm9, %v4468_v21 }
0x1715   :  { %6943 = vmatpush3.bf16.msra.mxu1 %v4486_v22 }
0x1716   :  { %7131 = vmatprep.subr.msk.bf16.mxu1 %vm1062_vm9, %v4463_v59 }
0x1718   :  { %6945 = vmatmul.mubr.msk.bf16.vlgmr.msra.gmra.mrb[92].mxu1 %vm2013_vm8, %v7328_v53 }
0x1719   :  { %6949 = vmatpush3.bf16.msra.mxu1 %v4554_v52  ;;  %6950 = vmatprep.mubr.msk.bf16.mxu1 %vm2013_vm8, %v7329_v50 }
0x171a   :  { %7132 = vmatprep.subr.msk.bf16.mxu1 %vm1062_vm9, %v4609_v51  ;;  %vm4695_vm9 = vcmp.ge.s32.totalorder %v7755_v48, 13 }
0x171b   :  { %v8238_v29 = vsel %vm4695_vm9, 1.0, %v7451_v30 }
0x1724   :  { %6951 = vmatmul.mubr.msk.bf16.vlgmr.msra.gmra.mrb[92].mxu1 %vm2013_vm8, %v7330_v58 }
0x1725   :  { %6955 = vmatpush3.bf16.msra.mxu1 %v4627_v55  ;;  %6956 = vmatprep.mubr.msk.bf16.mxu1 %vm2013_vm8, %v7331_v2 }
0x1730   :  { %6957 = vmatmul.mubr.msk.bf16.vlgmr.msra.gmra.mrb[92].mxu1 %vm2013_vm8, %v7332_v47 }
0x1803   :  { %v6958_v34 = vpop.f32.mrb[92].mxu1 }
0x1804   :  { %v4663_v24 = vpop.f32.mrb[93].mxu1  ;;  %v4712_v9 = vmul.f32 0.0, %v6958_v34  ;;  %v4740_v25 = vsel %vm1304_vm13, %v6958_v34, 0.0 }
0x1805   :  { %v4733_v62 = vmul.f32 0.0, %v4663_v24  ;;  %v6959_v33 = vpop.f32.mrb[94].mxu1  ;;  %v4714_v13 = vsel %vm1304_vm13, %v4663_v24, 0.0 }
0x1806   :  { %v4666_v8 = vpop.f32.mrb[95].mxu1  ;;  %v4713_v57 = vmul.f32 0.0, %v6959_v33  ;;  %v4736_v16 = vmul.f32 %v6959_v33, %v8241_v6  ;;  %v4717_v23 = vsel %vm1304_vm13, %v4712_v9, 0.0 }
0x1807   :  { %v4711_v10 = vmul.f32 %v8235_v32, %v4666_v8  ;;  %v4734_v48 = vmul.f32 %v8238_v29, %v4666_v8  ;;  %v4737_v15 = vsel %vm1304_vm13, %v4733_v62, 0.0 }
0x1808   :  { %v4720_v35 = vsel %vm4719_vm11, %v4713_v57, 0.0  ;;  %v4742_v37 = vsel %vm4719_vm11, %v4736_v16, 0.0 }
0x1809   :  { %v4715_v18 = vsel %vm1304_vm13, %v4711_v10, 0.0  ;;  %v4738_v14 = vsel %vm1304_vm13, %v4734_v48, 0.0 }
0x180a   :  { %v4716_v19 = vadd.f32 %v4715_v18, %v4714_v13  ;;  %v4739_v20 = vadd.f32 %v4738_v14, %v4737_v15 }
0x180c   :  { %v4718_v26 = vadd.f32 %v4717_v23, %v4716_v19  ;;  %v4741_v28 = vadd.f32 %v4740_v25, %v4739_v20 }
0x180e   :  { %v4721_v31 = vadd.f32 %v4720_v35, %v4718_v26  ;;  %v4743_v63 = vadd.f32 %v4742_v37, %v4741_v28 }
0x1810   :  { %v4722_v38 = vrot.slane %v4721_v31, 4  ;;  %v4744_v36 = vrot.slane %v4743_v63, 4 }
0x1812   :  { %v4723_v54 = vadd.f32 %v4722_v38, %v4721_v31  ;;  %v4745_v39 = vadd.f32 %v4744_v36, %v4743_v63 }
0x1814   :  { %v4724_v4 = vrot.slane %v4723_v54, 2  ;;  %v4746_v40 = vrot.slane %v4745_v39, 2 }
0x1816   :  { %v4725_v41 = vadd.f32 %v4724_v4, %v4723_v54  ;;  %v4747_v42 = vadd.f32 %v4746_v40, %v4745_v39 }
0x1818   :  { %v4726_v43 = vrot.slane %v4725_v41, 1  ;;  %v4748_v3 = vrot.slane %v4747_v42, 1 }
0x181a   :  { %v4727_v7 = vadd.f32 %v4726_v43, %v4725_v41  ;;  %v4749_v44 = vadd.f32 %v4748_v3, %v4747_v42 }
0x181c   :  { %v4728_v61 = vmul.f32 0.07692308, %v4727_v7  ;;  %v4750_v56 = vmul.f32 0.07692308, %v4749_v44 }
0x181e   :  { %v4730_v49 = vmul.f32 %v4728_v61, %v8235_v32  ;;  %v4731_v59 = vmul.f32 0.0, %v4728_v61  ;;  %v4751_v51 = vmul.f32 0.0, %v4750_v56  ;;  %v4752_v11 = vmul.f32 %v4750_v56, %v8238_v29 }
0x181f   :  { %v4754_v60 = vmul.f32 %v4750_v56, %v8241_v6 }
0x1820   :  { %v4755_v21 = vadd.f32 %v4751_v51, %v4728_v61  ;;  %v4756_v22 = vadd.f32 %v4752_v11, %v4730_v49  ;;  %v4757_v53 = vadd.f32 %v4750_v56, %v4731_v59 }
0x1821   :  { %v4758_v50 = vadd.f32 %v4754_v60, %v4731_v59 }
0x1822   :  { %v8257_v52 = vsub.f32 %v4663_v24, %v4755_v21  ;;  %v8259_v58 = vsub.f32 %v4666_v8, %v4756_v22  ;;  %v4761_v2 = vsub.f32 %v6958_v34, %v4757_v53 }
0x1823   :  { %v8261_v55 = vsub.f32 %v6959_v33, %v4758_v50 }
0x1824   :  { %v4763_v47 = vmul.f32 %v8257_v52, %v8257_v52  ;;  %v4764_v1 = vmul.f32 %v8259_v58, %v8259_v58  ;;  %v4765_v45 = vmul.f32 %v4761_v2, %v4761_v2 }
0x1825   :  { %v4766_v46 = vmul.f32 %v8261_v55, %v8261_v55 }
0x1826   :  { %v4768_v5 = vmul.f32 %v4764_v1, %v8235_v32  ;;  %v4769_v62 = vmul.f32 0.0, %v4765_v45  ;;  %v4789_v24 = vmul.f32 0.0, %v4763_v47  ;;  %v4790_v8 = vmul.f32 %v4764_v1, %v8238_v29 }
0x1827   :  { %v4770_v9 = vmul.f32 0.0, %v4766_v46  ;;  %v4771_v34 = vsel %vm1304_vm13, %v4763_v47, 0.0  ;;  %v4792_v13 = vmul.f32 %v4766_v46, %v8241_v6  ;;  %v4796_v14 = vsel %vm1304_vm13, %v4765_v45, 0.0 }
0x1828   :  { %v4772_v33 = vsel %vm1304_vm13, %v4768_v5, 0.0  ;;  %v4793_v10 = vsel %vm1304_vm13, %v4789_v24, 0.0  ;;  %v4794_v57 = vsel %vm1304_vm13, %v4790_v8, 0.0  ;;  %v4774_v15 = vsel %vm1304_vm13, %v4769_v62, 0.0 }
0x1829   :  { %v4773_v48 = vadd.f32 %v4772_v33, %v4771_v34  ;;  %v4795_v16 = vadd.f32 %v4794_v57, %v4793_v10  ;;  %v4776_v19 = vsel %vm4719_vm11, %v4770_v9, 0.0  ;;  %v4798_v25 = vsel %vm4719_vm11, %v4792_v13, 0.0  ;;  %v7340_v34 = vld [vmem:[#allocation2 + $0x3e0] ss:$12 sps:$4 sm:$0xff]  }
0x182b   :  { %v4775_v18 = vadd.f32 %v4774_v15, %v4773_v48  ;;  %v4797_v20 = vadd.f32 %v4796_v14, %v4795_v16 }
0x182d   :  { %v4777_v23 = vadd.f32 %v4776_v19, %v4775_v18  ;;  %v4799_v26 = vadd.f32 %v4798_v25, %v4797_v20  ;;  %v7342_v20 = vld [vmem:[%s8555_s1 + $0xd8] sm:$0xff]  }
0x182f   :  { %v4778_v28 = vrot.slane %v4777_v23, 4  ;;  %v4800_v35 = vrot.slane %v4799_v26, 4 }
0x1831   :  { %v4779_v37 = vadd.f32 %v4778_v28, %v4777_v23  ;;  %v4801_v31 = vadd.f32 %v4800_v35, %v4799_v26  ;;  %v7343_v23 = vld [vmem:[%s8555_s1 + $0xe0] sm:$0xff]  }
0x1833   :  { %v4780_v63 = vrot.slane %v4779_v37, 2  ;;  %v4802_v38 = vrot.slane %v4801_v31, 2 }
0x1835   :  { %v4781_v36 = vadd.f32 %v4780_v63, %v4779_v37  ;;  %v4803_v54 = vadd.f32 %v4802_v38, %v4801_v31  ;;  %v7344_v38 = vld [vmem:[%s8555_s1 + $0xe8] ss:$0 sps:$4 sm:$0x77]  }
0x1837   :  { %v4782_v39 = vrot.slane %v4781_v36, 1  ;;  %v4804_v4 = vrot.slane %v4803_v54, 1 }
0x1839   :  { %v4783_v40 = vadd.f32 %v4782_v39, %v4781_v36  ;;  %v4805_v41 = vadd.f32 %v4804_v4, %v4803_v54  ;;  %v7345_v36 = vld [vmem:[%s8555_s1 + $0x48] sm:$0xff]   ;;  %v7346_v54 = vld [vmem:[%s8555_s1 + $0x50] sm:$0xff]   ;;  %v7347_v39 = vld [vmem:[%s8555_s1 + $0x58] sm:$0xff]  }
0x183b   :  { %v4784_v42 = vmul.f32 0.07692308, %v4783_v40  ;;  %v4806_v43 = vmul.f32 0.07692308, %v4805_v41  ;;  %v7349_v41 = vld [vmem:[%s8555_s1 + $0x158] sm:$0xff]  }
0x183c   :  { %v7348_v40 = vld [vmem:[%s8555_s1 + $0x60] ss:$0 sps:$4 sm:$0x77]  }
0x183d   :  { %v4786_v3 = vmul.f32 %v4784_v42, %v8235_v32  ;;  %v4787_v7 = vmul.f32 0.0, %v4784_v42  ;;  %v4807_v44 = vmul.f32 0.0, %v4806_v43  ;;  %v4808_v61 = vmul.f32 %v4806_v43, %v8238_v29 }
0x183e   :  { %v4810_v56 = vmul.f32 %v4806_v43, %v8241_v6 }
0x183f   :  { %v4813_v49 = vadd.f32 %v4806_v43, %v4787_v7  ;;  %v4811_v59 = vadd.f32 %v4807_v44, %v4784_v42  ;;  %v4812_v51 = vadd.f32 %v4808_v61, %v4786_v3  ;;  %v7350_v42 = vld [vmem:[%s8555_s1 + $0x160] sm:$0xff]   ;;  %v7351_v43 = vld [vmem:[%s8555_s1 + $0x168] sm:$0xff]   ;;  %v7352_v3 = vld [vmem:[%s8555_s1 + $0x170] ss:$0 sps:$4 sm:$0x77]  }
0x1840   :  { %v4814_v11 = vadd.f32 %v4810_v56, %v4787_v7  ;;  %v7353_v7 = vld [vmem:[#allocation2 + $0x3f0] ss:$12 sps:$4 sm:$0xff]   ;;  %v7355_v44 = vld [vmem:[#allocation2 + $0x3f4] ss:$12 sps:$4 sm:$0xff]   ;;  %v8347_v61 = vld [vmem:[#allocation2 + $0x3f8] ss:$12 sps:$4 sm:$0xff]  }
0x1841   :  { %v4817_v60 = vadd.f32 1e-05, %v4813_v49  ;;  %v4815_v21 = vadd.f32 1e-05, %v4811_v59  ;;  %v4816_v22 = vadd.f32 1e-05, %v4812_v51 }
0x1842   :  { %v4818_v53 = vadd.f32 1e-05, %v4814_v11  ;;  %v8357_v59 = vsel %vm5311_vm14, 1.0, %v7451_v30  ;;  %v571_v51 = vadd.s32 48, %v7581_v12 }
0x1843   :  { %7405 = vrsqrt.f32 %v4817_v60 }
0x1844   :  { %7407 = vrsqrt.f32 %v4815_v21  ;;  %vm5342_vm0 = vcmp.lt.s32.totalorder %v571_v51, 54 }
0x1845   :  { %7409 = vrsqrt.f32 %v4816_v22  ;;  %v8365_v22 = vsel %vm5332_vm15, 1.0, %v7451_v30 }
0x1846   :  { %7411 = vrsqrt.f32 %v4818_v53 }
0x184d   :  { %v7406_v50 = vpop.eup %7405 }
0x184e   :  { %v7408_v32 = vpop.eup %7407  ;;  %v4825_v47 = vmul.f32 %v7406_v50, %v4761_v2 }
0x184f   :  { %v7410_v1 = vpop.eup %7409  ;;  %v4823_v29 = vmul.f32 %v7408_v32, %v8257_v52  ;;  %v7341_v52 = vld [vmem:[%s8555_s1 + $0xd0] sm:$0xff]  }
0x1850   :  { %v7412_v45 = vpop.eup %7411  ;;  %v4824_v6 = vmul.f32 %v7410_v1, %v8259_v58  ;;  %v4829_v62 = vmax.f32 %v4825_v47, 0.0  ;;  %6972 = vmatprep.mubr.msk.bf16.mxu1 %vm5017_vm12, %v7341_v52 }
0x1851   :  { %v4827_v46 = vmax.f32 %v4823_v29, 0.0  ;;  %v4826_v5 = vmul.f32 %v7412_v45, %v8261_v55 }
0x1852   :  { %v4828_v24 = vmax.f32 %v4824_v6, 0.0 }
0x1853   :  { %v4830_v8 = vmax.f32 %v4826_v5, 0.0 }
0x1854   :  { %v4831_v9 = vpack.c.bf16 %v4828_v24, %v4827_v46 }
0x1855   :  { %v4832_v33 = vpack.c.bf16 %v4830_v8, %v4829_v62 }
0x1856   :  { %6337 = vmatmul.mubr.msk.bf16.vlgmr.msra.gmra.mrb[136].mxu0 %vm1304_vm13, %v4831_v9 }
0x1857   :  { %4921 = vmatprep.mubr.bf16.mxu0 %v7450_v0  ;;  %6961 = vmatpush3.bf16.msra.mxu0 %v8228_v27 }
0x1858   :  { %6962 = vmatprep.subr.bf16.mxu0 %v7340_v34 }
0x185b   :  { %6963 = vmatpush3.bf16.msra.mxu0 %v7340_v34 }
0x185c   :  { %5586 = vmatprep.subr.bf16.mxu0 %v7355_v44 }
0x185e   :  { %6338 = vmatmul.mubr.msk.bf16.gmra.mrb[140].mxu0 %vm1304_vm13, %v4832_v33 }
0x185f   :  { %6964 = vmatprep.mubr.msk.bf16.mxu0 %vm1304_vm13, %v4831_v9  ;;  %v8385_v9 = vsel %vm5342_vm0, 1.0, %v7451_v30 }
0x1866   :  { %6965 = vmatmul.mubr.msk.bf16.vlgmr.msra.gmra.mrb[144].mxu0 %vm1304_vm13, %v4832_v33  ;;  %vm5030_vm13 = vcmask 1044480  }
0x1867   :  { %5618 = vmatprep.mubr.bf16.mxu0 %v7450_v0  ;;  %5587 = vmatpush1.bf16.msra.mxu0 %v7353_v7 }
0x1868   :  { %7004 = vmatprep.subr.bf16.mxu0 %v8347_v61 }
0x1929   :  { %v4913_v58 = vpop.f32.mrb[136].mxu0 }
0x192a   :  { %v4915_v2 = vpop.f32.mrb[137].mxu0 }
0x192b   :  { %v4917_v27 = vpop.f32.mrb[138].mxu0 }
0x192c   :  { %v4988_v55 = vpack.c.bf16 %v4917_v27, %v4913_v58  ;;  %v4919_v10 = vpop.f32.mrb[139].mxu0 }
0x192d   :  { %v4997_v48 = vpack.c.bf16 %v4919_v10, %v4915_v2 }
0x192f   :  { %6968 = vmatprep.subr.bf16.mxu1 %v4997_v48 }
0x1930   :  { %6969 = vmatpush3.bf16.msra.mxu1 %v4997_v48 }
0x1931   :  { %v4923_v13 = vpop.f32.mrb[140].mxu0 }
0x1932   :  { %v4925_v57 = vpop.f32.mrb[141].mxu0 }
0x1933   :  { %v4927_v15 = vpop.f32.mrb[142].mxu0 }
0x1934   :  { %v4989_v16 = vpack.c.bf16 %v4927_v15, %v4923_v13  ;;  %v4929_v18 = vpop.f32.mrb[143].mxu0 }
0x1935   :  { %v4998_v14 = vpack.c.bf16 %v4929_v18, %v4925_v57 }
0x1936   :  { %v5129_v63 = vsel %vm5030_vm13, %v4989_v16, 0 }
0x1937   :  { %v5032_v19 = vsel %vm5030_vm13, %v4998_v14, 0  ;;  %7133 = vmatprep.subr.msk.bf16.mxu1 %vm5030_vm13, %v4998_v14 }
0x1938   :  { %6971 = vmatpush3.bf16.msra.mxu1 %v5032_v19 }
0x1939   :  { %v6966_v25 = vpop.f32.mrb[144].mxu0  ;;  %6980 = vmatprep.subr.bf16.mxu1 %v4988_v55 }
0x193a   :  { %v4966_v26 = vpop.f32.mrb[145].mxu0 }
0x193b   :  { %v6967_v28 = vpop.f32.mrb[146].mxu0  ;;  %6973 = vmatmul.mubr.msk.bf16.vlgmr.msra.gmra.mrb[96].mxu1 %vm5017_vm12, %v7342_v20 }
0x193c   :  { %v5203_v35 = vpack.c.bf16 %v6967_v28, %v6966_v25  ;;  %v4969_v37 = vpop.f32.mrb[147].mxu0  ;;  %6981 = vmatpush3.bf16.msra.mxu1 %v4988_v55  ;;  %6976 = vmatprep.mubr.msk.bf16.mxu1 %vm5017_vm12, %v7343_v23 }
0x193d   :  { %v5202_v31 = vpack.c.bf16 %v4969_v37, %v4966_v26  ;;  %7134 = vmatprep.subr.msk.bf16.mxu1 %vm5030_vm13, %v4989_v16 }
0x193e   :  { %v5235_v4 = vsel %vm5030_vm13, %v5203_v35, 0 }
0x1940   :  { %6983 = vmatpush3.bf16.msra.mxu1 %v5129_v63 }
0x1941   :  { %6992 = vmatprep.subr.bf16.mxu1 %v5202_v31 }
0x1943   :  { %6977 = vmatmul.mubr.msk.bf16.gmra.mrb[100].mxu1 %vm5017_vm12, %v7344_v38 }
0x1944   :  { %6984 = vmatprep.mubr.msk.bf16.mxu1 %vm5017_vm12, %v7345_v36 }
0x194b   :  { %6985 = vmatmul.mubr.msk.bf16.vlgmr.msra.gmra.mrb[96].mxu1 %vm5017_vm12, %v7346_v54 }
0x194c   :  { %6993 = vmatpush3.bf16.msra.mxu1 %v5202_v31  ;;  %6988 = vmatprep.mubr.msk.bf16.mxu1 %vm5017_vm12, %v7347_v39 }
0x194d   :  { %7135 = vmatprep.subr.msk.bf16.mxu1 %vm5030_vm13, %v5203_v35 }
0x1950   :  { %6995 = vmatpush3.bf16.msra.mxu1 %v5235_v4 }
0x1953   :  { %6989 = vmatmul.mubr.msk.bf16.gmra.mrb[100].mxu1 %vm5017_vm12, %v7348_v40 }
0x1954   :  { %6996 = vmatprep.mubr.msk.bf16.mxu1 %vm5017_vm12, %v7349_v41 }
0x195b   :  { %6997 = vmatmul.mubr.msk.bf16.vlgmr.msra.gmra.mrb[96].mxu1 %vm5017_vm12, %v7350_v42 }
0x195c   :  { %7000 = vmatprep.mubr.msk.bf16.mxu1 %vm5017_vm12, %v7351_v43 }
0x1963   :  { %7001 = vmatmul.mubr.msk.bf16.gmra.mrb[100].mxu1 %vm5017_vm12, %v7352_v3 }
0x1a2e   :  { %v8351_v56 = vpop.f32.mrb[96].mxu1 }
0x1a2f   :  { %v8354_v49 = vpop.f32.mrb[97].mxu1  ;;  %v5394_v21 = vmul.f32 0.0, %v8351_v56  ;;  %v5367_v1 = vsel %vm645_vm5, %v8351_v56, 0.0 }
0x1a30   :  { %v5392_v11 = vmul.f32 0.0, %v8354_v49  ;;  %v8361_v60 = vpop.f32.mrb[98].mxu1  ;;  %v5364_v17 = vsel %vm645_vm5, %v8354_v49, 0.0 }
0x1a31   :  { %v8367_v53 = vpop.f32.mrb[99].mxu1  ;;  %v5360_v50 = vmul.f32 %v8361_v60, %v8357_v59  ;;  %v5395_v45 = vmul.f32 %v8361_v60, %v8365_v22  ;;  %v5402_v62 = vsel %vm645_vm5, %v5394_v21, 0.0 }
0x1a32   :  { %v5365_v12 = vsel %vm645_vm5, %v8367_v53, 0.0  ;;  %v5393_v32 = vmul.f32 0.0, %v8367_v53  ;;  %v5399_v29 = vsel %vm645_vm5, %v5392_v11, 0.0 }
0x1a33   :  { %v5366_v47 = vadd.f32 %v5365_v12, %v5364_v17  ;;  %v5369_v24 = vsel %vm645_vm5, %v5360_v50, 0.0  ;;  %v5404_v58 = vsel %vm645_vm5, %v5395_v45, 0.0 }
0x1a34   :  { %v5400_v6 = vsel %vm645_vm5, %v5393_v32, 0.0 }
0x1a35   :  { %v5368_v46 = vadd.f32 %v5367_v1, %v5366_v47  ;;  %v5401_v5 = vadd.f32 %v5400_v6, %v5399_v29 }
0x1a36   :  { %v7002_v8 = vpop.f32.mrb[100].mxu1 }
0x1a37   :  { %v5287_v34 = vpop.f32.mrb[101].mxu1  ;;  %v5370_v33 = vadd.f32 %v5369_v24, %v5368_v46  ;;  %v5403_v52 = vadd.f32 %v5402_v62, %v5401_v5  ;;  %v5363_v55 = vmul.f32 0.0, %v7002_v8  ;;  %v5398_v13 = vmul.f32 %v7002_v8, %v8385_v9 }
0x1a38   :  { %v5361_v2 = vmul.f32 0.0, %v5287_v34  ;;  %v7003_v27 = vpop.f32.mrb[102].mxu1  ;;  %v5406_v15 = vsel %vm645_vm5, %v5287_v34, 0.0 }
0x1a39   :  { %v5405_v10 = vadd.f32 %v5404_v58, %v5403_v52  ;;  %v5290_v48 = vpop.f32.mrb[103].mxu1  ;;  %v5376_v25 = vsel %vm5375_vm3, %v5363_v55, 0.0  ;;  %v5410_v26 = vsel %vm5375_vm3, %v5398_v13, 0.0 }
0x1a3a   :  { %v5371_v57 = vsel %vm645_vm5, %v5361_v2, 0.0  ;;  %v5362_v16 = vmul.f32 0.0, %v5290_v48  ;;  %v5408_v19 = vsel %vm645_vm5, %v5290_v48, 0.0 }
0x1a3b   :  { %v5372_v30 = vadd.f32 %v5371_v57, %v5370_v33  ;;  %v5407_v18 = vadd.f32 %v5406_v15, %v5405_v10 }
0x1a3c   :  { %v5373_v14 = vsel %vm645_vm5, %v5362_v16, 0.0 }
0x1a3d   :  { %v5374_v20 = vadd.f32 %v5373_v14, %v5372_v30  ;;  %v5409_v23 = vadd.f32 %v5408_v19, %v5407_v18 }
0x1a3f   :  { %v5377_v28 = vadd.f32 %v5376_v25, %v5374_v20  ;;  %v5411_v35 = vadd.f32 %v5410_v26, %v5409_v23 }
0x1a41   :  { %v5378_v37 = vrot.slane %v5377_v28, 4  ;;  %v5412_v31 = vrot.slane %v5411_v35, 4 }
0x1a43   :  { %v5379_v63 = vadd.f32 %v5378_v37, %v5377_v28  ;;  %v5413_v38 = vadd.f32 %v5412_v31, %v5411_v35 }
0x1a45   :  { %v5380_v36 = vrot.slane %v5379_v63, 2  ;;  %v5414_v54 = vrot.slane %v5413_v38, 2 }
0x1a47   :  { %v5381_v39 = vadd.f32 %v5380_v36, %v5379_v63  ;;  %v5415_v4 = vadd.f32 %v5414_v54, %v5413_v38 }
0x1a49   :  { %v5382_v40 = vrot.slane %v5381_v39, 1  ;;  %v5416_v41 = vrot.slane %v5415_v4, 1 }
0x1a4b   :  { %v5383_v42 = vadd.f32 %v5382_v40, %v5381_v39  ;;  %v5417_v43 = vadd.f32 %v5416_v41, %v5415_v4 }
0x1a4d   :  { %v5384_v3 = vmul.f32 0.037037037, %v5383_v42  ;;  %v5418_v7 = vmul.f32 0.037037037, %v5417_v43 }
0x1a4f   :  { %v5388_v44 = vmul.f32 %v5384_v3, %v8357_v59  ;;  %v5389_v51 = vmul.f32 0.0, %v5384_v3  ;;  %v5419_v11 = vmul.f32 0.0, %v5418_v7  ;;  %v5422_v21 = vmul.f32 %v5418_v7, %v8365_v22 }
0x1a50   :  { %v5425_v17 = vmul.f32 %v5418_v7, %v8385_v9 }
0x1a51   :  { %v5426_v50 = vadd.f32 %v5419_v11, %v5384_v3  ;;  %v5429_v12 = vadd.f32 %v5422_v21, %v5388_v44  ;;  %v5430_v32 = vadd.f32 %v5418_v7, %v5389_v51 }
0x1a52   :  { %v5432_v47 = vadd.f32 %v5425_v17, %v5389_v51 }
0x1a53   :  { %v8399_v1 = vsub.f32 %v8354_v49, %v5426_v50  ;;  %v8402_v29 = vsub.f32 %v8367_v53, %v5426_v50  ;;  %v8405_v45 = vsub.f32 %v8351_v56, %v5426_v50  ;;  %v8408_v6 = vsub.f32 %v8361_v60, %v5429_v12 }
0x1a54   :  { %v8410_v46 = vsub.f32 %v5287_v34, %v5430_v32  ;;  %v8412_v5 = vsub.f32 %v5290_v48, %v5430_v32  ;;  %v8414_v62 = vsub.f32 %v7002_v8, %v5432_v47 }
0x1a55   :  { %v5440_v24 = vmul.f32 %v8399_v1, %v8399_v1  ;;  %v5441_v49 = vmul.f32 %v8402_v29, %v8402_v29  ;;  %v5442_v53 = vmul.f32 %v8405_v45, %v8405_v45  ;;  %v5443_v56 = vmul.f32 %v8408_v6, %v8408_v6 }
0x1a56   :  { %v5444_v60 = vmul.f32 %v8410_v46, %v8410_v46  ;;  %v5445_v34 = vmul.f32 %v8412_v5, %v8412_v5  ;;  %v5446_v58 = vmul.f32 %v8414_v62, %v8414_v62 }
0x1a57   :  { %v5450_v8 = vmul.f32 %v5443_v56, %v8357_v59  ;;  %v5454_v33 = vsel %vm645_vm5, %v5440_v24, 0.0  ;;  %v5455_v52 = vsel %vm645_vm5, %v5441_v49, 0.0  ;;  %v5457_v27 = vsel %vm645_vm5, %v5442_v53, 0.0 }
0x1a58   :  { %v5456_v2 = vadd.f32 %v5455_v52, %v5454_v33  ;;  %v5451_v55 = vmul.f32 0.0, %v5444_v60  ;;  %v5481_v10 = vmul.f32 0.0, %v5440_v24  ;;  %v5482_v48 = vmul.f32 0.0, %v5441_v49 }
0x1a59   :  { %v5483_v13 = vmul.f32 0.0, %v5442_v53  ;;  %v5452_v57 = vmul.f32 0.0, %v5445_v34  ;;  %v5459_v16 = vsel %vm645_vm5, %v5450_v8, 0.0  ;;  %v5484_v30 = vmul.f32 %v5443_v56, %v8365_v22 }
0x1a5a   :  { %v5458_v15 = vadd.f32 %v5457_v27, %v5456_v2  ;;  %v5488_v18 = vsel %vm645_vm5, %v5481_v10, 0.0  ;;  %v5489_v14 = vsel %vm645_vm5, %v5482_v48, 0.0  ;;  %v5453_v23 = vmul.f32 0.0, %v5446_v58 }
0x1a5b   :  { %v5490_v20 = vadd.f32 %v5489_v14, %v5488_v18  ;;  %v5461_v25 = vsel %vm645_vm5, %v5451_v55, 0.0  ;;  %v5491_v26 = vsel %vm645_vm5, %v5483_v13, 0.0  ;;  %v5463_v37 = vsel %vm645_vm5, %v5452_v57, 0.0 }
0x1a5c   :  { %v5460_v19 = vadd.f32 %v5459_v16, %v5458_v15  ;;  %v5493_v31 = vsel %vm645_vm5, %v5484_v30, 0.0  ;;  %v5465_v36 = vsel %vm5375_vm3, %v5453_v23, 0.0  ;;  %v5487_v54 = vmul.f32 %v5446_v58, %v8385_v9 }
0x1a5d   :  { %v5492_v35 = vadd.f32 %v5491_v26, %v5490_v20  ;;  %v5495_v39 = vsel %vm645_vm5, %v5444_v60, 0.0  ;;  %v5497_v41 = vsel %vm645_vm5, %v5445_v34, 0.0 }
0x1a5e   :  { %v5462_v28 = vadd.f32 %v5461_v25, %v5460_v19  ;;  %v5499_v3 = vsel %vm5375_vm3, %v5487_v54, 0.0 }
0x1a5f   :  { %v5494_v38 = vadd.f32 %v5493_v31, %v5492_v35 }
0x1a60   :  { %v5464_v63 = vadd.f32 %v5463_v37, %v5462_v28 }
0x1a61   :  { %v5496_v40 = vadd.f32 %v5495_v39, %v5494_v38 }
0x1a62   :  { %v5466_v4 = vadd.f32 %v5465_v36, %v5464_v63 }
0x1a63   :  { %v5498_v43 = vadd.f32 %v5497_v41, %v5496_v40 }
0x1a64   :  { %v5467_v42 = vrot.slane %v5466_v4, 4 }
0x1a65   :  { %v5500_v44 = vadd.f32 %v5499_v3, %v5498_v43 }
0x1a66   :  { %v5468_v7 = vadd.f32 %v5467_v42, %v5466_v4 }
0x1a67   :  { %v5501_v11 = vrot.slane %v5500_v44, 4 }
0x1a68   :  { %v5469_v51 = vrot.slane %v5468_v7, 2 }
0x1a69   :  { %v5502_v17 = vadd.f32 %v5501_v11, %v5500_v44 }
0x1a6a   :  { %v5470_v21 = vadd.f32 %v5469_v51, %v5468_v7 }
0x1a6b   :  { %v5503_v12 = vrot.slane %v5502_v17, 2 }
0x1a6c   :  { %v5471_v50 = vrot.slane %v5470_v21, 1 }
0x1a6d   :  { %v5504_v47 = vadd.f32 %v5503_v12, %v5502_v17 }
0x1a6e   :  { %v5472_v32 = vadd.f32 %v5471_v50, %v5470_v21 }
0x1a6f   :  { %v5505_v49 = vrot.slane %v5504_v47, 1 }
0x1a70   :  { %v5473_v24 = vmul.f32 0.037037037, %v5472_v32 }
0x1a71   :  { %v5506_v56 = vadd.f32 %v5505_v49, %v5504_v47  ;;  %v7359_v49 = vld [vmem:[%s8555_s1 + $0x100] sm:$0xff]  }
0x1a72   :  { %v5478_v53 = vmul.f32 0.0, %v5473_v24  ;;  %v5477_v34 = vmul.f32 %v5473_v24, %v8357_v59 }
0x1a73   :  { %v5507_v60 = vmul.f32 0.037037037, %v5506_v56 }
0x1a75   :  { %v5508_v8 = vmul.f32 0.0, %v5507_v60  ;;  %v5519_v33 = vadd.f32 %v5507_v60, %v5478_v53  ;;  %v5511_v52 = vmul.f32 %v5507_v60, %v8365_v22  ;;  %v5514_v58 = vmul.f32 %v5507_v60, %v8385_v9 }
0x1a77   :  { %v5515_v2 = vadd.f32 %v5508_v8, %v5473_v24  ;;  %v5526_v27 = vadd.f32 1e-05, %v5519_v33  ;;  %v5518_v55 = vadd.f32 %v5511_v52, %v5477_v34  ;;  %v5521_v10 = vadd.f32 %v5514_v58, %v5478_v53  ;;  %v7358_v24 = vld [vmem:[%s8555_s1 + $0xf8] sm:$0xff]   ;;  %v7360_v52 = vld [vmem:[%s8555_s1 + $0x108] sm:$0x1f]  }
0x1a78   :  { %v7361_v58 = vld [vmem:[%s8555_s1 + $0x68] sm:$0xff]  }
0x1a79   :  { %v5522_v48 = vadd.f32 1e-05, %v5515_v2  ;;  %7413 = vrsqrt.f32 %v5526_v27  ;;  %v5525_v13 = vadd.f32 1e-05, %v5518_v55  ;;  %v5528_v57 = vadd.f32 1e-05, %v5521_v10 }
0x1a7b   :  { %7415 = vrsqrt.f32 %v5522_v48 }
0x1a7c   :  { %7417 = vrsqrt.f32 %v5525_v13 }
0x1a7d   :  { %7419 = vrsqrt.f32 %v5528_v57 }
0x1a83   :  { %v7414_v15 = vpop.eup %7413 }
0x1a84   :  { %v5540_v59 = vmul.f32 %v7414_v15, %v8410_v46  ;;  %v5541_v16 = vmul.f32 %v7414_v15, %v8412_v5  ;;  %v7362_v15 = vld [vmem:[%s8555_s1 + $0x70] sm:$0xff]  }
0x1a85   :  { %v7416_v30 = vpop.eup %7415 }
0x1a86   :  { %v7418_v22 = vpop.eup %7417  ;;  %v5548_v18 = vmax.f32 %v5541_v16, 0.0  ;;  %v5536_v9 = vmul.f32 %v7416_v30, %v8399_v1  ;;  %v5537_v14 = vmul.f32 %v7416_v30, %v8402_v29  ;;  %v5538_v19 = vmul.f32 %v7416_v30, %v8405_v45  ;;  %v7364_v16 = vld [vmem:[%s8555_s1 + $0x80] sm:$0x1f]   ;;  %v7365_v30 = vld [vmem:[%s8555_s1 + $0x178] sm:$0xff]  }
0x1a87   :  { %v7420_v20 = vpop.eup %7419  ;;  %v5539_v23 = vmul.f32 %v7418_v22, %v8408_v6  ;;  %v5547_v25 = vmax.f32 %v5540_v59, 0.0  ;;  %v7363_v59 = vld [vmem:[%s8555_s1 + $0x78] sm:$0xff]  }
0x1a88   :  { %v5543_v26 = vmax.f32 %v5536_v9, 0.0  ;;  %v5544_v28 = vmax.f32 %v5537_v14, 0.0  ;;  %v5545_v35 = vmax.f32 %v5538_v19, 0.0  ;;  %v5542_v46 = vmul.f32 %v7420_v20, %v8414_v62  ;;  %v7366_v9 = vld [vmem:[%s8555_s1 + $0x180] sm:$0xff]   ;;  %v7367_v14 = vld [vmem:[%s8555_s1 + $0x188] sm:$0xff]  }
0x1a89   :  { %v5546_v37 = vmax.f32 %v5539_v23, 0.0  ;;  %v5552_v5 = vpack.c.bf16 %v5548_v18, %v5547_v25  ;;  %v7368_v19 = vld [vmem:[%s8555_s1 + $0x190] sm:$0x1f]  }
0x1a8a   :  { %v5550_v31 = vpack.c.bf16 %v5544_v28, %v5543_v26  ;;  %v5549_v1 = vmax.f32 %v5542_v46, 0.0 }
0x1a8b   :  { %v5551_v63 = vpack.c.bf16 %v5546_v37, %v5545_v35 }
0x1a8c   :  { %6368 = vmatmul.mubr.msk.bf16.vlgmr.msra.gmra.mrb[148].mxu0 %vm645_vm5, %v5550_v31  ;;  %v5553_v29 = vpack.c.bf16 %v5549_v1, %v5549_v1 }
0x1a8d   :  { %5628 = vmatprep.mubr.bf16.mxu0 %v7450_v0  ;;  %7005 = vmatpush3.bf16.msra.mxu0 %v8347_v61  ;;  %v7357_v61 = vld [vmem:[%s8555_s1 + $0xf0] sm:$0xff]  }
0x1a8e   :  { %7022 = vmatprep.mubr.msk.bf16.mxu1 %vm5765_vm4, %v7357_v61 }
0x1a94   :  { %6369 = vmatmul.mubr.msk.bf16.gmra.mrb[152].mxu0 %vm645_vm5, %v5551_v63 }
0x1a95   :  { %5638 = vmatprep.mubr.bf16.mxu0 %v7450_v0 }
0x1a9c   :  { %6370 = vmatmul.mubr.msk.bf16.gmra.mrb[156].mxu0 %vm645_vm5, %v5552_v5 }
0x1a9d   :  { %5648 = vmatprep.mubr.bf16.mxu0 %v7450_v0 }
0x1aa4   :  { %6371 = vmatmul.mubr.msk.bf16.gmra.mrb[160].mxu0 %vm645_vm5, %v5553_v29 }
0x1aa5   :  { %7006 = vmatprep.mubr.msk.bf16.mxu0 %vm645_vm5, %v5550_v31 }
0x1aac   :  { %7007 = vmatmul.mubr.msk.bf16.vlgmr.msra.gmra.mrb[164].mxu0 %vm645_vm5, %v5551_v63 }
0x1aad   :  { %7010 = vmatprep.mubr.msk.bf16.mxu0 %vm645_vm5, %v5552_v5 }
0x1ab4   :  { %7011 = vmatmul.mubr.msk.bf16.gmra.mrb[168].mxu0 %vm645_vm5, %v5553_v29  ;;  %vm5778_vm5 = vcmask 1042432  }
0x1b5f   :  { %v5620_v0 = vpop.f32.mrb[148].mxu0 }
0x1b60   :  { %v5622_v45 = vpop.f32.mrb[149].mxu0 }
0x1b61   :  { %v5624_v6 = vpop.f32.mrb[150].mxu0 }
0x1b62   :  { %v5729_v62 = vpack.c.bf16 %v5624_v6, %v5620_v0  ;;  %v5626_v38 = vpop.f32.mrb[151].mxu0 }
0x1b63   :  { %v5741_v36 = vpack.c.bf16 %v5626_v38, %v5622_v45 }
0x1b65   :  { %7014 = vmatprep.subr.bf16.mxu1 %v5741_v36 }
0x1b66   :  { %7015 = vmatpush3.bf16.msra.mxu1 %v5741_v36 }
0x1b67   :  { %v5630_v54 = vpop.f32.mrb[152].mxu0 }
0x1b68   :  { %v5632_v39 = vpop.f32.mrb[153].mxu0 }
0x1b69   :  { %v5634_v4 = vpop.f32.mrb[154].mxu0 }
0x1b6a   :  { %v5730_v40 = vpack.c.bf16 %v5634_v4, %v5630_v54  ;;  %v5636_v41 = vpop.f32.mrb[155].mxu0 }
0x1b6b   :  { %v5742_v42 = vpack.c.bf16 %v5636_v41, %v5632_v39 }
0x1b6d   :  { %7016 = vmatprep.subr.bf16.mxu1 %v5742_v42 }
0x1b6e   :  { %7017 = vmatpush3.bf16.msra.mxu1 %v5742_v42 }
0x1b6f   :  { %v5640_v43 = vpop.f32.mrb[156].mxu0 }
0x1b70   :  { %v5642_v3 = vpop.f32.mrb[157].mxu0 }
0x1b71   :  { %v5644_v7 = vpop.f32.mrb[158].mxu0 }
0x1b72   :  { %v5731_v44 = vpack.c.bf16 %v5644_v7, %v5640_v43  ;;  %v5646_v51 = vpop.f32.mrb[159].mxu0 }
0x1b73   :  { %v5743_v11 = vpack.c.bf16 %v5646_v51, %v5642_v3 }
0x1b75   :  { %7018 = vmatprep.subr.bf16.mxu1 %v5743_v11 }
0x1b76   :  { %7019 = vmatpush3.bf16.msra.mxu1 %v5743_v11 }
0x1b77   :  { %v5650_v21 = vpop.f32.mrb[160].mxu0 }
0x1b78   :  { %v5652_v17 = vpop.f32.mrb[161].mxu0  ;;  %v5732_v2 = vpack.c.bf16 %v5650_v21, %v5650_v21 }
0x1b79   :  { %v5744_v50 = vpack.c.bf16 %v5652_v17, %v5652_v17  ;;  %v5654_v12 = vpop.f32.mrb[162].mxu0 }
0x1b7a   :  { %v5655_v32 = vpop.f32.mrb[163].mxu0  ;;  %v5880_v13 = vsel %vm5778_vm5, %v5732_v2, 0 }
0x1b7b   :  { %v5780_v47 = vsel %vm5778_vm5, %v5744_v50, 0  ;;  %7136 = vmatprep.subr.msk.bf16.mxu1 %vm5778_vm5, %v5744_v50 }
0x1b7c   :  { %7021 = vmatpush3.bf16.msra.mxu1 %v5780_v47 }
0x1b7d   :  { %7030 = vmatprep.subr.bf16.mxu1 %v5729_v62 }
0x1b7f   :  { %v7008_v53 = vpop.f32.mrb[164].mxu0  ;;  %7023 = vmatmul.mubr.msk.bf16.vlgmr.msra.gmra.mrb[104].mxu1 %vm5765_vm4, %v7358_v24 }
0x1b80   :  { %v5691_v56 = vpop.f32.mrb[165].mxu0  ;;  %7031 = vmatpush3.bf16.msra.mxu1 %v5729_v62  ;;  %7026 = vmatprep.mubr.msk.bf16.mxu1 %vm5765_vm4, %v7359_v49 }
0x1b81   :  { %v7009_v60 = vpop.f32.mrb[166].mxu0  ;;  %7032 = vmatprep.subr.bf16.mxu1 %v5730_v40 }
0x1b82   :  { %v5956_v34 = vpack.c.bf16 %v7009_v60, %v7008_v53  ;;  %v5694_v8 = vpop.f32.mrb[167].mxu0 }
0x1b83   :  { %v5955_v33 = vpack.c.bf16 %v5694_v8, %v5691_v56 }
0x1b84   :  { %7033 = vmatpush3.bf16.msra.mxu1 %v5730_v40 }
0x1b85   :  { %7034 = vmatprep.subr.bf16.mxu1 %v5731_v44 }
0x1b87   :  { %v7012_v27 = vpop.f32.mrb[168].mxu0  ;;  %7027 = vmatmul.mubr.msk.bf16.gmra.mrb[108].mxu1 %vm5765_vm4, %v7360_v52 }
0x1b88   :  { %v5707_v55 = vpop.f32.mrb[169].mxu0  ;;  %7035 = vmatpush3.bf16.msra.mxu1 %v5731_v44  ;;  %7038 = vmatprep.mubr.msk.bf16.mxu1 %vm5765_vm4, %v7361_v58  ;;  %v5958_v22 = vpack.c.bf16 %v7012_v27, %v7012_v27 }
0x1b89   :  { %v7013_v10 = vpop.f32.mrb[170].mxu0  ;;  %7137 = vmatprep.subr.msk.bf16.mxu1 %vm5778_vm5, %v5732_v2 }
0x1b8a   :  { %v5710_v48 = vpop.f32.mrb[171].mxu0  ;;  %v5992_v18 = vsel %vm5778_vm5, %v5958_v22, 0 }
0x1b8b   :  { %v5957_v57 = vpack.c.bf16 %v5710_v48, %v5707_v55 }
0x1b8c   :  { %7037 = vmatpush3.bf16.msra.mxu1 %v5880_v13 }
0x1b8d   :  { %7046 = vmatprep.subr.bf16.mxu1 %v5955_v33 }
0x1b8f   :  { %7039 = vmatmul.mubr.msk.bf16.vlgmr.msra.gmra.mrb[104].mxu1 %vm5765_vm4, %v7362_v15 }
0x1b90   :  { %7047 = vmatpush3.bf16.msra.mxu1 %v5955_v33  ;;  %7042 = vmatprep.mubr.msk.bf16.mxu1 %vm5765_vm4, %v7363_v59 }
0x1b91   :  { %7048 = vmatprep.subr.bf16.mxu1 %v5956_v34 }
0x1b94   :  { %7049 = vmatpush3.bf16.msra.mxu1 %v5956_v34 }
0x1b95   :  { %7050 = vmatprep.subr.bf16.mxu1 %v5957_v57 }
0x1b97   :  { %7043 = vmatmul.mubr.msk.bf16.gmra.mrb[108].mxu1 %vm5765_vm4, %v7364_v16 }
0x1b98   :  { %7051 = vmatpush3.bf16.msra.mxu1 %v5957_v57  ;;  %7054 = vmatprep.mubr.msk.bf16.mxu1 %vm5765_vm4, %v7365_v30 }
0x1b99   :  { %7138 = vmatprep.subr.msk.bf16.mxu1 %vm5778_vm5, %v5958_v22 }
0x1b9c   :  { %7053 = vmatpush3.bf16.msra.mxu1 %v5992_v18 }
0x1b9f   :  { %7055 = vmatmul.mubr.msk.bf16.vlgmr.msra.gmra.mrb[104].mxu1 %vm5765_vm4, %v7366_v9 }
0x1ba0   :  { %7058 = vmatprep.mubr.msk.bf16.mxu1 %vm5765_vm4, %v7367_v14 }
0x1ba7   :  { %7059 = vmatmul.mubr.msk.bf16.gmra.mrb[108].mxu1 %vm5765_vm4, %v7368_v19 }
0x1c72   :  { %v7056_v20 = vpop.f32.mrb[104].mxu1 }
0x1c73   :  { %6069 = vst.msk [vmem:[%s8558_s4 + $0x10] sm:$0xff] %vm54_vm1, %v7056_v20  ;;  %v6028_v23 = vpop.f32.mrb[105].mxu1 }
0x1c74   :  { %6067 = vst.msk [vmem:[%s8558_s4] sm:$0xff] %vm54_vm1, %v6028_v23  ;;  %v7057_v25 = vpop.f32.mrb[106].mxu1 }
0x1c75   :  { %6070 = vst.msk [vmem:[%s8558_s4 + $0x18] sm:$0xff] %vm54_vm1, %v7057_v25  ;;  %v6031_v26 = vpop.f32.mrb[107].mxu1 }
0x1c76   :  { %6068 = vst.msk [vmem:[%s8558_s4 + $0x8] sm:$0xff] %vm54_vm1, %v6031_v26 }
0x1c7a   :  { %v7060_v28 = vpop.f32.mrb[108].mxu1 }
0x1c7b   :  { %6073 = vst.msk [vmem:[%s8558_s4 + $0x30] sm:$0xff] %vm54_vm1, %v7060_v28  ;;  %v6044_v35 = vpop.f32.mrb[109].mxu1 }
0x1c7c   :  { %6071 = vst.msk [vmem:[%s8558_s4 + $0x20] sm:$0xff] %vm54_vm1, %v6044_v35  ;;  %v7061_v46 = vpop.f32.mrb[110].mxu1 }
0x1c7d   :  { %6075 = vst.msk [vmem:[%s8558_s4 + $0x38] sm:$0x3] %vm6074_vm6, %v7061_v46  ;;  %v6047_v37 = vpop.f32.mrb[111].mxu1 }
0x1c7e   :  { %6072 = vst.msk [vmem:[%s8558_s4 + $0x28] sm:$0xff] %vm54_vm1, %v6047_v37 }
0x1c7f   :  { %6080 = vsyncpa [#allocation3], 1 }

</bundles_post_ra>
